<compile_context>
chip_gen: v7x
topology: tpu7x:2x2x1
jax: 0.10.0
libtpu: 0.0.40
codegen_flags: <defaults>
</compile_context>

<pallas_src>
import jax
import jax.numpy as jnp
from jax import lax
from jax.experimental import pallas as pl
from jax.experimental.pallas import tpu as pltpu

# stride-2 ConvTranspose (k=4, p=1) parity taps: output index 2m+r reads input
# index m+d with kernel index k, for (d, k) in _PARITY_TAPS[r].
_PARITY_TAPS = {0: ((-1, 3), (0, 1)), 1: ((0, 2), (1, 0))}
# stage-3 (ConvT k=3 s=1 p=1 over the 2Hx2W parity planes): union of
# (source-parity, plane-shift) pairs needed along each spatial direction.
_PAIRS = ((0, 0), (0, 1), (1, -1), (1, 0))


def _make_kernel(c_in, c_mid, c_half, H, W, N):
    """Builds the fused forward kernel for static shapes. N = batch * H * W."""
    PAD = W + 1                  # max |flat shift| is W + 1
    PB = N + 2 * PAD
    SHIFTS = tuple((dm, dn) for dm in (-1, 0, 1) for dn in (-1, 0, 1))

    def kernel(xin_ref, masks_ref, w1_ref, aff1_ref, w2_ref, aff2_ref,
               w3_ref, b3_ref, out_ref,
               padx_ref, padh1_ref, padh2_ref,
               stk1_ref, stk2_ref, stk3_ref):

        def shifted(scr_ref, prefix, rows, dm, dn):
            # plane[:, q + dm*W + dn], zeroed where the (dm, dn) neighbour of flat
            # position q falls outside its own sample's HxW image.
            off = dm * W + dn
            src = scr_ref[(*prefix, slice(0, rows), pl.ds(PAD + off, N))]
            if dm == 0 and dn == 0:
                return src
            return src * masks_ref[dm + 1, dn + 1]

        # ---- stage 0: concatenated input into a zero-bordered plane scratch.
        #      Only the PAD borders are zeroed; the interior is fully overwritten.
        zb_in = jnp.zeros((c_in, PAD), jnp.float32)
        padx_ref[:, 0:PAD] = zb_in
        padx_ref[:, PAD + N:PB] = zb_in
        padx_ref[:, PAD:PAD + N] = xin_ref[...]

        # ---- stage 1: joining_layer Conv2d(c_in -> c_mid, 3x3, p=1) + BN + ReLU.
        #      Build each masked shifted plane once into a (9*c_in, N) stack,
        #      then a single MXU matmul.
        for t, (dm, dn) in enumerate(SHIFTS):
            stk1_ref[t * c_in:(t + 1) * c_in, :] = shifted(padx_ref, (), c_in, dm, dn)
        h1 = jnp.dot(w1_ref[...], stk1_ref[...], preferred_element_type=jnp.float32)
        h1 = jnp.maximum(h1 * aff1_ref[0] + aff1_ref[1], 0.0)

        zb_mid = jnp.zeros((c_mid, PAD), jnp.float32)
        padh1_ref[:, 0:PAD] = zb_mid
        padh1_ref[:, PAD + N:PB] = zb_mid
        padh1_ref[:, PAD:PAD + N] = h1

        # ---- stage 2: upsample_layer ConvT2d(c_mid -> c_half, 4x4, s=2, p=1)
        #      + BN + ReLU.  One (4*c_half, 9*c_mid) @ (9*c_mid, N) matmul
        #      produces all 4 output-parity planes at once.
        for t, (dm, dn) in enumerate(SHIFTS):
            stk2_ref[t * c_mid:(t + 1) * c_mid, :] = shifted(padh1_ref, (), c_mid, dm, dn)
        h2 = jnp.dot(w2_ref[...], stk2_ref[...], preferred_element_type=jnp.float32)
        h2 = jnp.maximum(h2 * aff2_ref[0] + aff2_ref[1], 0.0)        # (4*c_half, N)
        out_ref[0:4 * c_half, :] = h2            # first module output (parity layout)

        zb_half = jnp.zeros((c_half, PAD), jnp.float32)
        for ry in (0, 1):
            for rx in (0, 1):
                q = 2 * ry + rx
                padh2_ref[ry, rx, :, 0:PAD] = zb_half
                padh2_ref[ry, rx, :, PAD + N:PB] = zb_half
                padh2_ref[ry, rx, :, PAD:PAD + N] = h2[q * c_half:(q + 1) * c_half, :]

        # ---- stage 3: image_net ConvT2d(c_half -> 3, 3x3, s=1, p=1) + sigmoid,
        #      on the 2Hx2W feature map held as 4 parity planes.  The 16 distinct
        #      (source-parity, shift) reads are stacked once -> one (12, 16*c_half)
        #      matmul produces all 4 output parities.
        for s, (ai, bi) in enumerate((a, b) for a in range(4) for b in range(4)):
            py, dm = _PAIRS[ai]
            px, dn = _PAIRS[bi]
            stk3_ref[s * c_half:(s + 1) * c_half, :] = shifted(
                padh2_ref, (py, px), c_half, dm, dn)
        logits = jnp.dot(w3_ref[...], stk3_ref[...], preferred_element_type=jnp.float32)
        logits = logits + b3_ref[...]
        out_ref[4 * c_half:4 * c_half + 12, :] = 1.0 / (1.0 + jnp.exp(-logits))

    return kernel, PB


def generator_type_2_forward(condition, prev_output, params):
    """condition: (Dc,) or (B, Dc); prev_output: (C, H, W) or (B, C, H, W).
    Returns (out, out_image) with shapes ((B,) C//2, 2H, 2W) / ((B,) 3, 2H, 2W)."""
    squeeze = prev_output.ndim == 3
    if squeeze:
        prev_output = prev_output[None]
        condition = condition[None] if condition.ndim == 1 else condition
    B, C, H, W = prev_output.shape
    Dc = condition.shape[-1]
    c_in, c_mid, c_half = C + Dc, C, C // 2
    P = H * W
    N = B * P

    # Steps (1)+(2) of the reference forward: broadcast condition over (H, W),
    # concat with prev_output on channels; flatten (batch, spatial) to the lane axis.
    cond_rep = jnp.broadcast_to(condition.reshape(B, Dc, 1, 1), (B, Dc, H, W))
    x = jnp.concatenate([cond_rep, prev_output], axis=1).astype(jnp.float32)
    xin = jnp.transpose(x, (1, 0, 2, 3)).reshape(c_in, N)

    # Validity masks for the 9 flat-spatial shifts, tiled per sample along lanes
    # (so shifts never leak across sample boundaries).
    m = jnp.arange(P, dtype=jnp.int32) // W
    n = jnp.arange(P, dtype=jnp.int32) % W
    base = jnp.stack([
        jnp.stack([
            (((m + dm) >= 0) & ((m + dm) < H) &
             ((n + dn) >= 0) & ((n + dn) < W)).astype(jnp.float32)
            for dn in (-1, 0, 1)])
        for dm in (-1, 0, 1)])                              # (3, 3, P)
    masks = jnp.tile(base, (1, 1, B)).reshape(3, 3, 1, N)

    # ---- fold conv bias + inference-mode BatchNorm into per-channel affines.
    def fold_bn(bias, gamma, beta, mean, var, eps=1e-5):
        scale = gamma / jnp.sqrt(var + eps)
        shift = beta + scale * (bias - mean)
        return scale, shift

    s1, t1 = fold_bn(params["b1"], params["bn1_gamma"], params["bn1_beta"],
                     params["bn1_mean"], params["bn1_var"])
    aff1 = jnp.stack([s1, t1]).reshape(2, c_mid, 1)
    s2, t2 = fold_bn(params["b2"], params["bn2_gamma"], params["bn2_beta"],
                     params["bn2_mean"], params["bn2_var"])
    aff2 = jnp.stack([jnp.tile(s2, 4), jnp.tile(t2, 4)]).reshape(2, 4 * c_half, 1)
    b3 = jnp.tile(params["b3"], 4).reshape(4 * 3, 1)

    # ---- tap-stacked weight matrices (one MXU matmul per stage).
    # stage 1: (c_mid, 9*c_in); column block t = (dm+1)*3 + (dn+1) == ky*3 + kx.
    w1s = jnp.transpose(params["w1"], (0, 2, 3, 1)).reshape(c_mid, 9 * c_in)

    # stage 2: (4*c_half, 9*c_mid); rows grouped by output parity q = 2*ry + rx.
    w2t = jnp.transpose(params["w2"], (2, 3, 1, 0))               # (ky, kx, out, in)
    w2s = jnp.zeros((4 * c_half, 9 * c_mid), jnp.float32)
    for ry in (0, 1):
        for rx in (0, 1):
            q = 2 * ry + rx
            for dm, ky in _PARITY_TAPS[ry]:
                for dn, kx in _PARITY_TAPS[rx]:
                    t = (dm + 1) * 3 + (dn + 1)
                    w2s = w2s.at[q * c_half:(q + 1) * c_half,
                                 t * c_mid:(t + 1) * c_mid].set(w2t[ky, kx])

    # stage 3: (12, 16*c_half); ConvT k3 s1 p1 == conv with the flipped kernel.
    w3t = jnp.transpose(params["w3"], (2, 3, 1, 0))[::-1, ::-1]   # (dy+1, dx+1, out, in)
    w3s = jnp.zeros((4 * 3, 16 * c_half), jnp.float32)
    for ry in (0, 1):
        for rx in (0, 1):
            q = 2 * ry + rx
            for dy in (-1, 0, 1):
                ry_src = (ry + dy) % 2
                ai = _PAIRS.index((ry_src, (ry + dy - ry_src) // 2))
                for dx in (-1, 0, 1):
                    rx_src = (rx + dx) % 2
                    bi = _PAIRS.index((rx_src, (rx + dx - rx_src) // 2))
                    s = ai * 4 + bi
                    w3s = w3s.at[q * 3:(q + 1) * 3,
                                 s * c_half:(s + 1) * c_half].set(w3t[dy + 1, dx + 1])

    kernel, PB = _make_kernel(c_in, c_mid, c_half, H, W, N)
    vmem = pl.BlockSpec(memory_space=pltpu.MemorySpace.VMEM)
    slab = pl.pallas_call(
        kernel,
        out_shape=jax.ShapeDtypeStruct((4 * c_half + 12, N), jnp.float32),
        in_specs=[vmem] * 8,
        out_specs=vmem,
        scratch_shapes=[
            pltpu.VMEM((c_in, PB), jnp.float32),            # zero-bordered concat input
            pltpu.VMEM((c_mid, PB), jnp.float32),           # zero-bordered h1
            pltpu.VMEM((2, 2, c_half, PB), jnp.float32),    # zero-bordered h2 parity planes
            pltpu.VMEM((9 * c_in, N), jnp.float32),         # stage-1 stacked taps
            pltpu.VMEM((9 * c_mid, N), jnp.float32),        # stage-2 stacked taps
            pltpu.VMEM((16 * c_half, N), jnp.float32),      # stage-3 stacked taps
        ],
    )(xin, masks, w1s, aff1, w2s, aff2, w3s, b3)

    # De-interleave the stride-2 parity planes back to full resolution:
    # slab[q*ch + c, b*P + m*W + n] = full[b, c, 2m + q//2, 2n + q%2].
    def unpack(rows, ch):
        r = rows.reshape(2, 2, ch, B, H, W)
        return jnp.transpose(r, (3, 2, 4, 0, 5, 1)).reshape(B, ch, 2 * H, 2 * W)

    out = unpack(slab[:4 * c_half], c_half)
    out_image = unpack(slab[4 * c_half:], 3)
    if squeeze:
        out, out_image = out[0], out_image[0]
    return out, out_image


def _torch_style_reference(condition, prev_output, p, eps=1e-5):
    """Independent XLA reference (lax convolutions, PyTorch layouts)."""
    hp = lax.Precision.HIGHEST
    squeeze = prev_output.ndim == 3
    if squeeze:
        prev_output = prev_output[None]
        condition = condition[None] if condition.ndim == 1 else condition
    B, C, H, W = prev_output.shape
    Dc = condition.shape[-1]
    dnum = ("NCHW", "OIHW", "NCHW")

    def bn(x, g, b, mean, var):
        r = lambda v: v.reshape(1, -1, 1, 1)
        return (x - r(mean)) / jnp.sqrt(r(var) + eps) * r(g) + r(b)

    cond_rep = jnp.broadcast_to(condition.reshape(B, Dc, 1, 1), (B, Dc, H, W))
    x = jnp.concatenate([cond_rep, prev_output], axis=1)

    h = lax.conv_general_dilated(x, p["w1"], (1, 1), ((1, 1), (1, 1)),
                                 dimension_numbers=dnum, precision=hp)
    h = h + p["b1"].reshape(1, -1, 1, 1)
    h = jnp.maximum(bn(h, p["bn1_gamma"], p["bn1_beta"], p["bn1_mean"], p["bn1_var"]), 0.0)

    w2eq = jnp.flip(jnp.transpose(p["w2"], (1, 0, 2, 3)), axis=(2, 3))
    u = lax.conv_general_dilated(h, w2eq, (1, 1), ((2, 2), (2, 2)),
                                 lhs_dilation=(2, 2), dimension_numbers=dnum, precision=hp)
    u = u + p["b2"].reshape(1, -1, 1, 1)
    u = jnp.maximum(bn(u, p["bn2_gamma"], p["bn2_beta"], p["bn2_mean"], p["bn2_var"]), 0.0)

    w3eq = jnp.flip(jnp.transpose(p["w3"], (1, 0, 2, 3)), axis=(2, 3))
    img = lax.conv_general_dilated(u, w3eq, (1, 1), ((1, 1), (1, 1)),
                                   dimension_numbers=dnum, precision=hp)
    img = jax.nn.sigmoid(img + p["b3"].reshape(1, -1, 1, 1))
    if squeeze:
        return u[0], img[0]
    return u, img


if __name__ == "__main__":
    # Small shapes consistent with the module: in_chans=8, condition_dim=4, 16x16, batch=2.
    B, C, Dc, H, W = 2, 8, 4, 16, 16
    C2 = C // 2

    key = jax.random.PRNGKey(0)
    k = jax.random.split(key, 20)

    condition = jax.random.normal(k[0], (B, Dc), jnp.float32)
    prev_output = jax.random.normal(k[1], (B, C, H, W), jnp.float32)

    params = {
        # joining_layer: Conv2d(C+Dc -> C, 3, 1, 1) + BatchNorm2d(C)
        "w1": 0.15 * jax.random.normal(k[2], (C, C + Dc, 3, 3), jnp.float32),
        "b1": 0.1 * jax.random.normal(k[3], (C,), jnp.float32),
        "bn1_gamma": 1.0 + 0.1 * jax.random.normal(k[4], (C,), jnp.float32),
        "bn1_beta": 0.1 * jax.random.normal(k[5], (C,), jnp.float32),
        "bn1_mean": 0.1 * jax.random.normal(k[6], (C,), jnp.float32),
        "bn1_var": jax.random.uniform(k[7], (C,), jnp.float32, 0.5, 1.5),
        # upsample_layer: ConvTranspose2d(C -> C/2, 4, 2, 1) + BatchNorm2d(C/2)
        "w2": 0.15 * jax.random.normal(k[8], (C, C2, 4, 4), jnp.float32),
        "b2": 0.1 * jax.random.normal(k[9], (C2,), jnp.float32),
        "bn2_gamma": 1.0 + 0.1 * jax.random.normal(k[10], (C2,), jnp.float32),
        "bn2_beta": 0.1 * jax.random.normal(k[11], (C2,), jnp.float32),
        "bn2_mean": 0.1 * jax.random.normal(k[12], (C2,), jnp.float32),
        "bn2_var": jax.random.uniform(k[13], (C2,), jnp.float32, 0.5, 1.5),
        # image_net: ConvTranspose2d(C/2 -> 3, 3, 1, 1) + Sigmoid
        "w3": 0.15 * jax.random.normal(k[14], (C2, 3, 3, 3), jnp.float32),
        "b3": 0.1 * jax.random.normal(k[15], (3,), jnp.float32),
    }

    fwd = jax.jit(generator_type_2_forward)

    # Batched path (batch flattened onto the lane axis).
    out, out_image = fwd(condition, prev_output, params)
    jax.block_until_ready((out, out_image))
    assert out.shape == (B, C2, 2 * H, 2 * W)
    assert out_image.shape == (B, 3, 2 * H, 2 * W)

    ref_out, ref_img = _torch_style_reference(condition, prev_output, params)
    assert jnp.allclose(out, ref_out, atol=2e-3, rtol=2e-3), \
        f"out mismatch, max abs err {float(jnp.max(jnp.abs(out - ref_out)))}"
    assert jnp.allclose(out_image, ref_img, atol=2e-3, rtol=2e-3), \
        f"out_image mismatch, max abs err {float(jnp.max(jnp.abs(out_image - ref_img)))}"

    # Single-sample path (module docstring shapes: condition (Dc,), prev (C, H, W)).
    out1, img1 = fwd(condition[0], prev_output[0], params)
    jax.block_until_ready((out1, img1))
    assert out1.shape == (C2, 2 * H, 2 * W) and img1.shape == (3, 2 * H, 2 * W)
    assert jnp.allclose(out1, ref_out[0], atol=2e-3, rtol=2e-3)
    assert jnp.allclose(img1, ref_img[0], atol=2e-3, rtol=2e-3)

    print("KERNEL_OK")
</pallas_src>

<mosaic_0001>
module attributes {stable_mosaic.version = 11 : i64} {
  func.func @kernel(%arg0: memref<12x512xf32, #tpu.memory_space<vmem>>, %arg1: memref<3x3x1x512xf32, #tpu.memory_space<vmem>>, %arg2: memref<8x108xf32, #tpu.memory_space<vmem>>, %arg3: memref<2x8x1xf32, #tpu.memory_space<vmem>>, %arg4: memref<16x72xf32, #tpu.memory_space<vmem>>, %arg5: memref<2x16x1xf32, #tpu.memory_space<vmem>>, %arg6: memref<12x64xf32, #tpu.memory_space<vmem>>, %arg7: memref<12x1xf32, #tpu.memory_space<vmem>>, %arg8: memref<28x512xf32, #tpu.memory_space<vmem>>, %arg9: memref<12x546xf32, #tpu.memory_space<vmem>>, %arg10: memref<8x546xf32, #tpu.memory_space<vmem>>, %arg11: memref<2x2x4x546xf32, #tpu.memory_space<vmem>>, %arg12: memref<108x512xf32, #tpu.memory_space<vmem>>, %arg13: memref<72x512xf32, #tpu.memory_space<vmem>>, %arg14: memref<64x512xf32, #tpu.memory_space<vmem>>) attributes {dimension_semantics = [], scalar_prefetch = 0 : i64, scratch_operands = 6 : i64, tpu.core_type = #tpu.core_type<tc>} {
    %cst = arith.constant 0.000000e+00 : f32
    %0 = vector.broadcast %cst : f32 to vector<12x17xf32>
    %c0 = arith.constant 0 : index
    %c0_0 = arith.constant 0 : index
    %1 = vector.load %arg9[%c0, %c0_0] : memref<12x546xf32, #tpu.memory_space<vmem>>, vector<12x17xf32>
    tpu.vector_store %arg9[%c0, %c0_0], %0 {strides = array<i32>} : memref<12x546xf32, #tpu.memory_space<vmem>>, vector<12x17xf32>,
    %c0_1 = arith.constant 0 : index
    %c529 = arith.constant 529 : index
    %2 = vector.load %arg9[%c0_1, %c529] : memref<12x546xf32, #tpu.memory_space<vmem>>, vector<12x17xf32>
    tpu.vector_store %arg9[%c0_1, %c529], %0 {strides = array<i32>} : memref<12x546xf32, #tpu.memory_space<vmem>>, vector<12x17xf32>,
    %c0_2 = arith.constant 0 : index
    %c0_3 = arith.constant 0 : index
    %3 = vector.load %arg0[%c0_2, %c0_3] : memref<12x512xf32, #tpu.memory_space<vmem>>, vector<12x512xf32>
    %c0_4 = arith.constant 0 : index
    %c17 = arith.constant 17 : index
    %4 = vector.load %arg9[%c0_4, %c17] : memref<12x546xf32, #tpu.memory_space<vmem>>, vector<12x512xf32>
    tpu.vector_store %arg9[%c0_4, %c17], %3 {strides = array<i32>} : memref<12x546xf32, #tpu.memory_space<vmem>>, vector<12x512xf32>,
    %c0_5 = arith.constant 0 : index
    %c0_6 = arith.constant 0 : index
    %5 = vector.load %arg9[%c0_5, %c0_6] : memref<12x546xf32, #tpu.memory_space<vmem>>, vector<12x512xf32>
    %c0_7 = arith.constant 0 : index
    %c0_8 = arith.constant 0 : index
    %c0_9 = arith.constant 0 : index
    %c0_10 = arith.constant 0 : index
    %6 = vector.load %arg1[%c0_7, %c0_8, %c0_9, %c0_10] : memref<3x3x1x512xf32, #tpu.memory_space<vmem>>, vector<1x1x1x512xf32>
    %7 = vector.shape_cast %6 : vector<1x1x1x512xf32> to vector<1x512xf32>
    %8 = vector.broadcast %7 : vector<1x512xf32> to vector<12x512xf32>
    %9 = arith.mulf %5, %8 : vector<12x512xf32>
    %c0_11 = arith.constant 0 : index
    %c0_12 = arith.constant 0 : index
    %10 = vector.load %arg12[%c0_11, %c0_12] : memref<108x512xf32, #tpu.memory_space<vmem>>, vector<12x512xf32>
    tpu.vector_store %arg12[%c0_11, %c0_12], %9 {strides = array<i32>} : memref<108x512xf32, #tpu.memory_space<vmem>>, vector<12x512xf32>,
    %c0_13 = arith.constant 0 : index
    %c1 = arith.constant 1 : index
    %11 = vector.load %arg9[%c0_13, %c1] : memref<12x546xf32, #tpu.memory_space<vmem>>, vector<12x512xf32>
    %c0_14 = arith.constant 0 : index
    %c1_15 = arith.constant 1 : index
    %c0_16 = arith.constant 0 : index
    %c0_17 = arith.constant 0 : index
    %12 = vector.load %arg1[%c0_14, %c1_15, %c0_16, %c0_17] : memref<3x3x1x512xf32, #tpu.memory_space<vmem>>, vector<1x1x1x512xf32>
    %13 = vector.shape_cast %12 : vector<1x1x1x512xf32> to vector<1x512xf32>
    %14 = vector.broadcast %13 : vector<1x512xf32> to vector<12x512xf32>
    %15 = arith.mulf %11, %14 : vector<12x512xf32>
    %c12 = arith.constant 12 : index
    %c0_18 = arith.constant 0 : index
    %16 = vector.load %arg12[%c12, %c0_18] : memref<108x512xf32, #tpu.memory_space<vmem>>, vector<12x512xf32>
    tpu.vector_store %arg12[%c12, %c0_18], %15 {strides = array<i32>} : memref<108x512xf32, #tpu.memory_space<vmem>>, vector<12x512xf32>,
    %c0_19 = arith.constant 0 : index
    %c2 = arith.constant 2 : index
    %17 = vector.load %arg9[%c0_19, %c2] : memref<12x546xf32, #tpu.memory_space<vmem>>, vector<12x512xf32>
    %c0_20 = arith.constant 0 : index
    %c2_21 = arith.constant 2 : index
    %c0_22 = arith.constant 0 : index
    %c0_23 = arith.constant 0 : index
    %18 = vector.load %arg1[%c0_20, %c2_21, %c0_22, %c0_23] : memref<3x3x1x512xf32, #tpu.memory_space<vmem>>, vector<1x1x1x512xf32>
    %19 = vector.shape_cast %18 : vector<1x1x1x512xf32> to vector<1x512xf32>
    %20 = vector.broadcast %19 : vector<1x512xf32> to vector<12x512xf32>
    %21 = arith.mulf %17, %20 : vector<12x512xf32>
    %c24 = arith.constant 24 : index
    %c0_24 = arith.constant 0 : index
    %22 = vector.load %arg12[%c24, %c0_24] : memref<108x512xf32, #tpu.memory_space<vmem>>, vector<12x512xf32>
    tpu.vector_store %arg12[%c24, %c0_24], %21 {strides = array<i32>} : memref<108x512xf32, #tpu.memory_space<vmem>>, vector<12x512xf32>,
    %c0_25 = arith.constant 0 : index
    %c16 = arith.constant 16 : index
    %23 = vector.load %arg9[%c0_25, %c16] : memref<12x546xf32, #tpu.memory_space<vmem>>, vector<12x512xf32>
    %c1_26 = arith.constant 1 : index
    %c0_27 = arith.constant 0 : index
    %c0_28 = arith.constant 0 : index
    %c0_29 = arith.constant 0 : index
    %24 = vector.load %arg1[%c1_26, %c0_27, %c0_28, %c0_29] : memref<3x3x1x512xf32, #tpu.memory_space<vmem>>, vector<1x1x1x512xf32>
    %25 = vector.shape_cast %24 : vector<1x1x1x512xf32> to vector<1x512xf32>
    %26 = vector.broadcast %25 : vector<1x512xf32> to vector<12x512xf32>
    %27 = arith.mulf %23, %26 : vector<12x512xf32>
    %c36 = arith.constant 36 : index
    %c0_30 = arith.constant 0 : index
    %28 = vector.load %arg12[%c36, %c0_30] : memref<108x512xf32, #tpu.memory_space<vmem>>, vector<12x512xf32>
    tpu.vector_store %arg12[%c36, %c0_30], %27 {strides = array<i32>} : memref<108x512xf32, #tpu.memory_space<vmem>>, vector<12x512xf32>,
    %c0_31 = arith.constant 0 : index
    %c17_32 = arith.constant 17 : index
    %29 = vector.load %arg9[%c0_31, %c17_32] : memref<12x546xf32, #tpu.memory_space<vmem>>, vector<12x512xf32>
    %c48 = arith.constant 48 : index
    %c0_33 = arith.constant 0 : index
    %30 = vector.load %arg12[%c48, %c0_33] : memref<108x512xf32, #tpu.memory_space<vmem>>, vector<12x512xf32>
    tpu.vector_store %arg12[%c48, %c0_33], %29 {strides = array<i32>} : memref<108x512xf32, #tpu.memory_space<vmem>>, vector<12x512xf32>,
    %c0_34 = arith.constant 0 : index
    %c18 = arith.constant 18 : index
    %31 = vector.load %arg9[%c0_34, %c18] : memref<12x546xf32, #tpu.memory_space<vmem>>, vector<12x512xf32>
    %c1_35 = arith.constant 1 : index
    %c2_36 = arith.constant 2 : index
    %c0_37 = arith.constant 0 : index
    %c0_38 = arith.constant 0 : index
    %32 = vector.load %arg1[%c1_35, %c2_36, %c0_37, %c0_38] : memref<3x3x1x512xf32, #tpu.memory_space<vmem>>, vector<1x1x1x512xf32>
    %33 = vector.shape_cast %32 : vector<1x1x1x512xf32> to vector<1x512xf32>
    %34 = vector.broadcast %33 : vector<1x512xf32> to vector<12x512xf32>
    %35 = arith.mulf %31, %34 : vector<12x512xf32>
    %c60 = arith.constant 60 : index
    %c0_39 = arith.constant 0 : index
    %36 = vector.load %arg12[%c60, %c0_39] : memref<108x512xf32, #tpu.memory_space<vmem>>, vector<12x512xf32>
    tpu.vector_store %arg12[%c60, %c0_39], %35 {strides = array<i32>} : memref<108x512xf32, #tpu.memory_space<vmem>>, vector<12x512xf32>,
    %c0_40 = arith.constant 0 : index
    %c32 = arith.constant 32 : index
    %37 = vector.load %arg9[%c0_40, %c32] : memref<12x546xf32, #tpu.memory_space<vmem>>, vector<12x512xf32>
    %c2_41 = arith.constant 2 : index
    %c0_42 = arith.constant 0 : index
    %c0_43 = arith.constant 0 : index
    %c0_44 = arith.constant 0 : index
    %38 = vector.load %arg1[%c2_41, %c0_42, %c0_43, %c0_44] : memref<3x3x1x512xf32, #tpu.memory_space<vmem>>, vector<1x1x1x512xf32>
    %39 = vector.shape_cast %38 : vector<1x1x1x512xf32> to vector<1x512xf32>
    %40 = vector.broadcast %39 : vector<1x512xf32> to vector<12x512xf32>
    %41 = arith.mulf %37, %40 : vector<12x512xf32>
    %c72 = arith.constant 72 : index
    %c0_45 = arith.constant 0 : index
    %42 = vector.load %arg12[%c72, %c0_45] : memref<108x512xf32, #tpu.memory_space<vmem>>, vector<12x512xf32>
    tpu.vector_store %arg12[%c72, %c0_45], %41 {strides = array<i32>} : memref<108x512xf32, #tpu.memory_space<vmem>>, vector<12x512xf32>,
    %c0_46 = arith.constant 0 : index
    %c33 = arith.constant 33 : index
    %43 = vector.load %arg9[%c0_46, %c33] : memref<12x546xf32, #tpu.memory_space<vmem>>, vector<12x512xf32>
    %c2_47 = arith.constant 2 : index
    %c1_48 = arith.constant 1 : index
    %c0_49 = arith.constant 0 : index
    %c0_50 = arith.constant 0 : index
    %44 = vector.load %arg1[%c2_47, %c1_48, %c0_49, %c0_50] : memref<3x3x1x512xf32, #tpu.memory_space<vmem>>, vector<1x1x1x512xf32>
    %45 = vector.shape_cast %44 : vector<1x1x1x512xf32> to vector<1x512xf32>
    %46 = vector.broadcast %45 : vector<1x512xf32> to vector<12x512xf32>
    %47 = arith.mulf %43, %46 : vector<12x512xf32>
    %c84 = arith.constant 84 : index
    %c0_51 = arith.constant 0 : index
    %48 = vector.load %arg12[%c84, %c0_51] : memref<108x512xf32, #tpu.memory_space<vmem>>, vector<12x512xf32>
    tpu.vector_store %arg12[%c84, %c0_51], %47 {strides = array<i32>} : memref<108x512xf32, #tpu.memory_space<vmem>>, vector<12x512xf32>,
    %c0_52 = arith.constant 0 : index
    %c34 = arith.constant 34 : index
    %49 = vector.load %arg9[%c0_52, %c34] : memref<12x546xf32, #tpu.memory_space<vmem>>, vector<12x512xf32>
    %c2_53 = arith.constant 2 : index
    %c2_54 = arith.constant 2 : index
    %c0_55 = arith.constant 0 : index
    %c0_56 = arith.constant 0 : index
    %50 = vector.load %arg1[%c2_53, %c2_54, %c0_55, %c0_56] : memref<3x3x1x512xf32, #tpu.memory_space<vmem>>, vector<1x1x1x512xf32>
    %51 = vector.shape_cast %50 : vector<1x1x1x512xf32> to vector<1x512xf32>
    %52 = vector.broadcast %51 : vector<1x512xf32> to vector<12x512xf32>
    %53 = arith.mulf %49, %52 : vector<12x512xf32>
    %c96 = arith.constant 96 : index
    %c0_57 = arith.constant 0 : index
    %54 = vector.load %arg12[%c96, %c0_57] : memref<108x512xf32, #tpu.memory_space<vmem>>, vector<12x512xf32>
    tpu.vector_store %arg12[%c96, %c0_57], %53 {strides = array<i32>} : memref<108x512xf32, #tpu.memory_space<vmem>>, vector<12x512xf32>,
    %c0_58 = arith.constant 0 : index
    %c0_59 = arith.constant 0 : index
    %55 = vector.load %arg2[%c0_58, %c0_59] : memref<8x108xf32, #tpu.memory_space<vmem>>, vector<8x108xf32>
    %c0_60 = arith.constant 0 : index
    %c0_61 = arith.constant 0 : index
    %56 = vector.load %arg12[%c0_60, %c0_61] : memref<108x512xf32, #tpu.memory_space<vmem>>, vector<108x512xf32>
    %cst_62 = arith.constant dense<0.000000e+00> : vector<8x512xf32>
    %57 = tpu.matmul %55, %56, %cst_62 {dimension_numbers = #tpu.dot_dimension_numbers<[1], [0], [0], [1], [0, 0, 1, 1], [], []>} : vector<8x108xf32>, vector<108x512xf32>, vector<8x512xf32> -> vector<8x512xf32>
    %c0_63 = arith.constant 0 : index
    %c0_64 = arith.constant 0 : index
    %c0_65 = arith.constant 0 : index
    %58 = vector.load %arg3[%c0_63, %c0_64, %c0_65] : memref<2x8x1xf32, #tpu.memory_space<vmem>>, vector<1x8x1xf32>
    %59 = vector.shape_cast %58 : vector<1x8x1xf32> to vector<8x1xf32>
    %60 = vector.broadcast %59 : vector<8x1xf32> to vector<8x512xf32>
    %61 = arith.mulf %57, %60 : vector<8x512xf32>
    %c1_66 = arith.constant 1 : index
    %c0_67 = arith.constant 0 : index
    %c0_68 = arith.constant 0 : index
    %62 = vector.load %arg3[%c1_66, %c0_67, %c0_68] : memref<2x8x1xf32, #tpu.memory_space<vmem>>, vector<1x8x1xf32>
    %63 = vector.shape_cast %62 : vector<1x8x1xf32> to vector<8x1xf32>
    %64 = vector.broadcast %63 : vector<8x1xf32> to vector<8x512xf32>
    %65 = arith.addf %61, %64 : vector<8x512xf32>
    %cst_69 = arith.constant 0.000000e+00 : f32
    %66 = vector.broadcast %cst_69 : f32 to vector<8x512xf32>
    %67 = arith.maximumf %65, %66 : vector<8x512xf32>
    %cst_70 = arith.constant 0.000000e+00 : f32
    %68 = vector.broadcast %cst_70 : f32 to vector<8x17xf32>
    %c0_71 = arith.constant 0 : index
    %c0_72 = arith.constant 0 : index
    %69 = vector.load %arg10[%c0_71, %c0_72] : memref<8x546xf32, #tpu.memory_space<vmem>>, vector<8x17xf32>
    tpu.vector_store %arg10[%c0_71, %c0_72], %68 {strides = array<i32>} : memref<8x546xf32, #tpu.memory_space<vmem>>, vector<8x17xf32>,
    %c0_73 = arith.constant 0 : index
    %c529_74 = arith.constant 529 : index
    %70 = vector.load %arg10[%c0_73, %c529_74] : memref<8x546xf32, #tpu.memory_space<vmem>>, vector<8x17xf32>
    tpu.vector_store %arg10[%c0_73, %c529_74], %68 {strides = array<i32>} : memref<8x546xf32, #tpu.memory_space<vmem>>, vector<8x17xf32>,
    %c0_75 = arith.constant 0 : index
    %c17_76 = arith.constant 17 : index
    %71 = vector.load %arg10[%c0_75, %c17_76] : memref<8x546xf32, #tpu.memory_space<vmem>>, vector<8x512xf32>
    tpu.vector_store %arg10[%c0_75, %c17_76], %67 {strides = array<i32>} : memref<8x546xf32, #tpu.memory_space<vmem>>, vector<8x512xf32>,
    %c0_77 = arith.constant 0 : index
    %c0_78 = arith.constant 0 : index
    %72 = vector.load %arg10[%c0_77, %c0_78] : memref<8x546xf32, #tpu.memory_space<vmem>>, vector<8x512xf32>
    %c0_79 = arith.constant 0 : index
    %c0_80 = arith.constant 0 : index
    %c0_81 = arith.constant 0 : index
    %c0_82 = arith.constant 0 : index
    %73 = vector.load %arg1[%c0_79, %c0_80, %c0_81, %c0_82] : memref<3x3x1x512xf32, #tpu.memory_space<vmem>>, vector<1x1x1x512xf32>
    %74 = vector.shape_cast %73 : vector<1x1x1x512xf32> to vector<1x512xf32>
    %75 = vector.broadcast %74 : vector<1x512xf32> to vector<8x512xf32>
    %76 = arith.mulf %72, %75 : vector<8x512xf32>
    %c0_83 = arith.constant 0 : index
    %c0_84 = arith.constant 0 : index
    %77 = vector.load %arg13[%c0_83, %c0_84] : memref<72x512xf32, #tpu.memory_space<vmem>>, vector<8x512xf32>
    tpu.vector_store %arg13[%c0_83, %c0_84], %76 {strides = array<i32>} : memref<72x512xf32, #tpu.memory_space<vmem>>, vector<8x512xf32>,
    %c0_85 = arith.constant 0 : index
    %c1_86 = arith.constant 1 : index
    %78 = vector.load %arg10[%c0_85, %c1_86] : memref<8x546xf32, #tpu.memory_space<vmem>>, vector<8x512xf32>
    %c0_87 = arith.constant 0 : index
    %c1_88 = arith.constant 1 : index
    %c0_89 = arith.constant 0 : index
    %c0_90 = arith.constant 0 : index
    %79 = vector.load %arg1[%c0_87, %c1_88, %c0_89, %c0_90] : memref<3x3x1x512xf32, #tpu.memory_space<vmem>>, vector<1x1x1x512xf32>
    %80 = vector.shape_cast %79 : vector<1x1x1x512xf32> to vector<1x512xf32>
    %81 = vector.broadcast %80 : vector<1x512xf32> to vector<8x512xf32>
    %82 = arith.mulf %78, %81 : vector<8x512xf32>
    %c8 = arith.constant 8 : index
    %c0_91 = arith.constant 0 : index
    %83 = vector.load %arg13[%c8, %c0_91] : memref<72x512xf32, #tpu.memory_space<vmem>>, vector<8x512xf32>
    tpu.vector_store %arg13[%c8, %c0_91], %82 {strides = array<i32>} : memref<72x512xf32, #tpu.memory_space<vmem>>, vector<8x512xf32>,
    %c0_92 = arith.constant 0 : index
    %c2_93 = arith.constant 2 : index
    %84 = vector.load %arg10[%c0_92, %c2_93] : memref<8x546xf32, #tpu.memory_space<vmem>>, vector<8x512xf32>
    %c0_94 = arith.constant 0 : index
    %c2_95 = arith.constant 2 : index
    %c0_96 = arith.constant 0 : index
    %c0_97 = arith.constant 0 : index
    %85 = vector.load %arg1[%c0_94, %c2_95, %c0_96, %c0_97] : memref<3x3x1x512xf32, #tpu.memory_space<vmem>>, vector<1x1x1x512xf32>
    %86 = vector.shape_cast %85 : vector<1x1x1x512xf32> to vector<1x512xf32>
    %87 = vector.broadcast %86 : vector<1x512xf32> to vector<8x512xf32>
    %88 = arith.mulf %84, %87 : vector<8x512xf32>
    %c16_98 = arith.constant 16 : index
    %c0_99 = arith.constant 0 : index
    %89 = vector.load %arg13[%c16_98, %c0_99] : memref<72x512xf32, #tpu.memory_space<vmem>>, vector<8x512xf32>
    tpu.vector_store %arg13[%c16_98, %c0_99], %88 {strides = array<i32>} : memref<72x512xf32, #tpu.memory_space<vmem>>, vector<8x512xf32>,
    %c0_100 = arith.constant 0 : index
    %c16_101 = arith.constant 16 : index
    %90 = vector.load %arg10[%c0_100, %c16_101] : memref<8x546xf32, #tpu.memory_space<vmem>>, vector<8x512xf32>
    %c1_102 = arith.constant 1 : index
    %c0_103 = arith.constant 0 : index
    %c0_104 = arith.constant 0 : index
    %c0_105 = arith.constant 0 : index
    %91 = vector.load %arg1[%c1_102, %c0_103, %c0_104, %c0_105] : memref<3x3x1x512xf32, #tpu.memory_space<vmem>>, vector<1x1x1x512xf32>
    %92 = vector.shape_cast %91 : vector<1x1x1x512xf32> to vector<1x512xf32>
    %93 = vector.broadcast %92 : vector<1x512xf32> to vector<8x512xf32>
    %94 = arith.mulf %90, %93 : vector<8x512xf32>
    %c24_106 = arith.constant 24 : index
    %c0_107 = arith.constant 0 : index
    %95 = vector.load %arg13[%c24_106, %c0_107] : memref<72x512xf32, #tpu.memory_space<vmem>>, vector<8x512xf32>
    tpu.vector_store %arg13[%c24_106, %c0_107], %94 {strides = array<i32>} : memref<72x512xf32, #tpu.memory_space<vmem>>, vector<8x512xf32>,
    %c0_108 = arith.constant 0 : index
    %c17_109 = arith.constant 17 : index
    %96 = vector.load %arg10[%c0_108, %c17_109] : memref<8x546xf32, #tpu.memory_space<vmem>>, vector<8x512xf32>
    %c32_110 = arith.constant 32 : index
    %c0_111 = arith.constant 0 : index
    %97 = vector.load %arg13[%c32_110, %c0_111] : memref<72x512xf32, #tpu.memory_space<vmem>>, vector<8x512xf32>
    tpu.vector_store %arg13[%c32_110, %c0_111], %96 {strides = array<i32>} : memref<72x512xf32, #tpu.memory_space<vmem>>, vector<8x512xf32>,
    %c0_112 = arith.constant 0 : index
    %c18_113 = arith.constant 18 : index
    %98 = vector.load %arg10[%c0_112, %c18_113] : memref<8x546xf32, #tpu.memory_space<vmem>>, vector<8x512xf32>
    %c1_114 = arith.constant 1 : index
    %c2_115 = arith.constant 2 : index
    %c0_116 = arith.constant 0 : index
    %c0_117 = arith.constant 0 : index
    %99 = vector.load %arg1[%c1_114, %c2_115, %c0_116, %c0_117] : memref<3x3x1x512xf32, #tpu.memory_space<vmem>>, vector<1x1x1x512xf32>
    %100 = vector.shape_cast %99 : vector<1x1x1x512xf32> to vector<1x512xf32>
    %101 = vector.broadcast %100 : vector<1x512xf32> to vector<8x512xf32>
    %102 = arith.mulf %98, %101 : vector<8x512xf32>
    %c40 = arith.constant 40 : index
    %c0_118 = arith.constant 0 : index
    %103 = vector.load %arg13[%c40, %c0_118] : memref<72x512xf32, #tpu.memory_space<vmem>>, vector<8x512xf32>
    tpu.vector_store %arg13[%c40, %c0_118], %102 {strides = array<i32>} : memref<72x512xf32, #tpu.memory_space<vmem>>, vector<8x512xf32>,
    %c0_119 = arith.constant 0 : index
    %c32_120 = arith.constant 32 : index
    %104 = vector.load %arg10[%c0_119, %c32_120] : memref<8x546xf32, #tpu.memory_space<vmem>>, vector<8x512xf32>
    %c2_121 = arith.constant 2 : index
    %c0_122 = arith.constant 0 : index
    %c0_123 = arith.constant 0 : index
    %c0_124 = arith.constant 0 : index
    %105 = vector.load %arg1[%c2_121, %c0_122, %c0_123, %c0_124] : memref<3x3x1x512xf32, #tpu.memory_space<vmem>>, vector<1x1x1x512xf32>
    %106 = vector.shape_cast %105 : vector<1x1x1x512xf32> to vector<1x512xf32>
    %107 = vector.broadcast %106 : vector<1x512xf32> to vector<8x512xf32>
    %108 = arith.mulf %104, %107 : vector<8x512xf32>
    %c48_125 = arith.constant 48 : index
    %c0_126 = arith.constant 0 : index
    %109 = vector.load %arg13[%c48_125, %c0_126] : memref<72x512xf32, #tpu.memory_space<vmem>>, vector<8x512xf32>
    tpu.vector_store %arg13[%c48_125, %c0_126], %108 {strides = array<i32>} : memref<72x512xf32, #tpu.memory_space<vmem>>, vector<8x512xf32>,
    %c0_127 = arith.constant 0 : index
    %c33_128 = arith.constant 33 : index
    %110 = vector.load %arg10[%c0_127, %c33_128] : memref<8x546xf32, #tpu.memory_space<vmem>>, vector<8x512xf32>
    %c2_129 = arith.constant 2 : index
    %c1_130 = arith.constant 1 : index
    %c0_131 = arith.constant 0 : index
    %c0_132 = arith.constant 0 : index
    %111 = vector.load %arg1[%c2_129, %c1_130, %c0_131, %c0_132] : memref<3x3x1x512xf32, #tpu.memory_space<vmem>>, vector<1x1x1x512xf32>
    %112 = vector.shape_cast %111 : vector<1x1x1x512xf32> to vector<1x512xf32>
    %113 = vector.broadcast %112 : vector<1x512xf32> to vector<8x512xf32>
    %114 = arith.mulf %110, %113 : vector<8x512xf32>
    %c56 = arith.constant 56 : index
    %c0_133 = arith.constant 0 : index
    %115 = vector.load %arg13[%c56, %c0_133] : memref<72x512xf32, #tpu.memory_space<vmem>>, vector<8x512xf32>
    tpu.vector_store %arg13[%c56, %c0_133], %114 {strides = array<i32>} : memref<72x512xf32, #tpu.memory_space<vmem>>, vector<8x512xf32>,
    %c0_134 = arith.constant 0 : index
    %c34_135 = arith.constant 34 : index
    %116 = vector.load %arg10[%c0_134, %c34_135] : memref<8x546xf32, #tpu.memory_space<vmem>>, vector<8x512xf32>
    %c2_136 = arith.constant 2 : index
    %c2_137 = arith.constant 2 : index
    %c0_138 = arith.constant 0 : index
    %c0_139 = arith.constant 0 : index
    %117 = vector.load %arg1[%c2_136, %c2_137, %c0_138, %c0_139] : memref<3x3x1x512xf32, #tpu.memory_space<vmem>>, vector<1x1x1x512xf32>
    %118 = vector.shape_cast %117 : vector<1x1x1x512xf32> to vector<1x512xf32>
    %119 = vector.broadcast %118 : vector<1x512xf32> to vector<8x512xf32>
    %120 = arith.mulf %116, %119 : vector<8x512xf32>
    %c64 = arith.constant 64 : index
    %c0_140 = arith.constant 0 : index
    %121 = vector.load %arg13[%c64, %c0_140] : memref<72x512xf32, #tpu.memory_space<vmem>>, vector<8x512xf32>
    tpu.vector_store %arg13[%c64, %c0_140], %120 {strides = array<i32>} : memref<72x512xf32, #tpu.memory_space<vmem>>, vector<8x512xf32>,
    %c0_141 = arith.constant 0 : index
    %c0_142 = arith.constant 0 : index
    %122 = vector.load %arg4[%c0_141, %c0_142] : memref<16x72xf32, #tpu.memory_space<vmem>>, vector<16x72xf32>
    %c0_143 = arith.constant 0 : index
    %c0_144 = arith.constant 0 : index
    %123 = vector.load %arg13[%c0_143, %c0_144] : memref<72x512xf32, #tpu.memory_space<vmem>>, vector<72x512xf32>
    %cst_145 = arith.constant dense<0.000000e+00> : vector<16x512xf32>
    %124 = tpu.matmul %122, %123, %cst_145 {dimension_numbers = #tpu.dot_dimension_numbers<[1], [0], [0], [1], [0, 0, 1, 1], [], []>} : vector<16x72xf32>, vector<72x512xf32>, vector<16x512xf32> -> vector<16x512xf32>
    %c0_146 = arith.constant 0 : index
    %c0_147 = arith.constant 0 : index
    %c0_148 = arith.constant 0 : index
    %125 = vector.load %arg5[%c0_146, %c0_147, %c0_148] : memref<2x16x1xf32, #tpu.memory_space<vmem>>, vector<1x16x1xf32>
    %126 = vector.shape_cast %125 : vector<1x16x1xf32> to vector<16x1xf32>
    %127 = vector.broadcast %126 : vector<16x1xf32> to vector<16x512xf32>
    %128 = arith.mulf %124, %127 : vector<16x512xf32>
    %c1_149 = arith.constant 1 : index
    %c0_150 = arith.constant 0 : index
    %c0_151 = arith.constant 0 : index
    %129 = vector.load %arg5[%c1_149, %c0_150, %c0_151] : memref<2x16x1xf32, #tpu.memory_space<vmem>>, vector<1x16x1xf32>
    %130 = vector.shape_cast %129 : vector<1x16x1xf32> to vector<16x1xf32>
    %131 = vector.broadcast %130 : vector<16x1xf32> to vector<16x512xf32>
    %132 = arith.addf %128, %131 : vector<16x512xf32>
    %cst_152 = arith.constant 0.000000e+00 : f32
    %133 = vector.broadcast %cst_152 : f32 to vector<16x512xf32>
    %134 = arith.maximumf %132, %133 : vector<16x512xf32>
    %c0_153 = arith.constant 0 : index
    %c0_154 = arith.constant 0 : index
    %135 = vector.load %arg8[%c0_153, %c0_154] : memref<28x512xf32, #tpu.memory_space<vmem>>, vector<16x512xf32>
    tpu.vector_store %arg8[%c0_153, %c0_154], %134 {strides = array<i32>} : memref<28x512xf32, #tpu.memory_space<vmem>>, vector<16x512xf32>,
    %cst_155 = arith.constant 0.000000e+00 : f32
    %136 = vector.broadcast %cst_155 : f32 to vector<4x17xf32>
    %c0_156 = arith.constant 0 : index
    %c0_157 = arith.constant 0 : index
    %c0_158 = arith.constant 0 : index
    %c0_159 = arith.constant 0 : index
    %137 = vector.load %arg11[%c0_156, %c0_157, %c0_158, %c0_159] : memref<2x2x4x546xf32, #tpu.memory_space<vmem>>, vector<1x1x4x17xf32>
    %138 = vector.shape_cast %137 : vector<1x1x4x17xf32> to vector<4x17xf32>
    %139 = vector.shape_cast %136 : vector<4x17xf32> to vector<1x1x4x17xf32>
    tpu.vector_store %arg11[%c0_156, %c0_157, %c0_158, %c0_159], %139 {strides = array<i32>} : memref<2x2x4x546xf32, #tpu.memory_space<vmem>>, vector<1x1x4x17xf32>,
    %c0_160 = arith.constant 0 : index
    %c0_161 = arith.constant 0 : index
    %c0_162 = arith.constant 0 : index
    %c529_163 = arith.constant 529 : index
    %140 = vector.load %arg11[%c0_160, %c0_161, %c0_162, %c529_163] : memref<2x2x4x546xf32, #tpu.memory_space<vmem>>, vector<1x1x4x17xf32>
    %141 = vector.shape_cast %140 : vector<1x1x4x17xf32> to vector<4x17xf32>
    %142 = vector.shape_cast %136 : vector<4x17xf32> to vector<1x1x4x17xf32>
    tpu.vector_store %arg11[%c0_160, %c0_161, %c0_162, %c529_163], %142 {strides = array<i32>} : memref<2x2x4x546xf32, #tpu.memory_space<vmem>>, vector<1x1x4x17xf32>,
    %143 = vector.extract_strided_slice %134 {offsets = [0, 0], sizes = [4, 512], strides = [1, 1]} : vector<16x512xf32> to vector<4x512xf32>
    %c0_164 = arith.constant 0 : index
    %c0_165 = arith.constant 0 : index
    %c0_166 = arith.constant 0 : index
    %c17_167 = arith.constant 17 : index
    %144 = vector.load %arg11[%c0_164, %c0_165, %c0_166, %c17_167] : memref<2x2x4x546xf32, #tpu.memory_space<vmem>>, vector<1x1x4x512xf32>
    %145 = vector.shape_cast %144 : vector<1x1x4x512xf32> to vector<4x512xf32>
    %146 = vector.shape_cast %143 : vector<4x512xf32> to vector<1x1x4x512xf32>
    tpu.vector_store %arg11[%c0_164, %c0_165, %c0_166, %c17_167], %146 {strides = array<i32>} : memref<2x2x4x546xf32, #tpu.memory_space<vmem>>, vector<1x1x4x512xf32>,
    %c0_168 = arith.constant 0 : index
    %c1_169 = arith.constant 1 : index
    %c0_170 = arith.constant 0 : index
    %c0_171 = arith.constant 0 : index
    %147 = vector.load %arg11[%c0_168, %c1_169, %c0_170, %c0_171] : memref<2x2x4x546xf32, #tpu.memory_space<vmem>>, vector<1x1x4x17xf32>
    %148 = vector.shape_cast %147 : vector<1x1x4x17xf32> to vector<4x17xf32>
    %149 = vector.shape_cast %136 : vector<4x17xf32> to vector<1x1x4x17xf32>
    tpu.vector_store %arg11[%c0_168, %c1_169, %c0_170, %c0_171], %149 {strides = array<i32>} : memref<2x2x4x546xf32, #tpu.memory_space<vmem>>, vector<1x1x4x17xf32>,
    %c0_172 = arith.constant 0 : index
    %c1_173 = arith.constant 1 : index
    %c0_174 = arith.constant 0 : index
    %c529_175 = arith.constant 529 : index
    %150 = vector.load %arg11[%c0_172, %c1_173, %c0_174, %c529_175] : memref<2x2x4x546xf32, #tpu.memory_space<vmem>>, vector<1x1x4x17xf32>
    %151 = vector.shape_cast %150 : vector<1x1x4x17xf32> to vector<4x17xf32>
    %152 = vector.shape_cast %136 : vector<4x17xf32> to vector<1x1x4x17xf32>
    tpu.vector_store %arg11[%c0_172, %c1_173, %c0_174, %c529_175], %152 {strides = array<i32>} : memref<2x2x4x546xf32, #tpu.memory_space<vmem>>, vector<1x1x4x17xf32>,
    %153 = vector.extract_strided_slice %134 {offsets = [4, 0], sizes = [4, 512], strides = [1, 1]} : vector<16x512xf32> to vector<4x512xf32>
    %c0_176 = arith.constant 0 : index
    %c1_177 = arith.constant 1 : index
    %c0_178 = arith.constant 0 : index
    %c17_179 = arith.constant 17 : index
    %154 = vector.load %arg11[%c0_176, %c1_177, %c0_178, %c17_179] : memref<2x2x4x546xf32, #tpu.memory_space<vmem>>, vector<1x1x4x512xf32>
    %155 = vector.shape_cast %154 : vector<1x1x4x512xf32> to vector<4x512xf32>
    %156 = vector.shape_cast %153 : vector<4x512xf32> to vector<1x1x4x512xf32>
    tpu.vector_store %arg11[%c0_176, %c1_177, %c0_178, %c17_179], %156 {strides = array<i32>} : memref<2x2x4x546xf32, #tpu.memory_space<vmem>>, vector<1x1x4x512xf32>,
    %c1_180 = arith.constant 1 : index
    %c0_181 = arith.constant 0 : index
    %c0_182 = arith.constant 0 : index
    %c0_183 = arith.constant 0 : index
    %157 = vector.load %arg11[%c1_180, %c0_181, %c0_182, %c0_183] : memref<2x2x4x546xf32, #tpu.memory_space<vmem>>, vector<1x1x4x17xf32>
    %158 = vector.shape_cast %157 : vector<1x1x4x17xf32> to vector<4x17xf32>
    %159 = vector.shape_cast %136 : vector<4x17xf32> to vector<1x1x4x17xf32>
    tpu.vector_store %arg11[%c1_180, %c0_181, %c0_182, %c0_183], %159 {strides = array<i32>} : memref<2x2x4x546xf32, #tpu.memory_space<vmem>>, vector<1x1x4x17xf32>,
    %c1_184 = arith.constant 1 : index
    %c0_185 = arith.constant 0 : index
    %c0_186 = arith.constant 0 : index
    %c529_187 = arith.constant 529 : index
    %160 = vector.load %arg11[%c1_184, %c0_185, %c0_186, %c529_187] : memref<2x2x4x546xf32, #tpu.memory_space<vmem>>, vector<1x1x4x17xf32>
    %161 = vector.shape_cast %160 : vector<1x1x4x17xf32> to vector<4x17xf32>
    %162 = vector.shape_cast %136 : vector<4x17xf32> to vector<1x1x4x17xf32>
    tpu.vector_store %arg11[%c1_184, %c0_185, %c0_186, %c529_187], %162 {strides = array<i32>} : memref<2x2x4x546xf32, #tpu.memory_space<vmem>>, vector<1x1x4x17xf32>,
    %163 = vector.extract_strided_slice %134 {offsets = [8, 0], sizes = [4, 512], strides = [1, 1]} : vector<16x512xf32> to vector<4x512xf32>
    %c1_188 = arith.constant 1 : index
    %c0_189 = arith.constant 0 : index
    %c0_190 = arith.constant 0 : index
    %c17_191 = arith.constant 17 : index
    %164 = vector.load %arg11[%c1_188, %c0_189, %c0_190, %c17_191] : memref<2x2x4x546xf32, #tpu.memory_space<vmem>>, vector<1x1x4x512xf32>
    %165 = vector.shape_cast %164 : vector<1x1x4x512xf32> to vector<4x512xf32>
    %166 = vector.shape_cast %163 : vector<4x512xf32> to vector<1x1x4x512xf32>
    tpu.vector_store %arg11[%c1_188, %c0_189, %c0_190, %c17_191], %166 {strides = array<i32>} : memref<2x2x4x546xf32, #tpu.memory_space<vmem>>, vector<1x1x4x512xf32>,
    %c1_192 = arith.constant 1 : index
    %c1_193 = arith.constant 1 : index
    %c0_194 = arith.constant 0 : index
    %c0_195 = arith.constant 0 : index
    %167 = vector.load %arg11[%c1_192, %c1_193, %c0_194, %c0_195] : memref<2x2x4x546xf32, #tpu.memory_space<vmem>>, vector<1x1x4x17xf32>
    %168 = vector.shape_cast %167 : vector<1x1x4x17xf32> to vector<4x17xf32>
    %169 = vector.shape_cast %136 : vector<4x17xf32> to vector<1x1x4x17xf32>
    tpu.vector_store %arg11[%c1_192, %c1_193, %c0_194, %c0_195], %169 {strides = array<i32>} : memref<2x2x4x546xf32, #tpu.memory_space<vmem>>, vector<1x1x4x17xf32>,
    %c1_196 = arith.constant 1 : index
    %c1_197 = arith.constant 1 : index
    %c0_198 = arith.constant 0 : index
    %c529_199 = arith.constant 529 : index
    %170 = vector.load %arg11[%c1_196, %c1_197, %c0_198, %c529_199] : memref<2x2x4x546xf32, #tpu.memory_space<vmem>>, vector<1x1x4x17xf32>
    %171 = vector.shape_cast %170 : vector<1x1x4x17xf32> to vector<4x17xf32>
    %172 = vector.shape_cast %136 : vector<4x17xf32> to vector<1x1x4x17xf32>
    tpu.vector_store %arg11[%c1_196, %c1_197, %c0_198, %c529_199], %172 {strides = array<i32>} : memref<2x2x4x546xf32, #tpu.memory_space<vmem>>, vector<1x1x4x17xf32>,
    %173 = vector.extract_strided_slice %134 {offsets = [12, 0], sizes = [4, 512], strides = [1, 1]} : vector<16x512xf32> to vector<4x512xf32>
    %c1_200 = arith.constant 1 : index
    %c1_201 = arith.constant 1 : index
    %c0_202 = arith.constant 0 : index
    %c17_203 = arith.constant 17 : index
    %174 = vector.load %arg11[%c1_200, %c1_201, %c0_202, %c17_203] : memref<2x2x4x546xf32, #tpu.memory_space<vmem>>, vector<1x1x4x512xf32>
    %175 = vector.shape_cast %174 : vector<1x1x4x512xf32> to vector<4x512xf32>
    %176 = vector.shape_cast %173 : vector<4x512xf32> to vector<1x1x4x512xf32>
    tpu.vector_store %arg11[%c1_200, %c1_201, %c0_202, %c17_203], %176 {strides = array<i32>} : memref<2x2x4x546xf32, #tpu.memory_space<vmem>>, vector<1x1x4x512xf32>,
    %c0_204 = arith.constant 0 : index
    %c0_205 = arith.constant 0 : index
    %c0_206 = arith.constant 0 : index
    %c17_207 = arith.constant 17 : index
    %177 = vector.load %arg11[%c0_204, %c0_205, %c0_206, %c17_207] : memref<2x2x4x546xf32, #tpu.memory_space<vmem>>, vector<1x1x4x512xf32>
    %178 = vector.shape_cast %177 : vector<1x1x4x512xf32> to vector<4x512xf32>
    %c0_208 = arith.constant 0 : index
    %c0_209 = arith.constant 0 : index
    %179 = vector.load %arg14[%c0_208, %c0_209] : memref<64x512xf32, #tpu.memory_space<vmem>>, vector<4x512xf32>
    tpu.vector_store %arg14[%c0_208, %c0_209], %178 {strides = array<i32>} : memref<64x512xf32, #tpu.memory_space<vmem>>, vector<4x512xf32>,
    %c0_210 = arith.constant 0 : index
    %c0_211 = arith.constant 0 : index
    %c0_212 = arith.constant 0 : index
    %c18_213 = arith.constant 18 : index
    %180 = vector.load %arg11[%c0_210, %c0_211, %c0_212, %c18_213] : memref<2x2x4x546xf32, #tpu.memory_space<vmem>>, vector<1x1x4x512xf32>
    %181 = vector.shape_cast %180 : vector<1x1x4x512xf32> to vector<4x512xf32>
    %c1_214 = arith.constant 1 : index
    %c2_215 = arith.constant 2 : index
    %c0_216 = arith.constant 0 : index
    %c0_217 = arith.constant 0 : index
    %182 = vector.load %arg1[%c1_214, %c2_215, %c0_216, %c0_217] : memref<3x3x1x512xf32, #tpu.memory_space<vmem>>, vector<1x1x1x512xf32>
    %183 = vector.shape_cast %182 : vector<1x1x1x512xf32> to vector<1x512xf32>
    %184 = vector.broadcast %183 : vector<1x512xf32> to vector<4x512xf32>
    %185 = arith.mulf %181, %184 : vector<4x512xf32>
    %c4 = arith.constant 4 : index
    %c0_218 = arith.constant 0 : index
    %186 = vector.load %arg14[%c4, %c0_218] : memref<64x512xf32, #tpu.memory_space<vmem>>, vector<4x512xf32>
    tpu.vector_store %arg14[%c4, %c0_218], %185 {strides = array<i32>} : memref<64x512xf32, #tpu.memory_space<vmem>>, vector<4x512xf32>,
    %c0_219 = arith.constant 0 : index
    %c1_220 = arith.constant 1 : index
    %c0_221 = arith.constant 0 : index
    %c16_222 = arith.constant 16 : index
    %187 = vector.load %arg11[%c0_219, %c1_220, %c0_221, %c16_222] : memref<2x2x4x546xf32, #tpu.memory_space<vmem>>, vector<1x1x4x512xf32>
    %188 = vector.shape_cast %187 : vector<1x1x4x512xf32> to vector<4x512xf32>
    %c1_223 = arith.constant 1 : index
    %c0_224 = arith.constant 0 : index
    %c0_225 = arith.constant 0 : index
    %c0_226 = arith.constant 0 : index
    %189 = vector.load %arg1[%c1_223, %c0_224, %c0_225, %c0_226] : memref<3x3x1x512xf32, #tpu.memory_space<vmem>>, vector<1x1x1x512xf32>
    %190 = vector.shape_cast %189 : vector<1x1x1x512xf32> to vector<1x512xf32>
    %191 = vector.broadcast %190 : vector<1x512xf32> to vector<4x512xf32>
    %192 = arith.mulf %188, %191 : vector<4x512xf32>
    %c8_227 = arith.constant 8 : index
    %c0_228 = arith.constant 0 : index
    %193 = vector.load %arg14[%c8_227, %c0_228] : memref<64x512xf32, #tpu.memory_space<vmem>>, vector<4x512xf32>
    tpu.vector_store %arg14[%c8_227, %c0_228], %192 {strides = array<i32>} : memref<64x512xf32, #tpu.memory_space<vmem>>, vector<4x512xf32>,
    %c0_229 = arith.constant 0 : index
    %c1_230 = arith.constant 1 : index
    %c0_231 = arith.constant 0 : index
    %c17_232 = arith.constant 17 : index
    %194 = vector.load %arg11[%c0_229, %c1_230, %c0_231, %c17_232] : memref<2x2x4x546xf32, #tpu.memory_space<vmem>>, vector<1x1x4x512xf32>
    %195 = vector.shape_cast %194 : vector<1x1x4x512xf32> to vector<4x512xf32>
    %c12_233 = arith.constant 12 : index
    %c0_234 = arith.constant 0 : index
    %196 = vector.load %arg14[%c12_233, %c0_234] : memref<64x512xf32, #tpu.memory_space<vmem>>, vector<4x512xf32>
    tpu.vector_store %arg14[%c12_233, %c0_234], %195 {strides = array<i32>} : memref<64x512xf32, #tpu.memory_space<vmem>>, vector<4x512xf32>,
    %c0_235 = arith.constant 0 : index
    %c0_236 = arith.constant 0 : index
    %c0_237 = arith.constant 0 : index
    %c33_238 = arith.constant 33 : index
    %197 = vector.load %arg11[%c0_235, %c0_236, %c0_237, %c33_238] : memref<2x2x4x546xf32, #tpu.memory_space<vmem>>, vector<1x1x4x512xf32>
    %198 = vector.shape_cast %197 : vector<1x1x4x512xf32> to vector<4x512xf32>
    %c2_239 = arith.constant 2 : index
    %c1_240 = arith.constant 1 : index
    %c0_241 = arith.constant 0 : index
    %c0_242 = arith.constant 0 : index
    %199 = vector.load %arg1[%c2_239, %c1_240, %c0_241, %c0_242] : memref<3x3x1x512xf32, #tpu.memory_space<vmem>>, vector<1x1x1x512xf32>
    %200 = vector.shape_cast %199 : vector<1x1x1x512xf32> to vector<1x512xf32>
    %201 = vector.broadcast %200 : vector<1x512xf32> to vector<4x512xf32>
    %202 = arith.mulf %198, %201 : vector<4x512xf32>
    %c16_243 = arith.constant 16 : index
    %c0_244 = arith.constant 0 : index
    %203 = vector.load %arg14[%c16_243, %c0_244] : memref<64x512xf32, #tpu.memory_space<vmem>>, vector<4x512xf32>
    tpu.vector_store %arg14[%c16_243, %c0_244], %202 {strides = array<i32>} : memref<64x512xf32, #tpu.memory_space<vmem>>, vector<4x512xf32>,
    %c0_245 = arith.constant 0 : index
    %c0_246 = arith.constant 0 : index
    %c0_247 = arith.constant 0 : index
    %c34_248 = arith.constant 34 : index
    %204 = vector.load %arg11[%c0_245, %c0_246, %c0_247, %c34_248] : memref<2x2x4x546xf32, #tpu.memory_space<vmem>>, vector<1x1x4x512xf32>
    %205 = vector.shape_cast %204 : vector<1x1x4x512xf32> to vector<4x512xf32>
    %c2_249 = arith.constant 2 : index
    %c2_250 = arith.constant 2 : index
    %c0_251 = arith.constant 0 : index
    %c0_252 = arith.constant 0 : index
    %206 = vector.load %arg1[%c2_249, %c2_250, %c0_251, %c0_252] : memref<3x3x1x512xf32, #tpu.memory_space<vmem>>, vector<1x1x1x512xf32>
    %207 = vector.shape_cast %206 : vector<1x1x1x512xf32> to vector<1x512xf32>
    %208 = vector.broadcast %207 : vector<1x512xf32> to vector<4x512xf32>
    %209 = arith.mulf %205, %208 : vector<4x512xf32>
    %c20 = arith.constant 20 : index
    %c0_253 = arith.constant 0 : index
    %210 = vector.load %arg14[%c20, %c0_253] : memref<64x512xf32, #tpu.memory_space<vmem>>, vector<4x512xf32>
    tpu.vector_store %arg14[%c20, %c0_253], %209 {strides = array<i32>} : memref<64x512xf32, #tpu.memory_space<vmem>>, vector<4x512xf32>,
    %c0_254 = arith.constant 0 : index
    %c1_255 = arith.constant 1 : index
    %c0_256 = arith.constant 0 : index
    %c32_257 = arith.constant 32 : index
    %211 = vector.load %arg11[%c0_254, %c1_255, %c0_256, %c32_257] : memref<2x2x4x546xf32, #tpu.memory_space<vmem>>, vector<1x1x4x512xf32>
    %212 = vector.shape_cast %211 : vector<1x1x4x512xf32> to vector<4x512xf32>
    %c2_258 = arith.constant 2 : index
    %c0_259 = arith.constant 0 : index
    %c0_260 = arith.constant 0 : index
    %c0_261 = arith.constant 0 : index
    %213 = vector.load %arg1[%c2_258, %c0_259, %c0_260, %c0_261] : memref<3x3x1x512xf32, #tpu.memory_space<vmem>>, vector<1x1x1x512xf32>
    %214 = vector.shape_cast %213 : vector<1x1x1x512xf32> to vector<1x512xf32>
    %215 = vector.broadcast %214 : vector<1x512xf32> to vector<4x512xf32>
    %216 = arith.mulf %212, %215 : vector<4x512xf32>
    %c24_262 = arith.constant 24 : index
    %c0_263 = arith.constant 0 : index
    %217 = vector.load %arg14[%c24_262, %c0_263] : memref<64x512xf32, #tpu.memory_space<vmem>>, vector<4x512xf32>
    tpu.vector_store %arg14[%c24_262, %c0_263], %216 {strides = array<i32>} : memref<64x512xf32, #tpu.memory_space<vmem>>, vector<4x512xf32>,
    %c0_264 = arith.constant 0 : index
    %c1_265 = arith.constant 1 : index
    %c0_266 = arith.constant 0 : index
    %c33_267 = arith.constant 33 : index
    %218 = vector.load %arg11[%c0_264, %c1_265, %c0_266, %c33_267] : memref<2x2x4x546xf32, #tpu.memory_space<vmem>>, vector<1x1x4x512xf32>
    %219 = vector.shape_cast %218 : vector<1x1x4x512xf32> to vector<4x512xf32>
    %c2_268 = arith.constant 2 : index
    %c1_269 = arith.constant 1 : index
    %c0_270 = arith.constant 0 : index
    %c0_271 = arith.constant 0 : index
    %220 = vector.load %arg1[%c2_268, %c1_269, %c0_270, %c0_271] : memref<3x3x1x512xf32, #tpu.memory_space<vmem>>, vector<1x1x1x512xf32>
    %221 = vector.shape_cast %220 : vector<1x1x1x512xf32> to vector<1x512xf32>
    %222 = vector.broadcast %221 : vector<1x512xf32> to vector<4x512xf32>
    %223 = arith.mulf %219, %222 : vector<4x512xf32>
    %c28 = arith.constant 28 : index
    %c0_272 = arith.constant 0 : index
    %224 = vector.load %arg14[%c28, %c0_272] : memref<64x512xf32, #tpu.memory_space<vmem>>, vector<4x512xf32>
    tpu.vector_store %arg14[%c28, %c0_272], %223 {strides = array<i32>} : memref<64x512xf32, #tpu.memory_space<vmem>>, vector<4x512xf32>,
    %c1_273 = arith.constant 1 : index
    %c0_274 = arith.constant 0 : index
    %c0_275 = arith.constant 0 : index
    %c1_276 = arith.constant 1 : index
    %225 = vector.load %arg11[%c1_273, %c0_274, %c0_275, %c1_276] : memref<2x2x4x546xf32, #tpu.memory_space<vmem>>, vector<1x1x4x512xf32>
    %226 = vector.shape_cast %225 : vector<1x1x4x512xf32> to vector<4x512xf32>
    %c0_277 = arith.constant 0 : index
    %c1_278 = arith.constant 1 : index
    %c0_279 = arith.constant 0 : index
    %c0_280 = arith.constant 0 : index
    %227 = vector.load %arg1[%c0_277, %c1_278, %c0_279, %c0_280] : memref<3x3x1x512xf32, #tpu.memory_space<vmem>>, vector<1x1x1x512xf32>
    %228 = vector.shape_cast %227 : vector<1x1x1x512xf32> to vector<1x512xf32>
    %229 = vector.broadcast %228 : vector<1x512xf32> to vector<4x512xf32>
    %230 = arith.mulf %226, %229 : vector<4x512xf32>
    %c32_281 = arith.constant 32 : index
    %c0_282 = arith.constant 0 : index
    %231 = vector.load %arg14[%c32_281, %c0_282] : memref<64x512xf32, #tpu.memory_space<vmem>>, vector<4x512xf32>
    tpu.vector_store %arg14[%c32_281, %c0_282], %230 {strides = array<i32>} : memref<64x512xf32, #tpu.memory_space<vmem>>, vector<4x512xf32>,
    %c1_283 = arith.constant 1 : index
    %c0_284 = arith.constant 0 : index
    %c0_285 = arith.constant 0 : index
    %c2_286 = arith.constant 2 : index
    %232 = vector.load %arg11[%c1_283, %c0_284, %c0_285, %c2_286] : memref<2x2x4x546xf32, #tpu.memory_space<vmem>>, vector<1x1x4x512xf32>
    %233 = vector.shape_cast %232 : vector<1x1x4x512xf32> to vector<4x512xf32>
    %c0_287 = arith.constant 0 : index
    %c2_288 = arith.constant 2 : index
    %c0_289 = arith.constant 0 : index
    %c0_290 = arith.constant 0 : index
    %234 = vector.load %arg1[%c0_287, %c2_288, %c0_289, %c0_290] : memref<3x3x1x512xf32, #tpu.memory_space<vmem>>, vector<1x1x1x512xf32>
    %235 = vector.shape_cast %234 : vector<1x1x1x512xf32> to vector<1x512xf32>
    %236 = vector.broadcast %235 : vector<1x512xf32> to vector<4x512xf32>
    %237 = arith.mulf %233, %236 : vector<4x512xf32>
    %c36_291 = arith.constant 36 : index
    %c0_292 = arith.constant 0 : index
    %238 = vector.load %arg14[%c36_291, %c0_292] : memref<64x512xf32, #tpu.memory_space<vmem>>, vector<4x512xf32>
    tpu.vector_store %arg14[%c36_291, %c0_292], %237 {strides = array<i32>} : memref<64x512xf32, #tpu.memory_space<vmem>>, vector<4x512xf32>,
    %c1_293 = arith.constant 1 : index
    %c1_294 = arith.constant 1 : index
    %c0_295 = arith.constant 0 : index
    %c0_296 = arith.constant 0 : index
    %239 = vector.load %arg11[%c1_293, %c1_294, %c0_295, %c0_296] : memref<2x2x4x546xf32, #tpu.memory_space<vmem>>, vector<1x1x4x512xf32>
    %240 = vector.shape_cast %239 : vector<1x1x4x512xf32> to vector<4x512xf32>
    %c0_297 = arith.constant 0 : index
    %c0_298 = arith.constant 0 : index
    %c0_299 = arith.constant 0 : index
    %c0_300 = arith.constant 0 : index
    %241 = vector.load %arg1[%c0_297, %c0_298, %c0_299, %c0_300] : memref<3x3x1x512xf32, #tpu.memory_space<vmem>>, vector<1x1x1x512xf32>
    %242 = vector.shape_cast %241 : vector<1x1x1x512xf32> to vector<1x512xf32>
    %243 = vector.broadcast %242 : vector<1x512xf32> to vector<4x512xf32>
    %244 = arith.mulf %240, %243 : vector<4x512xf32>
    %c40_301 = arith.constant 40 : index
    %c0_302 = arith.constant 0 : index
    %245 = vector.load %arg14[%c40_301, %c0_302] : memref<64x512xf32, #tpu.memory_space<vmem>>, vector<4x512xf32>
    tpu.vector_store %arg14[%c40_301, %c0_302], %244 {strides = array<i32>} : memref<64x512xf32, #tpu.memory_space<vmem>>, vector<4x512xf32>,
    %c1_303 = arith.constant 1 : index
    %c1_304 = arith.constant 1 : index
    %c0_305 = arith.constant 0 : index
    %c1_306 = arith.constant 1 : index
    %246 = vector.load %arg11[%c1_303, %c1_304, %c0_305, %c1_306] : memref<2x2x4x546xf32, #tpu.memory_space<vmem>>, vector<1x1x4x512xf32>
    %247 = vector.shape_cast %246 : vector<1x1x4x512xf32> to vector<4x512xf32>
    %c0_307 = arith.constant 0 : index
    %c1_308 = arith.constant 1 : index
    %c0_309 = arith.constant 0 : index
    %c0_310 = arith.constant 0 : index
    %248 = vector.load %arg1[%c0_307, %c1_308, %c0_309, %c0_310] : memref<3x3x1x512xf32, #tpu.memory_space<vmem>>, vector<1x1x1x512xf32>
    %249 = vector.shape_cast %248 : vector<1x1x1x512xf32> to vector<1x512xf32>
    %250 = vector.broadcast %249 : vector<1x512xf32> to vector<4x512xf32>
    %251 = arith.mulf %247, %250 : vector<4x512xf32>
    %c44 = arith.constant 44 : index
    %c0_311 = arith.constant 0 : index
    %252 = vector.load %arg14[%c44, %c0_311] : memref<64x512xf32, #tpu.memory_space<vmem>>, vector<4x512xf32>
    tpu.vector_store %arg14[%c44, %c0_311], %251 {strides = array<i32>} : memref<64x512xf32, #tpu.memory_space<vmem>>, vector<4x512xf32>,
    %c1_312 = arith.constant 1 : index
    %c0_313 = arith.constant 0 : index
    %c0_314 = arith.constant 0 : index
    %c17_315 = arith.constant 17 : index
    %253 = vector.load %arg11[%c1_312, %c0_313, %c0_314, %c17_315] : memref<2x2x4x546xf32, #tpu.memory_space<vmem>>, vector<1x1x4x512xf32>
    %254 = vector.shape_cast %253 : vector<1x1x4x512xf32> to vector<4x512xf32>
    %c48_316 = arith.constant 48 : index
    %c0_317 = arith.constant 0 : index
    %255 = vector.load %arg14[%c48_316, %c0_317] : memref<64x512xf32, #tpu.memory_space<vmem>>, vector<4x512xf32>
    tpu.vector_store %arg14[%c48_316, %c0_317], %254 {strides = array<i32>} : memref<64x512xf32, #tpu.memory_space<vmem>>, vector<4x512xf32>,
    %c1_318 = arith.constant 1 : index
    %c0_319 = arith.constant 0 : index
    %c0_320 = arith.constant 0 : index
    %c18_321 = arith.constant 18 : index
    %256 = vector.load %arg11[%c1_318, %c0_319, %c0_320, %c18_321] : memref<2x2x4x546xf32, #tpu.memory_space<vmem>>, vector<1x1x4x512xf32>
    %257 = vector.shape_cast %256 : vector<1x1x4x512xf32> to vector<4x512xf32>
    %c1_322 = arith.constant 1 : index
    %c2_323 = arith.constant 2 : index
    %c0_324 = arith.constant 0 : index
    %c0_325 = arith.constant 0 : index
    %258 = vector.load %arg1[%c1_322, %c2_323, %c0_324, %c0_325] : memref<3x3x1x512xf32, #tpu.memory_space<vmem>>, vector<1x1x1x512xf32>
    %259 = vector.shape_cast %258 : vector<1x1x1x512xf32> to vector<1x512xf32>
    %260 = vector.broadcast %259 : vector<1x512xf32> to vector<4x512xf32>
    %261 = arith.mulf %257, %260 : vector<4x512xf32>
    %c52 = arith.constant 52 : index
    %c0_326 = arith.constant 0 : index
    %262 = vector.load %arg14[%c52, %c0_326] : memref<64x512xf32, #tpu.memory_space<vmem>>, vector<4x512xf32>
    tpu.vector_store %arg14[%c52, %c0_326], %261 {strides = array<i32>} : memref<64x512xf32, #tpu.memory_space<vmem>>, vector<4x512xf32>,
    %c1_327 = arith.constant 1 : index
    %c1_328 = arith.constant 1 : index
    %c0_329 = arith.constant 0 : index
    %c16_330 = arith.constant 16 : index
    %263 = vector.load %arg11[%c1_327, %c1_328, %c0_329, %c16_330] : memref<2x2x4x546xf32, #tpu.memory_space<vmem>>, vector<1x1x4x512xf32>
    %264 = vector.shape_cast %263 : vector<1x1x4x512xf32> to vector<4x512xf32>
    %c1_331 = arith.constant 1 : index
    %c0_332 = arith.constant 0 : index
    %c0_333 = arith.constant 0 : index
    %c0_334 = arith.constant 0 : index
    %265 = vector.load %arg1[%c1_331, %c0_332, %c0_333, %c0_334] : memref<3x3x1x512xf32, #tpu.memory_space<vmem>>, vector<1x1x1x512xf32>
    %266 = vector.shape_cast %265 : vector<1x1x1x512xf32> to vector<1x512xf32>
    %267 = vector.broadcast %266 : vector<1x512xf32> to vector<4x512xf32>
    %268 = arith.mulf %264, %267 : vector<4x512xf32>
    %c56_335 = arith.constant 56 : index
    %c0_336 = arith.constant 0 : index
    %269 = vector.load %arg14[%c56_335, %c0_336] : memref<64x512xf32, #tpu.memory_space<vmem>>, vector<4x512xf32>
    tpu.vector_store %arg14[%c56_335, %c0_336], %268 {strides = array<i32>} : memref<64x512xf32, #tpu.memory_space<vmem>>, vector<4x512xf32>,
    %c1_337 = arith.constant 1 : index
    %c1_338 = arith.constant 1 : index
    %c0_339 = arith.constant 0 : index
    %c17_340 = arith.constant 17 : index
    %270 = vector.load %arg11[%c1_337, %c1_338, %c0_339, %c17_340] : memref<2x2x4x546xf32, #tpu.memory_space<vmem>>, vector<1x1x4x512xf32>
    %271 = vector.shape_cast %270 : vector<1x1x4x512xf32> to vector<4x512xf32>
    %c60_341 = arith.constant 60 : index
    %c0_342 = arith.constant 0 : index
    %272 = vector.load %arg14[%c60_341, %c0_342] : memref<64x512xf32, #tpu.memory_space<vmem>>, vector<4x512xf32>
    tpu.vector_store %arg14[%c60_341, %c0_342], %271 {strides = array<i32>} : memref<64x512xf32, #tpu.memory_space<vmem>>, vector<4x512xf32>,
    %c0_343 = arith.constant 0 : index
    %c0_344 = arith.constant 0 : index
    %273 = vector.load %arg6[%c0_343, %c0_344] : memref<12x64xf32, #tpu.memory_space<vmem>>, vector<12x64xf32>
    %c0_345 = arith.constant 0 : index
    %c0_346 = arith.constant 0 : index
    %274 = vector.load %arg14[%c0_345, %c0_346] : memref<64x512xf32, #tpu.memory_space<vmem>>, vector<64x512xf32>
    %cst_347 = arith.constant dense<0.000000e+00> : vector<12x512xf32>
    %275 = tpu.matmul %273, %274, %cst_347 {dimension_numbers = #tpu.dot_dimension_numbers<[1], [0], [0], [1], [0, 0, 1, 1], [], []>} : vector<12x64xf32>, vector<64x512xf32>, vector<12x512xf32> -> vector<12x512xf32>
    %c0_348 = arith.constant 0 : index
    %c0_349 = arith.constant 0 : index
    %276 = vector.load %arg7[%c0_348, %c0_349] : memref<12x1xf32, #tpu.memory_space<vmem>>, vector<12x1xf32>
    %277 = vector.broadcast %276 : vector<12x1xf32> to vector<12x512xf32>
    %278 = arith.addf %275, %277 : vector<12x512xf32>
    %cst_350 = arith.constant 0.000000e+00 : f32
    %279 = vector.broadcast %cst_350 : f32 to vector<12x512xf32>
    %280 = arith.subf %279, %278 : vector<12x512xf32>
    %281 = math.exp %280 : vector<12x512xf32>
    %cst_351 = arith.constant 1.000000e+00 : f32
    %282 = vector.broadcast %cst_351 : f32 to vector<12x512xf32>
    %283 = arith.addf %282, %281 : vector<12x512xf32>
    %cst_352 = arith.constant 1.000000e+00 : f32
    %284 = vector.broadcast %cst_352 : f32 to vector<12x512xf32>
    %285 = arith.divf %284, %283 : vector<12x512xf32>
    %c16_353 = arith.constant 16 : index
    %c0_354 = arith.constant 0 : index
    %286 = vector.load %arg8[%c16_353, %c0_354] : memref<28x512xf32, #tpu.memory_space<vmem>>, vector<12x512xf32>
    tpu.vector_store %arg8[%c16_353, %c0_354], %285 {strides = array<i32>} : memref<28x512xf32, #tpu.memory_space<vmem>>, vector<12x512xf32>,
    return
  }
}

</mosaic_0001>

<bundles_post_ra>
// kernel: tile.28
= control target key start
LH: loop header
LB: loop body
LE: loop exit
PB: predicated region body
PF: predicated region fallthrough
CT: control target
= control target key end

     0   :  { %s22_s0 = inlined_call_operand.vmem [shape: f32[4], index: 0, kind: input, shape index: {}]   ;;  %s23_s1 = inlined_call_operand.vmem [shape: f32[4,4], index: 1, kind: output, shape index: {}]  }
   0x1   :  { %v4_v0 = vld [vmem:[%s22_s0] ss:$0 sm:$0xff] }
   0x2   :  { %5 = vst [vmem:[%s23_s1] sm:$0xf] %v4_v0 }

// kernel: tile.33
= control target key start
LH: loop header
LB: loop body
LE: loop exit
PB: predicated region body
PF: predicated region fallthrough
CT: control target
= control target key end

     0   :  { %vm7_vm0 = vcmask 31744   ;;  %s37_s8 = smov 4   ;;  %s38_s9 = smov 8   ;;  %vm13_vm1 = vcmask 130144   ;;  %vm19_vm2 = vcmask 97344   ;;  %vm25_vm3 = vcmask 64544   ;;  %s55_s0 = inlined_call_operand.vmem [shape: f32[4,4], index: 0, kind: input, shape index: {}]   ;;  %s56_s1 = inlined_call_operand.vmem [shape: f32[1,16], index: 1, kind: output, shape index: {}]  }
   0x1   :  { %v4_v0 = vld [vmem:[%s55_s0] sm:$0xf]  ;;  %s36_s0 = smov 12  }
   0x2   :  { %5 = vst [vmem:[#allocation1] sm:$0xf] %v4_v0 }
   0x9   :  { %v10_v1 = vld [vmem:[#allocation1 + $0x3] sm:$0x1]   ;;  %v22_v2 = vld [vmem:[#allocation1 + $0x1] sm:$0x1]   ;;  %v6_v3 = vld [vmem:[#allocation1] sm:$0x1]  }
   0xa   :  { %11 = vrot.lane.b32.xlu0 %v10_v1, %s36_s0  ;;  %23 = vrot.lane.b32.xlu1 %v22_v2, %s37_s8  ;;  %v16_v4 = vld [vmem:[#allocation1 + $0x2] sm:$0x1]   ;;  %8 = vst.msk [vmem:[#allocation0] sm:$0x1] %vm7_vm0, %v6_v3  }
   0xe   :  { %17 = vrot.lane.b32.xlu0 %v16_v4, %s38_s9 }
  0x7c   :  { %v12_v5 = vpop.permute.xlu0 %11   ;;  %v24_v6 = vpop.permute.xlu1 %23  }
  0x7d   :  { %14 = vst.msk [vmem:[#allocation0] sm:$0x1] %vm13_vm1, %v12_v5  }
  0x80   :  { %v18_v7 = vpop.permute.xlu0 %17  }
  0x81   :  { %20 = vst.msk [vmem:[#allocation0] sm:$0x1] %vm19_vm2, %v18_v7  }
  0x82   :  { %26 = vst.msk [vmem:[#allocation0] sm:$0x1] %vm25_vm3, %v24_v6  }
  0x89   :  { %v30_v8 = vld [vmem:[#allocation0] sm:$0x1] }
  0x8a   :  { %32 = vst [vmem:[%s56_s1] sm:$0x1] %v30_v8 }

// kernel: tile.38
= control target key start
LH: loop header
LB: loop body
LE: loop exit
PB: predicated region body
PF: predicated region fallthrough
CT: control target
= control target key end

     0   :  { %s22_s0 = inlined_call_operand.vmem [shape: f32[3], index: 0, kind: input, shape index: {}]   ;;  %s23_s1 = inlined_call_operand.vmem [shape: f32[4,3], index: 1, kind: output, shape index: {}]  }
   0x1   :  { %v4_v0 = vld [vmem:[%s22_s0] ss:$0 sm:$0xff] }
   0x2   :  { %5 = vst [vmem:[%s23_s1] sm:$0xf] %v4_v0 }

// kernel: tile.0
= control target key start
LH: loop header
LB: loop body
LE: loop exit
PB: predicated region body
PF: predicated region fallthrough
CT: control target
= control target key end

     0   :  { %vm7_vm0 = vcmask 7168   ;;  %s26_s10 = smov 126   ;;  %s49_s0 = inlined_call_operand.vmem [shape: f32[4,3], index: 0, kind: input, shape index: {}]   ;;  %s50_s1 = inlined_call_operand.vmem [shape: f32[12,1], index: 1, kind: output, shape index: {}]  }
   0x1   :  { %v4_v0 = vld [vmem:[%s49_s0] sm:$0xf]  ;;  %s25_s0 = smov 127  }
   0x2   :  { %5 = vst [vmem:[#allocation0] sm:$0xf] %v4_v0 }
   0x9   :  { %v9_v1 = vld [vmem:[#allocation0] sm:$0xf]  }
   0xa   :  { %v6_v2 = vld [vmem:[#allocation0] sm:$0xf]   ;;  %10 = vrot.lane.b32.xlu0 %v9_v1, %s25_s0 }
   0xb   :  { %8 = vst.msk [vmem:[%s50_s1] ss:$3 sm:$0xf] %vm7_vm0, %v6_v2   ;;  %v15_v3 = vld [vmem:[#allocation0] sm:$0xf]  }
   0xe   :  { %16 = vrot.lane.b32.xlu0 %v15_v3, %s26_s10 }
  0x7c   :  { %v11_v4 = vpop.permute.xlu0 %10  }
  0x7d   :  { %21 = vst.msk [vmem:[%s50_s1 + $0x1] ss:$3 sm:$0xf] %vm7_vm0, %v11_v4  }
  0x80   :  { %v17_v5 = vpop.permute.xlu0 %16  }
  0x81   :  { %22 = vst.msk [vmem:[%s50_s1 + $0x2] ss:$3 sm:$0xf] %vm7_vm0, %v17_v5  }

// kernel: generator_type_2_forward.1
= control target key start
LH: loop header
LB: loop body
LE: loop exit
PB: predicated region body
PF: predicated region fallthrough
CT: control target
= control target key end

     0   :  { %vm29_vm0 = vcmask 138240   ;;  %v3661_v2 = vmov 0.0   ;;  %vm33_vm1 = vcmask 277640   ;;  %s3662_s9 = smov 17   ;;  %v107_v3 = vlaneseq  ;;  %s3664_s26 = smov 2   ;;  %s5183_s0 = inlined_call_operand.vmem [shape: f32[12,512], index: 0, kind: input, shape index: {}]   ;;  %s5184_s1 = inlined_call_operand.vmem [shape: f32[3,3,1,512], index: 1, kind: input, shape index: {}]   ;;  %s5185_s3 = inlined_call_operand.vmem [shape: f32[2,8,1], index: 3, kind: input, shape index: {}]   ;;  %s5186_s2 = inlined_call_operand.vmem [shape: f32[8,108], index: 2, kind: input, shape index: {}]   ;;  %s5187_s5 = inlined_call_operand.vmem [shape: f32[2,16,1], index: 5, kind: input, shape index: {}]   ;;  %s5188_s4 = inlined_call_operand.vmem [shape: f32[16,72], index: 4, kind: input, shape index: {}]   ;;  %s5189_s8 = inlined_call_operand.vmem [shape: f32[28,512], index: 8, kind: output, shape index: {}]   ;;  %s5190_s7 = inlined_call_operand.vmem [shape: f32[12,1], index: 7, kind: input, shape index: {}]   ;;  %s5191_s6 = inlined_call_operand.vmem [shape: f32[12,64], index: 6, kind: input, shape index: {}]  }
   0x1   :  { %v39_v0 = vld [vmem:[%s5183_s0 + $0x10] sm:$0xff]  ;;  %v37_v1 = vld [vmem:[%s5183_s0] sm:$0xff]  ;;  %30 = vst.msk [vmem:[#allocation2] sm:$0xff] %vm29_vm0, %v3661_v2  ;;  %1286 = vst.msk [vmem:[#allocation3] sm:$0xff] %vm29_vm0, %v3661_v2  ;;  %1254 = vmatprep.mubr.f32.mxu1 %v3661_v2  ;;  %1183 = vmatprep.mubr.f32.mxu0 %v3661_v2  ;;  %vm5192_vm2 = vcmask 134144   ;;  %vm35_vm3 = vcmask 273544  }
   0x2   :  { %57 = vrot.lane.b32.xlu1 %v39_v0, %s3662_s9  ;;  %53 = vrot.lane.b32.xlu0 %v37_v1, %s3662_s9  ;;  %34 = vst.msk [vmem:[#allocation2 + $0x20] sm:$0xff] %vm33_vm1, %v3661_v2  ;;  %1287 = vst.msk [vmem:[#allocation3 + $0x20] sm:$0xff] %vm33_vm1, %v3661_v2  ;;  %v40_v4 = vld [vmem:[%s5183_s0 + $0x18] sm:$0xff]  ;;  %v38_v5 = vld [vmem:[%s5183_s0 + $0x8] sm:$0xff]  ;;  %v108_v6 = vshrl.u32 %v107_v3, 7  ;;  %s3665_s29 = smov 16  }
   0x3   :  { %v42_v7 = vld [vmem:[%s5183_s0 + $0x28] sm:$0xf]  ;;  %v41_v8 = vld [vmem:[%s5183_s0 + $0x20] sm:$0xf]  ;;  %v44_v11 = vld [vmem:[%s5183_s0 + $0x38] sm:$0xf] }
   0x4   :  { %v3757_v9 = vsub.s32 1, %v108_v6  ;;  %v3759_v10 = vsub.s32 0, %v108_v6  ;;  %v43_v12 = vld [vmem:[%s5183_s0 + $0x30] sm:$0xf]  ;;  %v3367_v13 = vld [vmem:[%s5184_s1 + $0x4] sm:$0xf] }
   0x5   :  { %32 = vst.msk [vmem:[#allocation2 + $0x28] sm:$0xf] %vm5192_vm2, %v3661_v2  ;;  %2132 = vst.msk [vmem:[#allocation4] sm:$0xf] %vm5192_vm2, %v3661_v2  ;;  %v3780_v14 = vsub.s32 3, %v108_v6  ;;  %v3786_v17 = vsub.s32 2, %v108_v6 }
   0x6   :  { %59 = vrot.lane.b32.xlu1 %v40_v4, %s3662_s9  ;;  %55 = vrot.lane.b32.xlu0 %v38_v5, %s3662_s9  ;;  %2158 = vst.msk [vmem:[#allocation4 + $0x14] sm:$0xf] %vm5192_vm2, %v3661_v2  ;;  %2178 = vst.msk [vmem:[#allocation4 + $0x28] sm:$0xf] %vm5192_vm2, %v3661_v2  ;;  %v163_v15 = vrot.slane %v3367_v13, %v3757_v9  ;;  %v159_v16 = vrot.slane %v3367_v13, %v3759_v10  ;;  %s3663_s0 = smov 1   ;;  %s3666_s11 = smov 18  }
   0x7   :  { %2202 = vst.msk [vmem:[#allocation4 + $0x3c] sm:$0xf] %vm5192_vm2, %v3661_v2  ;;  %v171_v18 = vrot.slane %v3367_v13, %v3780_v14  ;;  %v167_v19 = vrot.slane %v3367_v13, %v3786_v17  ;;  %v3368_v20 = vld [vmem:[%s5184_s1 + $0x8] sm:$0xf]  ;;  %v3369_v25 = vld [vmem:[%s5184_s1 + $0xc] sm:$0xf] }
   0x8   :  { %36 = vst.msk [vmem:[#allocation2 + $0x48] sm:$0xf] %vm35_vm3, %v3661_v2  ;;  %2133 = vst.msk [vmem:[#allocation4 + $0x10] sm:$0xf] %vm35_vm3, %v3661_v2  ;;  %v290_v21 = vrot.slane %v3368_v20, %v3757_v9  ;;  %v286_v22 = vrot.slane %v3368_v20, %v3759_v10  ;;  %v298_v23 = vrot.slane %v3368_v20, %v3780_v14  ;;  %v3370_v30 = vld [vmem:[%s5184_s1 + $0x14] sm:$0xf] }
   0x9   :  { %2159 = vst.msk [vmem:[#allocation4 + $0x24] sm:$0xf] %vm35_vm3, %v3661_v2  ;;  %2179 = vst.msk [vmem:[#allocation4 + $0x38] sm:$0xf] %vm35_vm3, %v3661_v2  ;;  %v294_v24 = vrot.slane %v3368_v20, %v3786_v17  ;;  %v401_v26 = vrot.slane %v3369_v25, %v3757_v9  ;;  %v397_v27 = vrot.slane %v3369_v25, %v3759_v10  ;;  %v3371_v35 = vld [vmem:[%s5184_s1 + $0x18] sm:$0xf] }
   0xa   :  { %63 = vrot.lane.b32.xlu1 %v42_v7, %s3662_s9  ;;  %61 = vrot.lane.b32.xlu0 %v41_v8, %s3662_s9  ;;  %2203 = vst.msk [vmem:[#allocation4 + $0x4c] sm:$0xf] %vm35_vm3, %v3661_v2  ;;  %v409_v28 = vrot.slane %v3369_v25, %v3780_v14  ;;  %v405_v29 = vrot.slane %v3369_v25, %v3786_v17  ;;  %s3667_s14 = smov 32   ;;  %v3372_v40 = vld [vmem:[%s5184_s1 + $0x1c] sm:$0xf]  ;;  %s3668_s17 = smov 33  }
   0xb   :  { %v592_v31 = vrot.slane %v3370_v30, %v3757_v9  ;;  %v588_v32 = vrot.slane %v3370_v30, %v3759_v10  ;;  %v600_v33 = vrot.slane %v3370_v30, %v3780_v14  ;;  %v596_v34 = vrot.slane %v3370_v30, %v3786_v17  ;;  %v3373_v45 = vld [vmem:[%s5184_s1 + $0x20] sm:$0xf]  ;;  %s3669_s20 = smov 34   ;;  %s5199_s23 = smov 126  }
   0xc   :  { %v718_v36 = vrot.slane %v3371_v35, %v3757_v9  ;;  %v714_v37 = vrot.slane %v3371_v35, %v3759_v10  ;;  %v726_v38 = vrot.slane %v3371_v35, %v3780_v14  ;;  %v722_v39 = vrot.slane %v3371_v35, %v3786_v17  ;;  %v105_v50 = vld [vmem:[%s5184_s1] sm:$0xf]  ;;  %s3671_s24 = smov 127   ;;  %s3672_s25 = smov 112  }
   0xd   :  { %v829_v41 = vrot.slane %v3372_v40, %v3757_v9  ;;  %v825_v42 = vrot.slane %v3372_v40, %v3759_v10  ;;  %v837_v43 = vrot.slane %v3372_v40, %v3780_v14  ;;  %v833_v44 = vrot.slane %v3372_v40, %v3786_v17  ;;  %s3673_s27 = smov 111   ;;  %s3674_s28 = smov 110  }
   0xe   :  { %67 = vrot.lane.b32.xlu1 %v44_v11, %s3662_s9  ;;  %65 = vrot.lane.b32.xlu0 %v43_v12, %s3662_s9  ;;  %v955_v46 = vrot.slane %v3373_v45, %v3757_v9  ;;  %v951_v47 = vrot.slane %v3373_v45, %v3759_v10  ;;  %v963_v48 = vrot.slane %v3373_v45, %v3780_v14  ;;  %vm85_vm4 = vcmask 1047688   ;;  %s3675_s30 = smov 96   ;;  %s3676_s10 = smov 95  }
   0xf   :  { %v959_v49 = vrot.slane %v3373_v45, %v3786_v17  ;;  %v114_v53 = vrot.slane %v105_v50, %v3757_v9  ;;  %v122_v54 = vrot.slane %v105_v50, %v3780_v14  ;;  %v118_v55 = vrot.slane %v105_v50, %v3786_v17  ;;  %s3677_s12 = smov 94  }
  0x10   :  { %v110_v61 = vrot.slane %v105_v50, %v3759_v10  ;;  %vm5193_vm5 = vcmask 1043592   ;;  %vm307_vm6 = vcmask 15360   ;;  %vm180_vm7 = vcmask 7168  }
  0x11   :  { %vm418_vm8 = vcmask 130048   ;;  %vm209_vm9 = vcmask 1043456   ;;  %vm609_vm10 = vcmask 146432   ;;  %vm5202_vm11 = vcmask 261120  }
  0x12   :  { %174 = vrot.lane.b32.xlu1 %v163_v15, %s3663_s0  ;;  %172 = vrot.lane.b32.xlu0 %v159_v16, %s3663_s0  ;;  %vm846_vm12 = vcmask 269312   ;;  %vm5198_vm13 = vcmask 1031168   ;;  %vm972_vm14 = vcmask 277504   ;;  %vm482_vm15 = vcmask 916480  }
  0x13   :  { %vm5201_vm1 = vcmask 1039360   ;;  %vm5197_vm3 = vcmask 908288  }
  0x16   :  { %178 = vrot.lane.b32.xlu1 %v171_v18, %s3663_s0  ;;  %176 = vrot.lane.b32.xlu0 %v167_v19, %s3663_s0 }
  0x1a   :  { %301 = vrot.lane.b32.xlu1 %v290_v21, %s3664_s26  ;;  %299 = vrot.lane.b32.xlu0 %v286_v22, %s3664_s26 }
  0x1e   :  { %305 = vrot.lane.b32.xlu1 %v298_v23, %s3664_s26  ;;  %303 = vrot.lane.b32.xlu0 %v294_v24, %s3664_s26 }
  0x22   :  { %412 = vrot.lane.b32.xlu1 %v401_v26, %s3665_s29  ;;  %410 = vrot.lane.b32.xlu0 %v397_v27, %s3665_s29 }
  0x26   :  { %416 = vrot.lane.b32.xlu1 %v409_v28, %s3665_s29  ;;  %414 = vrot.lane.b32.xlu0 %v405_v29, %s3665_s29 }
  0x2a   :  { %603 = vrot.lane.b32.xlu1 %v592_v31, %s3666_s11  ;;  %601 = vrot.lane.b32.xlu0 %v588_v32, %s3666_s11 }
  0x2e   :  { %607 = vrot.lane.b32.xlu1 %v600_v33, %s3666_s11  ;;  %605 = vrot.lane.b32.xlu0 %v596_v34, %s3666_s11 }
  0x32   :  { %729 = vrot.lane.b32.xlu1 %v718_v36, %s3667_s14  ;;  %727 = vrot.lane.b32.xlu0 %v714_v37, %s3667_s14 }
  0x36   :  { %733 = vrot.lane.b32.xlu1 %v726_v38, %s3667_s14  ;;  %731 = vrot.lane.b32.xlu0 %v722_v39, %s3667_s14 }
  0x3a   :  { %840 = vrot.lane.b32.xlu1 %v829_v41, %s3668_s17  ;;  %838 = vrot.lane.b32.xlu0 %v825_v42, %s3668_s17 }
  0x3e   :  { %844 = vrot.lane.b32.xlu1 %v837_v43, %s3668_s17  ;;  %842 = vrot.lane.b32.xlu0 %v833_v44, %s3668_s17 }
  0x42   :  { %966 = vrot.lane.b32.xlu1 %v955_v46, %s3669_s20  ;;  %964 = vrot.lane.b32.xlu0 %v951_v47, %s3669_s20 }
  0x46   :  { %970 = vrot.lane.b32.xlu1 %v963_v48, %s3669_s20  ;;  %968 = vrot.lane.b32.xlu0 %v959_v49, %s3669_s20 }
  0x74   :  { %v58_v51 = vpop.permute.xlu1 %57  ;;  %v54_v52 = vpop.permute.xlu0 %53 }
  0x75   :  { %86 = vst.msk [vmem:[#allocation2] sm:$0xff] %vm85_vm4, %v54_v52 }
  0x78   :  { %v60_v56 = vpop.permute.xlu1 %59  ;;  %v56_v57 = vpop.permute.xlu0 %55 }
  0x79   :  { %v3873_v58 = vsel %vm29_vm0, %v58_v51, %v60_v56  ;;  %90 = vst.msk [vmem:[#allocation2 + $0x20] sm:$0xff] %vm29_vm0, %v60_v56  ;;  %v3877_v59 = vsel %vm29_vm0, %v54_v52, %v56_v57  ;;  %v3880_v60 = vsel %vm29_vm0, %v56_v57, %v58_v51 }
  0x7a   :  { %v3884_v62 = vmul.f32 %v114_v53, %v3877_v59  ;;  %v3887_v63 = vmul.f32 %v122_v54, %v3873_v58  ;;  %v3890_v0 = vmul.f32 %v118_v55, %v3880_v60 }
  0x7c   :  { %v3892_v1 = vld [vmem:[#allocation2] sm:$0xff]  ;;  %v64_v3 = vpop.permute.xlu1 %63  ;;  %v62_v4 = vpop.permute.xlu0 %61 }
  0x7d   :  { %v72_v5 = vsel %vm29_vm0, %v62_v4, %v64_v3  ;;  %92 = vst.msk [vmem:[#allocation2 + $0x28] sm:$0xf] %vm5193_vm5, %v62_v4  ;;  %v3897_v6 = vmul.f32 %v110_v61, %v3892_v1  ;;  %vm5195_vm5 = vcmask 785408  }
  0x7e   :  { %93 = vst [vmem:[#allocation2 + $0x30] sm:$0xf] %v72_v5 }
  0x80   :  { %v68_v7 = vpop.permute.xlu1 %67  ;;  %v66_v8 = vpop.permute.xlu0 %65  ;;  %v3912_v30 = vld [vmem:[#allocation2 + $0x20] sm:$0xff] }
  0x81   :  { %96 = vst.msk [vmem:[#allocation2 + $0x48] sm:$0xf] %vm5192_vm2, %v68_v7  ;;  %v73_v11 = vsel %vm29_vm0, %v64_v3, %v66_v8  ;;  %v74_v12 = vsel %vm29_vm0, %v66_v8, %v68_v7  ;;  %vm5194_vm2 = vcmask 900096  }
  0x82   :  { %94 = vst [vmem:[#allocation2 + $0x38] sm:$0xf] %v73_v11  ;;  %95 = vst [vmem:[#allocation2 + $0x40] sm:$0xf] %v74_v12 }
  0x84   :  { %v101_v13 = vld [vmem:[#allocation2 + $0x28] sm:$0xf]  ;;  %v3902_v15 = vpop.permute.xlu1 %174  ;;  %v3904_v16 = vpop.permute.xlu0 %172 }
  0x85   :  { %v131_v18 = vmul.f32 %v110_v61, %v101_v13  ;;  %v275_v25 = vld [vmem:[#allocation2 + $0x28] sm:$0xf]  ;;  %v102_v34 = vld [vmem:[#allocation2 + $0x30] sm:$0xf]  ;;  %v189_v57 = vmul.f32 %v3904_v16, %v3892_v1 }
  0x86   :  { %v132_v38 = vmul.f32 %v114_v53, %v102_v34  ;;  %v276_v41 = vld [vmem:[#allocation2 + $0x30] sm:$0xf]  ;;  %v148_v51 = vld [vmem:[#allocation2 + $0x28] sm:$0xf] }
  0x87   :  { %139 = vst [vmem:[#allocation5 + $0x20] sm:$0xf] %v131_v18  ;;  %v194_v61 = vmul.f32 %v3904_v16, %v148_v51  ;;  %v210_v5 = vrot.slane %v189_v57, 4 }
  0x88   :  { %v3906_v19 = vpop.permute.xlu1 %178  ;;  %v3908_v20 = vpop.permute.xlu0 %176  ;;  %140 = vst [vmem:[#allocation5 + $0x28] sm:$0xf] %v132_v38  ;;  %v279_v40 = vld [vmem:[#allocation2 + $0x48] sm:$0xf] }
  0x89   :  { %v103_v21 = vld [vmem:[#allocation2 + $0x38] sm:$0xf]  ;;  %v104_v35 = vld [vmem:[#allocation2 + $0x40] sm:$0xf]  ;;  %v3931_v49 = vmul.f32 %v3912_v30, %v3906_v19  ;;  %v3936_v50 = vsel %vm180_vm7, %v3902_v15, %v3908_v20  ;;  %v215_v8 = vrot.slane %v194_v61, 4 }
  0x8a   :  { %v133_v22 = vmul.f32 %v118_v55, %v103_v21  ;;  %v134_v39 = vmul.f32 %v122_v54, %v104_v35  ;;  %v278_v46 = vld [vmem:[#allocation2 + $0x40] sm:$0xf]  ;;  %v277_v52 = vld [vmem:[#allocation2 + $0x38] sm:$0xf]  ;;  %v3943_v56 = vmul.f32 %v3936_v50, %v3880_v60 }
  0x8b   :  { %v214_v54 = vrot.slane %v3931_v49, 4  ;;  %v150_v51 = vld [vmem:[#allocation2 + $0x38] sm:$0xf]  ;;  %v389_v61 = vld [vmem:[#allocation2 + $0x40] sm:$0xf] }
  0x8c   :  { %v302_v23 = vpop.permute.xlu1 %301  ;;  %v300_v24 = vpop.permute.xlu0 %299  ;;  %141 = vst [vmem:[#allocation5 + $0x30] sm:$0xf] %v133_v22  ;;  %142 = vst [vmem:[#allocation5 + $0x38] sm:$0xf] %v134_v39  ;;  %v212_v4 = vrot.slane %v3943_v56, 4  ;;  %v196_v57 = vmul.f32 %v3936_v50, %v150_v51 }
  0x8d   :  { %v321_v26 = vmul.f32 %v300_v24, %v275_v25  ;;  %v308_v27 = vsel %vm307_vm6, %v300_v24, %v302_v23  ;;  %v316_v36 = vmul.f32 %v300_v24, %v3892_v1  ;;  %v181_v24 = vsel %vm180_vm7, %v3904_v16, %v3902_v15  ;;  %v386_v25 = vld [vmem:[#allocation2 + $0x28] sm:$0xf]  ;;  %v149_v16 = vld [vmem:[#allocation2 + $0x30] sm:$0xf] }
  0x8e   :  { %v317_v32 = vmul.f32 %v308_v27, %v3877_v59  ;;  %v322_v43 = vmul.f32 %v308_v27, %v276_v41  ;;  %v152_v15 = vld [vmem:[#allocation2 + $0x48] sm:$0xf]  ;;  %v195_v38 = vmul.f32 %v181_v24, %v149_v16  ;;  %v219_v49 = vrot.slane %v196_v57, 4 }
  0x8f   :  { %346 = vrot.lane.b32.xlu1 %v321_v26, %s5199_s23  ;;  %v581_v57 = vld [vmem:[#allocation2 + $0x48] sm:$0xf] }
  0x90   :  { %v306_v28 = vpop.permute.xlu1 %305  ;;  %v304_v29 = vpop.permute.xlu0 %303 }
  0x91   :  { %v320_v31 = vmul.f32 %v306_v28, %v3912_v30  ;;  %v310_v33 = vsel %vm307_vm6, %v304_v29, %v306_v28  ;;  %v325_v42 = vmul.f32 %v306_v28, %v279_v40  ;;  %v309_v44 = vsel %vm307_vm6, %v302_v23, %v304_v29 }
  0x92   :  { %v319_v37 = vmul.f32 %v310_v33, %v3873_v58  ;;  %v324_v47 = vmul.f32 %v310_v33, %v278_v46  ;;  %v318_v48 = vmul.f32 %v309_v44, %v3880_v60  ;;  %v323_v55 = vmul.f32 %v309_v44, %v277_v52  ;;  %v390_v46 = vld [vmem:[#allocation2 + $0x48] sm:$0xf] }
  0x93   :  { %344 = vrot.lane.b32.xlu0 %v320_v31, %s5199_s23  ;;  %338 = vrot.lane.b32.xlu1 %v317_v32, %s5199_s23  ;;  %v216_v23 = vsel %vm209_vm9, %v210_v5, %v215_v8  ;;  %v190_v28 = vmul.f32 %v181_v24, %v3877_v59  ;;  %v183_v31 = vsel %vm180_vm7, %v3908_v20, %v3906_v19  ;;  %v217_v44 = vrot.slane %v195_v38, 4 }
  0x94   :  { %v3926_v45 = vpop.permute.xlu1 %412  ;;  %v411_v53 = vpop.permute.xlu0 %410  ;;  %v192_v35 = vmul.f32 %v183_v31, %v3873_v58 }
  0x95   :  { %v419_v11 = vsel %vm418_vm8, %v411_v53, %v3926_v45  ;;  %v427_v18 = vmul.f32 %v411_v53, %v3892_v1  ;;  %v432_v32 = vmul.f32 %v411_v53, %v386_v25  ;;  %v211_v33 = vrot.slane %v190_v28, 4 }
  0x96   :  { %v428_v21 = vmul.f32 %v419_v11, %v3877_v59  ;;  %v213_v40 = vrot.slane %v192_v35, 4  ;;  %v220_v25 = vsel %vm209_vm9, %v212_v4, %v219_v49 }
  0x97   :  { %336 = vrot.lane.b32.xlu0 %v316_v36, %s5199_s23  ;;  %342 = vrot.lane.b32.xlu1 %v319_v37, %s5199_s23  ;;  %v447_v26 = vrot.slane %v427_v18, 4  ;;  %v198_v36 = vmul.f32 %v3906_v19, %v152_v15  ;;  %v151_v37 = vld [vmem:[#allocation2 + $0x40] sm:$0xf]  ;;  %v452_v39 = vrot.slane %v432_v32, 4  ;;  %v513_v32 = vld [vmem:[#allocation2 + $0x30] sm:$0xf] }
  0x98   :  { %v417_v3 = vpop.permute.xlu1 %416  ;;  %v415_v12 = vpop.permute.xlu0 %414  ;;  %v448_v27 = vrot.slane %v428_v21, 4  ;;  %v197_v20 = vmul.f32 %v183_v31, %v151_v37  ;;  %v516_v31 = vld [vmem:[#allocation2 + $0x48] sm:$0xf]  ;;  %v578_v37 = vld [vmem:[#allocation2 + $0x30] sm:$0xf] }
  0x99   :  { %v3954_v7 = vmul.f32 %v417_v3, %v3912_v30  ;;  %v421_v22 = vsel %vm418_vm8, %v415_v12, %v417_v3  ;;  %v420_v41 = vsel %vm418_vm8, %v3926_v45, %v415_v12  ;;  %v436_v52 = vmul.f32 %v417_v3, %v390_v46 }
  0x9a   :  { %v430_v29 = vmul.f32 %v421_v22, %v3873_v58  ;;  %v221_v19 = vrot.slane %v197_v20, 4  ;;  %v435_v8 = vmul.f32 %v421_v22, %v389_v61 }
  0x9b   :  { %354 = vrot.lane.b32.xlu0 %v325_v42, %s5199_s23  ;;  %348 = vrot.lane.b32.xlu1 %v322_v43, %s5199_s23  ;;  %v451_v13 = vrot.slane %v3954_v7, 4  ;;  %v453_v42 = vsel %vm209_vm9, %v447_v26, %v452_v39  ;;  %v223_v43 = vrot.slane %v198_v36, 4  ;;  %v460_v3 = vrot.slane %v436_v52, 4  ;;  %v515_v36 = vld [vmem:[#allocation2 + $0x40] sm:$0xf] }
  0x9c   :  { %v450_v34 = vrot.slane %v430_v29, 4  ;;  %v222_v12 = vsel %vm209_vm9, %v213_v40, %v221_v19  ;;  %v458_v21 = vrot.slane %v435_v8, 4  ;;  %v604_v56 = vpop.permute.xlu1 %603  ;;  %v512_v19 = vld [vmem:[#allocation2 + $0x28] sm:$0xf] }
  0x9d   :  { %v224_v45 = vsel %vm209_vm9, %v214_v54, %v223_v43  ;;  %v461_v50 = vsel %vm209_vm9, %v451_v13, %v460_v3 }
  0x9e   :  { %v459_v24 = vsel %vm209_vm9, %v450_v34, %v458_v21 }
  0x9f   :  { %352 = vrot.lane.b32.xlu1 %v324_v47, %s5199_s23  ;;  %340 = vrot.lane.b32.xlu0 %v318_v48, %s5199_s23  ;;  %v387_v47 = vld [vmem:[#allocation2 + $0x30] sm:$0xf]  ;;  %v429_v48 = vmul.f32 %v420_v41, %v3880_v60 }
  0xa0   :  { %v433_v53 = vmul.f32 %v419_v11, %v387_v47  ;;  %v608_v29 = vpop.permute.xlu1 %607 }
  0xa1   :  { %v627_v8 = vmul.f32 %v608_v29, %v581_v57 }
  0xa2   :  { %v454_v18 = vrot.slane %v433_v53, 4 }
  0xa3   :  { %233 = vrot.lane.b32.xlu1 %v214_v54, %s3671_s24  ;;  %350 = vrot.lane.b32.xlu0 %v323_v55, %s5199_s23  ;;  %v218_v55 = vsel %vm209_vm9, %v211_v33, %v217_v44  ;;  %v388_v54 = vld [vmem:[#allocation2 + $0x38] sm:$0xf] }
  0xa4   :  { %v434_v11 = vmul.f32 %v420_v41, %v388_v54  ;;  %v730_v41 = vpop.permute.xlu1 %729  ;;  %v577_v54 = vld [vmem:[#allocation2 + $0x28] sm:$0xf] }
  0xa6   :  { %v456_v22 = vrot.slane %v434_v11, 4 }
  0xa7   :  { %229 = vrot.lane.b32.xlu1 %v212_v4, %s3671_s24  ;;  %225 = vrot.lane.b32.xlu0 %v210_v5, %s3671_s24  ;;  %v449_v5 = vrot.slane %v429_v48, 4  ;;  %v579_v48 = vld [vmem:[#allocation2 + $0x38] sm:$0xf] }
  0xa8   :  { %v4044_v51 = vpop.permute.xlu1 %733 }
  0xa9   :  { %v457_v7 = vsel %vm209_vm9, %v449_v5, %v456_v22  ;;  %v651_v22 = vrot.slane %v627_v8, 4 }
  0xab   :  { %235 = vrot.lane.b32.xlu1 %v216_v23, %s3671_s24  ;;  %470 = vrot.lane.b32.xlu0 %v451_v13, %s3672_s25  ;;  %v455_v23 = vsel %vm209_vm9, %v448_v27, %v454_v18 }
  0xac   :  { %v841_v49 = vpop.permute.xlu1 %840 }
  0xaf   :  { %462 = vrot.lane.b32.xlu0 %v447_v26, %s3672_s25  ;;  %464 = vrot.lane.b32.xlu1 %v448_v27, %s3672_s25  ;;  %v4013_v26 = vpop.permute.xlu0 %601  ;;  %v514_v27 = vld [vmem:[#allocation2 + $0x38] sm:$0xf] }
  0xb0   :  { %v610_v15 = vsel %vm609_vm10, %v4013_v26, %v604_v56  ;;  %v618_v52 = vmul.f32 %v4013_v26, %v3892_v1  ;;  %v623_v21 = vmul.f32 %v4013_v26, %v577_v54 }
  0xb3   :  { %227 = vrot.lane.b32.xlu0 %v211_v33, %s3671_s24  ;;  %468 = vrot.lane.b32.xlu1 %v450_v34, %s3672_s25  ;;  %v606_v13 = vpop.permute.xlu0 %605  ;;  %v619_v33 = vmul.f32 %v610_v15, %v3877_v59  ;;  %v622_v34 = vmul.f32 %v608_v29, %v3912_v30 }
  0xb4   :  { %v611_v4 = vsel %vm609_vm10, %v604_v56, %v606_v13  ;;  %v612_v35 = vsel %vm609_vm10, %v606_v13, %v608_v29  ;;  %v643_v56 = vrot.slane %v623_v21, 4 }
  0xb5   :  { %v620_v28 = vmul.f32 %v611_v4, %v3880_v60  ;;  %v639_v38 = vrot.slane %v619_v33, 4  ;;  %v642_v39 = vrot.slane %v622_v34, 4  ;;  %v621_v20 = vmul.f32 %v612_v35, %v3873_v58  ;;  %v706_v34 = vld [vmem:[#allocation2 + $0x40] sm:$0xf] }
  0xb6   :  { %v625_v53 = vmul.f32 %v611_v4, %v579_v48 }
  0xb7   :  { %231 = vrot.lane.b32.xlu0 %v213_v40, %s3671_s24  ;;  %472 = vrot.lane.b32.xlu1 %v453_v42, %s3672_s25  ;;  %v640_v16 = vrot.slane %v620_v28, 4  ;;  %v624_v40 = vmul.f32 %v610_v15, %v578_v37  ;;  %v580_v42 = vld [vmem:[#allocation2 + $0x40] sm:$0xf]  ;;  %v641_v43 = vrot.slane %v621_v20, 4  ;;  %v4040_v47 = vpop.permute.xlu0 %727  ;;  %v652_v26 = vsel %vm209_vm9, %v642_v39, %v651_v22  ;;  %v705_v20 = vld [vmem:[#allocation2 + $0x38] sm:$0xf] }
  0xb8   :  { %v626_v44 = vmul.f32 %v612_v35, %v580_v42  ;;  %v736_v3 = vsel %vm5202_vm11, %v4040_v47, %v730_v41  ;;  %v748_v15 = vmul.f32 %v4044_v51, %v3912_v30  ;;  %v744_v37 = vmul.f32 %v4040_v47, %v3892_v1 }
  0xb9   :  { %v645_v46 = vrot.slane %v624_v40, 4  ;;  %v745_v11 = vmul.f32 %v736_v3, %v3877_v59 }
  0xbb   :  { %243 = vrot.lane.b32.xlu0 %v224_v45, %s3671_s24  ;;  %237 = vrot.lane.b32.xlu1 %v218_v55, %s3671_s24  ;;  %v649_v45 = vrot.slane %v626_v44, 4  ;;  %v646_v55 = vsel %vm209_vm9, %v639_v38, %v645_v46  ;;  %v732_v61 = vpop.permute.xlu0 %731 }
  0xbc   :  { %v737_v13 = vsel %vm5202_vm11, %v730_v41, %v732_v61 }
  0xbd   :  { %v650_v18 = vsel %vm209_vm9, %v641_v43, %v649_v45  ;;  %v751_v42 = vmul.f32 %v737_v13, %v705_v20 }
  0xbf   :  { %241 = vrot.lane.b32.xlu1 %v222_v12, %s3671_s24  ;;  %466 = vrot.lane.b32.xlu0 %v449_v5, %s3672_s25  ;;  %v638_v5 = vrot.slane %v618_v52, 4  ;;  %v647_v12 = vrot.slane %v625_v53, 4  ;;  %v707_v52 = vld [vmem:[#allocation2 + $0x48] sm:$0xf]  ;;  %v817_v53 = vld [vmem:[#allocation2 + $0x40] sm:$0xf] }
  0xc0   :  { %v753_v57 = vmul.f32 %v4044_v51, %v707_v52 }
  0xc1   :  { %v644_v28 = vsel %vm209_vm9, %v638_v5, %v643_v56 }
  0xc3   :  { %474 = vrot.lane.b32.xlu1 %v455_v23, %s3672_s25  ;;  %480 = vrot.lane.b32.xlu0 %v461_v50, %s3672_s25  ;;  %v738_v23 = vsel %vm5202_vm11, %v732_v61, %v4044_v51  ;;  %v648_v50 = vsel %vm209_vm9, %v640_v16, %v647_v12 }
  0xc7   :  { %478 = vrot.lane.b32.xlu1 %v459_v24, %s3672_s25  ;;  %239 = vrot.lane.b32.xlu0 %v220_v25, %s3671_s24  ;;  %v4062_v24 = vpop.permute.xlu0 %838  ;;  %v4066_v25 = vpop.permute.xlu1 %844 }
  0xcb   :  { %531 = vrot.lane.b32.xlu1 %v3880_v60, %s3673_s27  ;;  %476 = vrot.lane.b32.xlu0 %v457_v7, %s3672_s25  ;;  %v747_v7 = vmul.f32 %v738_v23, %v3873_v58  ;;  %v843_v4 = vpop.permute.xlu0 %842  ;;  %v4075_v29 = vpop.permute.xlu1 %966 }
  0xcc   :  { %v848_v46 = vsel %vm846_vm12, %v841_v49, %v843_v4 }
  0xcf   :  { %535 = vrot.lane.b32.xlu1 %v3912_v30, %s3673_s27  ;;  %529 = vrot.lane.b32.xlu0 %v3877_v59, %s3673_s27  ;;  %v4083_v33 = vpop.permute.xlu0 %964  ;;  %v4087_v35 = vpop.permute.xlu1 %970 }
  0xd3   :  { %541 = vrot.lane.b32.xlu1 %v514_v27, %s3673_s27  ;;  %533 = vrot.lane.b32.xlu0 %v3873_v58, %s3673_s27  ;;  %v746_v27 = vmul.f32 %v737_v13, %v3880_v60  ;;  %v4096_v40 = vpop.permute.xlu0 %968  ;;  %v818_v13 = vld [vmem:[#allocation2 + $0x48] sm:$0xf] }
  0xd7   :  { %545 = vrot.lane.b32.xlu1 %v516_v31, %s3673_s27  ;;  %539 = vrot.lane.b32.xlu0 %v513_v32, %s3673_s27  ;;  %v704_v31 = vld [vmem:[#allocation2 + $0x30] sm:$0xf] }
  0xd8   :  { %v750_v32 = vmul.f32 %v736_v3, %v704_v31  ;;  %v859_v3 = vmul.f32 %v4066_v25, %v3912_v30 }
  0xdb   :  { %543 = vrot.lane.b32.xlu0 %v515_v36, %s3673_s27  ;;  %657 = vrot.lane.b32.xlu1 %v640_v16, %s3674_s28  ;;  %v847_v16 = vsel %vm846_vm12, %v4062_v24, %v841_v49  ;;  %v752_v36 = vmul.f32 %v738_v23, %v706_v34  ;;  %v703_v34 = vld [vmem:[#allocation2 + $0x28] sm:$0xf] }
  0xdf   :  { %655 = vrot.lane.b32.xlu0 %v639_v38, %s3674_s28  ;;  %661 = vrot.lane.b32.xlu1 %v642_v39, %s3674_s28  ;;  %v856_v38 = vmul.f32 %v847_v16, %v3877_v59  ;;  %v849_v39 = vsel %vm846_vm12, %v843_v4, %v4066_v25  ;;  %v864_v4 = vmul.f32 %v4066_v25, %v818_v13 }
  0xe0   :  { %v863_v8 = vmul.f32 %v849_v39, %v817_v53 }
  0xe1   :  { %v876_v44 = vrot.slane %v856_v38, 4  ;;  %v888_v38 = vrot.slane %v864_v4, 4  ;;  %v943_v4 = vld [vmem:[#allocation2 + $0x40] sm:$0xf] }
  0xe2   :  { %v886_v23 = vrot.slane %v863_v8, 4  ;;  %v985_v8 = vmul.f32 %v4087_v35, %v3912_v30  ;;  %v941_v30 = vld [vmem:[#allocation2 + $0x30] sm:$0xf] }
  0xe3   :  { %659 = vrot.lane.b32.xlu0 %v641_v43, %s3674_s28  ;;  %537 = vrot.lane.b32.xlu1 %v512_v19, %s3673_s27  ;;  %v815_v43 = vld [vmem:[#allocation2 + $0x30] sm:$0xf]  ;;  %v858_v19 = vmul.f32 %v849_v39, %v3873_v58 }
  0xe4   :  { %v861_v48 = vmul.f32 %v847_v16, %v815_v43 }
  0xe5   :  { %v878_v61 = vrot.slane %v858_v19, 4 }
  0xe6   :  { %v882_v12 = vrot.slane %v861_v48, 4 }
  0xe7   :  { %527 = vrot.lane.b32.xlu0 %v3892_v1, %s3673_s27  ;;  %665 = vrot.lane.b32.xlu1 %v646_v55, %s3674_s28  ;;  %v887_v16 = vsel %vm209_vm9, %v878_v61, %v886_v23 }
  0xe8   :  { %v883_v22 = vsel %vm209_vm9, %v876_v44, %v882_v12 }
  0xeb   :  { %653 = vrot.lane.b32.xlu0 %v638_v5, %s3674_s28  ;;  %669 = vrot.lane.b32.xlu1 %v650_v18, %s3674_s28  ;;  %v857_v5 = vmul.f32 %v848_v46, %v3880_v60  ;;  %v816_v18 = vld [vmem:[#allocation2 + $0x38] sm:$0xf] }
  0xec   :  { %v862_v49 = vmul.f32 %v848_v46, %v816_v18  ;;  %v974_v46 = vsel %vm972_vm14, %v4075_v29, %v4096_v40 }
  0xed   :  { %v877_v21 = vrot.slane %v857_v5, 4 }
  0xef   :  { %667 = vrot.lane.b32.xlu0 %v648_v50, %s3674_s28  ;;  %766 = vrot.lane.b32.xlu1 %v745_v11, %s3675_s30 }
  0xf3   :  { %671 = vrot.lane.b32.xlu0 %v652_v26, %s3674_s28  ;;  %770 = vrot.lane.b32.xlu1 %v747_v7, %s3675_s30  ;;  %v814_v7 = vld [vmem:[#allocation2 + $0x28] sm:$0xf]  ;;  %v855_v26 = vmul.f32 %v4062_v24, %v3892_v1 }
  0xf4   :  { %v860_v56 = vmul.f32 %v4062_v24, %v814_v7 }
  0xf6   :  { %v880_v24 = vrot.slane %v860_v56, 4  ;;  %v940_v56 = vld [vmem:[#allocation2 + $0x28] sm:$0xf] }
  0xf7   :  { %663 = vrot.lane.b32.xlu1 %v644_v28, %s3674_s28  ;;  %768 = vrot.lane.b32.xlu0 %v746_v27, %s3675_s30  ;;  %v879_v27 = vrot.slane %v859_v3, 4 }
  0xf9   :  { %v889_v53 = vsel %vm209_vm9, %v879_v27, %v888_v38 }
  0xfb   :  { %776 = vrot.lane.b32.xlu1 %v750_v32, %s3675_s30  ;;  %772 = vrot.lane.b32.xlu0 %v748_v15, %s3675_s30  ;;  %v884_v32 = vrot.slane %v862_v49, 4 }
  0xfd   :  { %v885_v43 = vsel %vm209_vm9, %v877_v21, %v884_v32 }
  0xff   :  { %780 = vrot.lane.b32.xlu1 %v752_v36, %s3675_s30  ;;  %764 = vrot.lane.b32.xlu0 %v744_v37, %s3675_s30  ;;  %v749_v36 = vmul.f32 %v4040_v47, %v703_v34  ;;  %v875_v37 = vrot.slane %v855_v26, 4 }
 0x101   :  { %v347_v41 = vpop.permute.xlu1 %346  ;;  %v881_v19 = vsel %vm209_vm9, %v875_v37, %v880_v24 }
 0x103   :  { %778 = vrot.lane.b32.xlu0 %v751_v42, %s3675_s30  ;;  %892 = vrot.lane.b32.xlu1 %v876_v44, %s3676_s10 }
 0x105   :  { %v339_v45 = vpop.permute.xlu1 %338  ;;  %v345_v55 = vpop.permute.xlu0 %344 }
 0x107   :  { %782 = vrot.lane.b32.xlu0 %v753_v57, %s3675_s30  ;;  %896 = vrot.lane.b32.xlu1 %v878_v61, %s3676_s10  ;;  %v973_v61 = vsel %vm972_vm14, %v4083_v33, %v4075_v29  ;;  %v942_v29 = vld [vmem:[#allocation2 + $0x38] sm:$0xf] }
 0x108   :  { %v982_v5 = vmul.f32 %v973_v61, %v3877_v59  ;;  %v988_v49 = vmul.f32 %v974_v46, %v942_v29 }
 0x109   :  { %v343_v54 = vpop.permute.xlu1 %342  ;;  %v337_v11 = vpop.permute.xlu0 %336 }
 0x10a   :  { %v4109_v51 = vsel %vm5198_vm13, %v343_v54, %v345_v55  ;;  %v4112_v50 = vsel %vm5198_vm13, %v337_v11, %v339_v45 }
 0x10b   :  { %902 = vrot.lane.b32.xlu1 %v883_v22, %s3676_s10  ;;  %894 = vrot.lane.b32.xlu0 %v877_v21, %s3676_s10  ;;  %v987_v21 = vmul.f32 %v973_v61, %v941_v30 }
 0x10d   :  { %v349_v28 = vpop.permute.xlu1 %348  ;;  %v355_v31 = vpop.permute.xlu0 %354 }
 0x10e   :  { %v361_v15 = vsel %vm5198_vm13, %v347_v41, %v349_v28 }
 0x10f   :  { %377 = vst [vmem:[#allocation5 + $0x80] sm:$0xf] %v361_v15  ;;  %906 = vrot.lane.b32.xlu1 %v887_v16, %s3676_s10  ;;  %898 = vrot.lane.b32.xlu0 %v879_v27, %s3676_s10  ;;  %v986_v27 = vmul.f32 %v4083_v33, %v940_v56  ;;  %v981_v16 = vmul.f32 %v4083_v33, %v3892_v1  ;;  %v3380_v33 = vld [vmem:[%s5185_s3 + $0x8] sm:$0xff] }
 0x111   :  { %v353_v25 = vpop.permute.xlu1 %352  ;;  %v341_v39 = vpop.permute.xlu0 %340 }
 0x112   :  { %v364_v20 = vsel %vm5198_vm13, %v353_v25, %v355_v31  ;;  %v4128_v42 = vsel %vm5198_vm13, %v339_v45, %v341_v39  ;;  %v4131_v41 = vsel %vm5198_vm13, %v341_v39, %v343_v54  ;;  %v983_v45 = vmul.f32 %v974_v46, %v3880_v60 }
 0x113   :  { %380 = vst [vmem:[#allocation5 + $0x98] sm:$0xf] %v364_v20  ;;  %774 = vrot.lane.b32.xlu1 %v749_v36, %s3675_s30  ;;  %904 = vrot.lane.b32.xlu0 %v885_v43, %s3676_s10  ;;  %v975_v60 = vsel %vm972_vm14, %v4096_v40, %v4087_v35  ;;  %v944_v40 = vld [vmem:[#allocation2 + $0x48] sm:$0xf]  ;;  %v3678_v39 = vmov 0   ;;  %v1261_v43 = vld [vmem:[%s5185_s3] sm:$0xff] }
 0x114   :  { %v984_v3 = vmul.f32 %v975_v60, %v3873_v58  ;;  %v990_v23 = vmul.f32 %v4087_v35, %v944_v40  ;;  %v989_v35 = vmul.f32 %v975_v60, %v943_v4  ;;  %3552 = vset.pattern.permute.xlu0 %v3678_v39  ;;  %3553 = vset.pattern.permute.xlu1 %v3678_v39 }
 0x115   :  { %v234_v47 = vpop.permute.xlu1 %233  ;;  %v351_v44 = vpop.permute.xlu0 %350 }
 0x116   :  { %v362_v48 = vsel %vm5198_vm13, %v349_v28, %v351_v44  ;;  %v363_v52 = vsel %vm5198_vm13, %v351_v44, %v353_v25  ;;  %vm1103_vm13 = vcmask 883712  }
 0x117   :  { %378 = vst [vmem:[#allocation5 + $0x88] sm:$0xf] %v362_v48  ;;  %379 = vst [vmem:[#allocation5 + $0x90] sm:$0xf] %v363_v52  ;;  %900 = vrot.lane.b32.xlu1 %v881_v19, %s3676_s10  ;;  %908 = vrot.lane.b32.xlu0 %v889_v53, %s3676_s10 }
 0x119   :  { %v230_v55 = vpop.permute.xlu1 %229  ;;  %v226_v57 = vpop.permute.xlu0 %225 }
 0x11b   :  { %890 = vrot.lane.b32.xlu0 %v875_v37, %s3676_s10  ;;  %1005 = vrot.lane.b32.xlu1 %v983_v45, %s3677_s12  ;;  %v3381_v37 = vld [vmem:[%s5184_s1 + $0x4] sm:$0xf] }
 0x11d   :  { %v236_v12 = vpop.permute.xlu1 %235  ;;  %v471_v18 = vpop.permute.xlu0 %470 }
 0x11f   :  { %1003 = vrot.lane.b32.xlu0 %v982_v5, %s3677_s12  ;;  %1009 = vrot.lane.b32.xlu1 %v985_v8, %s3677_s12 }
 0x121   :  { %v465_v54 = vpop.permute.xlu1 %464  ;;  %v463_v59 = vpop.permute.xlu0 %462 }
 0x122   :  { %v483_v11 = vsel %vm482_vm15, %v463_v59, %v465_v54 }
 0x123   :  { %499 = vst [vmem:[#allocation5 + $0x80] sm:$0xf0] %v483_v11  ;;  %1007 = vrot.lane.b32.xlu0 %v984_v3, %s3677_s12  ;;  %1015 = vrot.lane.b32.xlu1 %v988_v49, %s3677_s12 }
 0x125   :  { %v469_v22 = vpop.permute.xlu1 %468  ;;  %v228_v7 = vpop.permute.xlu0 %227 }
 0x126   :  { %v486_v58 = vsel %vm482_vm15, %v469_v22, %v471_v18  ;;  %v246_v13 = vsel %vm5201_vm1, %v226_v57, %v228_v7  ;;  %v247_v26 = vsel %vm5201_vm1, %v228_v7, %v230_v55  ;;  %v1365_v57 = vrot.slane %v3381_v37, %v3786_v17 }
 0x127   :  { %502 = vst [vmem:[#allocation5 + $0x98] sm:$0xf0] %v486_v58  ;;  %262 = vst [vmem:[#allocation5 + $0x20] sm:$0xf0] %v246_v13  ;;  %1013 = vrot.lane.b32.xlu0 %v987_v21, %s3677_s12  ;;  %1019 = vrot.lane.b32.xlu1 %v990_v23, %s3677_s12 }
 0x128   :  { %263 = vst [vmem:[#allocation5 + $0x28] sm:$0xf0] %v247_v26 }
 0x129   :  { %v473_v28 = vpop.permute.xlu1 %472  ;;  %v232_v31 = vpop.permute.xlu0 %231 }
 0x12a   :  { %v248_v32 = vsel %vm5201_vm1, %v230_v55, %v232_v31  ;;  %v249_v15 = vsel %vm5201_vm1, %v232_v31, %v234_v47  ;;  %v1357_v47 = vrot.slane %v3381_v37, %v3759_v10  ;;  %v1361_v55 = vrot.slane %v3381_v37, %v3757_v9  ;;  %v1063_v4 = vld [vmem:[#allocation5 + $0x80] sm:$0xff] }
 0x12b   :  { %264 = vst [vmem:[#allocation5 + $0x30] sm:$0xf0] %v248_v32  ;;  %265 = vst [vmem:[#allocation5 + $0x38] sm:$0xf0] %v249_v15  ;;  %1017 = vrot.lane.b32.xlu0 %v989_v35, %s3677_s12  ;;  %1011 = vrot.lane.b32.xlu1 %v986_v27, %s3677_s12 }
 0x12d   :  { %v238_v34 = vpop.permute.xlu1 %237  ;;  %v244_v36 = vpop.permute.xlu0 %243 }
 0x12e   :  { %v4180_v24 = vsel %vm5201_vm1, %v236_v12, %v238_v34  ;;  %v1051_v25 = vld [vmem:[#allocation5 + $0x20] sm:$0xff] }
 0x12f   :  { %v1052_v38 = vld [vmem:[#allocation5 + $0x28] sm:$0xff]  ;;  %1001 = vrot.lane.b32.xlu0 %v981_v16, %s3677_s12  ;;  %v3411_v1 = vpack.c.bf16 %v1051_v25, %v3897_v6  ;;  %1275 = vperm.xlu1 %3553, %v3380_v33   ;;  %v3382_v12 = vld [vmem:[%s5184_s1 + $0x8] sm:$0xf]  ;;  %v3415_v21 = vpack.c.bf16 %v4112_v50, %v4180_v24 }
 0x130   :  { %v3409_v20 = vpack.c.bf16 %v1052_v38, %v3884_v62  ;;  %v1428_v18 = vrot.slane %v3382_v12, %v3759_v10  ;;  %v1432_v40 = vrot.slane %v3382_v12, %v3757_v9  ;;  %v1436_v23 = vrot.slane %v3382_v12, %v3786_v17 }
 0x131   :  { %v242_v44 = vpop.permute.xlu1 %241  ;;  %v467_v19 = vpop.permute.xlu0 %466  ;;  %v1440_v27 = vrot.slane %v3382_v12, %v3780_v14 }
 0x132   :  { %3410 = vmatprep.subr.bf16.mxu0 %v3409_v20  ;;  %v253_v46 = vsel %vm5201_vm1, %v242_v44, %v244_v36  ;;  %v484_v62 = vsel %vm482_vm15, %v465_v54, %v467_v19  ;;  %v485_v6 = vsel %vm482_vm15, %v467_v19, %v469_v22  ;;  %v1054_v48 = vld [vmem:[#allocation5 + $0x38] sm:$0xff]  ;;  %v1053_v52 = vld [vmem:[#allocation5 + $0x30] sm:$0xff] }
 0x133   :  { %3412 = vmatpush1.bf16.msra.mxu0 %v3411_v1  ;;  %500 = vst [vmem:[#allocation5 + $0x88] sm:$0xf0] %v484_v62  ;;  %501 = vst [vmem:[#allocation5 + $0x90] sm:$0xf0] %v485_v6  ;;  %v3439_v53 = vpack.c.bf16 %v1054_v48, %v3887_v63  ;;  %v3441_v45 = vpack.c.bf16 %v1053_v52, %v3890_v0  ;;  %1264 = vperm.xlu0 %3552, %v1261_v43   ;;  %v1066_v54 = vld [vmem:[#allocation5 + $0x98] sm:$0xff] }
 0x134   :  { %1370 = vrot.lane.b32.xlu1 %v1357_v47, %s3663_s0  ;;  %v3443_v8 = vpack.c.bf16 %v4109_v51, %v253_v46  ;;  %v1369_v0 = vrot.slane %v3381_v37, %v3780_v14 }
 0x135   :  { %v475_v61 = vpop.permute.xlu1 %474  ;;  %3440 = vmatprep.subr.bf16.mxu1 %v3439_v53  ;;  %v481_v5 = vpop.permute.xlu0 %480 }
 0x136   :  { %v487_v63 = vsel %vm482_vm15, %v473_v28, %v475_v61  ;;  %3442 = vmatpush1.bf16.msra.mxu1 %v3441_v45 }
 0x137   :  { %3444 = vmatprep.subr.bf16.mxu1 %v3443_v8  ;;  %1372 = vrot.lane.b32.xlu0 %v1361_v55, %s3663_s0  ;;  %v3419_v35 = vpack.c.bf16 %v487_v63, %v1063_v4 }
 0x138   :  { %1374 = vrot.lane.b32.xlu1 %v1365_v57, %s3663_s0 }
 0x139   :  { %v479_v60 = vpop.permute.xlu1 %478  ;;  %v240_v29 = vpop.permute.xlu0 %239 }
 0x13a   :  { %v490_v51 = vsel %vm482_vm15, %v479_v60, %v481_v5  ;;  %v251_v3 = vsel %vm5201_vm1, %v238_v34, %v240_v29  ;;  %v252_v49 = vsel %vm5201_vm1, %v240_v29, %v242_v44  ;;  %v1064_v13 = vld [vmem:[#allocation5 + $0x88] sm:$0xff]  ;;  %v1065_v50 = vld [vmem:[#allocation5 + $0x90] sm:$0xff] }
 0x13b   :  { %v3413_v59 = vpack.c.bf16 %v4128_v42, %v251_v3  ;;  %v3445_v11 = vpack.c.bf16 %v4131_v41, %v252_v49  ;;  %v3447_v30 = vpack.c.bf16 %v490_v51, %v1066_v54  ;;  %1376 = vrot.lane.b32.xlu0 %v1369_v0, %s3663_s0  ;;  %v3383_v42 = vld [vmem:[%s5184_s1 + $0xc] sm:$0xf] }
 0x13c   :  { %1441 = vrot.lane.b32.xlu1 %v1428_v18, %s3664_s26  ;;  %v1499_v28 = vrot.slane %v3383_v42, %v3759_v10  ;;  %v1503_v16 = vrot.slane %v3383_v42, %v3757_v9  ;;  %v1507_v34 = vrot.slane %v3383_v42, %v3786_v17  ;;  %v1511_v25 = vrot.slane %v3383_v42, %v3780_v14 }
 0x13d   :  { %v532_v22 = vpop.permute.xlu1 %531  ;;  %v477_v7 = vpop.permute.xlu0 %476  ;;  %3414 = vmatprep.subr.bf16.mxu0 %v3413_v59  ;;  %3446 = vmatpush1.bf16.msra.mxu1 %v3445_v11 }
 0x13e   :  { %v488_v41 = vsel %vm482_vm15, %v475_v61, %v477_v7  ;;  %v489_v58 = vsel %vm482_vm15, %v477_v7, %v479_v60  ;;  %3416 = vmatpush1.bf16.msra.mxu0 %v3415_v21  ;;  %3448 = vmatprep.subr.bf16.mxu1 %v3447_v30 }
 0x13f   :  { %v3417_v26 = vpack.c.bf16 %v488_v41, %v1064_v13  ;;  %v3449_v56 = vpack.c.bf16 %v489_v58, %v1065_v50  ;;  %1443 = vrot.lane.b32.xlu0 %v1432_v40, %s3664_s26 }
 0x140   :  { %1445 = vrot.lane.b32.xlu1 %v1436_v23, %s3664_s26 }
 0x141   :  { %v536_v31 = vpop.permute.xlu1 %535  ;;  %v530_v32 = vpop.permute.xlu0 %529  ;;  %3418 = vmatprep.subr.bf16.mxu0 %v3417_v26  ;;  %3450 = vmatpush1.bf16.msra.mxu1 %v3449_v56 }
 0x142   :  { %v549_v15 = vsel %vm5197_vm3, %v530_v32, %v532_v22  ;;  %3420 = vmatpush1.bf16.msra.mxu0 %v3419_v35 }
 0x143   :  { %1447 = vrot.lane.b32.xlu0 %v1440_v27, %s3664_s26 }
 0x144   :  { %1512 = vrot.lane.b32.xlu1 %v1499_v28, %s3665_s29 }
 0x145   :  { %v542_v36 = vpop.permute.xlu1 %541  ;;  %v534_v37 = vpop.permute.xlu0 %533 }
 0x146   :  { %v550_v24 = vsel %vm5197_vm3, %v532_v22, %v534_v37  ;;  %v551_v38 = vsel %vm5197_vm3, %v534_v37, %v536_v31 }
 0x147   :  { %1514 = vrot.lane.b32.xlu0 %v1503_v16, %s3665_s29 }
 0x148   :  { %1516 = vrot.lane.b32.xlu1 %v1507_v34, %s3665_s29 }
 0x149   :  { %v546_v39 = vpop.permute.xlu1 %545  ;;  %v540_v20 = vpop.permute.xlu0 %539 }
 0x14a   :  { %v553_v1 = vsel %vm5197_vm3, %v540_v20, %v542_v36 }
 0x14b   :  { %569 = vst [vmem:[#allocation5 + $0xe8] sm:$0xf] %v553_v1  ;;  %1518 = vrot.lane.b32.xlu0 %v1511_v25, %s3665_s29 }
 0x14d   :  { %v658_v33 = vpop.permute.xlu1 %657  ;;  %v544_v43 = vpop.permute.xlu0 %543 }
 0x14e   :  { %v554_v47 = vsel %vm5197_vm3, %v542_v36, %v544_v43  ;;  %v555_v44 = vsel %vm5197_vm3, %v544_v43, %v546_v39 }
 0x14f   :  { %570 = vst [vmem:[#allocation5 + $0xf0] sm:$0xf] %v554_v47  ;;  %571 = vst [vmem:[#allocation5 + $0xf8] sm:$0xf] %v555_v44 }
 0x151   :  { %v662_v19 = vpop.permute.xlu1 %661  ;;  %v656_v46 = vpop.permute.xlu0 %655 }
 0x152   :  { %v675_v62 = vsel %vm5194_vm2, %v656_v46, %v658_v33 }
 0x153   :  { %691 = vst [vmem:[#allocation5 + $0xe8] sm:$0xf0] %v675_v62 }
 0x155   :  { %v538_v6 = vpop.permute.xlu1 %537  ;;  %v660_v48 = vpop.permute.xlu0 %659 }
 0x156   :  { %v552_v52 = vsel %vm5197_vm3, %v538_v6, %v540_v20  ;;  %v676_v53 = vsel %vm5194_vm2, %v658_v33, %v660_v48  ;;  %v677_v45 = vsel %vm5194_vm2, %v660_v48, %v662_v19 }
 0x157   :  { %568 = vst [vmem:[#allocation5 + $0xe0] sm:$0xf] %v552_v52  ;;  %692 = vst [vmem:[#allocation5 + $0xf0] sm:$0xf0] %v676_v53 }
 0x158   :  { %693 = vst [vmem:[#allocation5 + $0xf8] sm:$0xf0] %v677_v45 }
 0x159   :  { %v666_v55 = vpop.permute.xlu1 %665  ;;  %v528_v57 = vpop.permute.xlu0 %527 }
 0x15a   :  { %v548_v61 = vsel %vm5197_vm3, %v528_v57, %v530_v32  ;;  %v1076_v5 = vld [vmem:[#allocation5 + $0xe8] sm:$0xff] }
 0x15b   :  { %v3421_v8 = vpack.c.bf16 %v1076_v5, %v549_v15 }
 0x15d   :  { %v670_v12 = vpop.permute.xlu1 %669  ;;  %3422 = vmatprep.subr.bf16.mxu0 %v3421_v8  ;;  %v654_v63 = vpop.permute.xlu0 %653 }
 0x15e   :  { %v674_v0 = vsel %vm5194_vm2, %v654_v63, %v656_v46  ;;  %v1077_v60 = vld [vmem:[#allocation5 + $0xf0] sm:$0xff] }
 0x15f   :  { %v1078_v18 = vld [vmem:[#allocation5 + $0xf8] sm:$0xff]  ;;  %690 = vst [vmem:[#allocation5 + $0xe0] sm:$0xf0] %v674_v0  ;;  %v3453_v51 = vpack.c.bf16 %v1077_v60, %v550_v24 }
 0x160   :  { %v3451_v29 = vpack.c.bf16 %v1078_v18, %v551_v38 }
 0x161   :  { %v767_v3 = vpop.permute.xlu1 %766  ;;  %v668_v49 = vpop.permute.xlu0 %667 }
 0x162   :  { %3452 = vmatprep.subr.bf16.mxu1 %v3451_v29  ;;  %v679_v54 = vsel %vm5194_vm2, %v666_v55, %v668_v49  ;;  %v680_v59 = vsel %vm5194_vm2, %v668_v49, %v670_v12 }
 0x163   :  { %3454 = vmatpush1.bf16.msra.mxu1 %v3453_v51 }
 0x165   :  { %v771_v11 = vpop.permute.xlu1 %770  ;;  %v672_v30 = vpop.permute.xlu0 %671 }
 0x166   :  { %v681_v40 = vsel %vm5194_vm2, %v670_v12, %v672_v30  ;;  %v1075_v21 = vld [vmem:[#allocation5 + $0xe0] sm:$0xff] }
 0x167   :  { %v3423_v23 = vpack.c.bf16 %v1075_v21, %v548_v61 }
 0x169   :  { %v664_v22 = vpop.permute.xlu1 %663  ;;  %3424 = vmatpush1.bf16.msra.mxu0 %v3423_v23  ;;  %v769_v7 = vpop.permute.xlu0 %768 }
 0x16a   :  { %v678_v42 = vsel %vm5194_vm2, %v664_v22, %v666_v55  ;;  %v786_v41 = vsel %vm5195_vm5, %v767_v3, %v769_v7  ;;  %v787_v58 = vsel %vm5195_vm5, %v769_v7, %v771_v11  ;;  %vm5196_vm2 = vcmask 777216  }
 0x16b   :  { %v3425_v13 = vpack.c.bf16 %v786_v41, %v679_v54  ;;  %v3457_v27 = vpack.c.bf16 %v787_v58, %v680_v59 }
 0x16d   :  { %v777_v50 = vpop.permute.xlu1 %776  ;;  %v773_v26 = vpop.permute.xlu0 %772  ;;  %3426 = vmatprep.subr.bf16.mxu0 %v3425_v13 }
 0x16e   :  { %v788_v56 = vsel %vm5195_vm5, %v771_v11, %v773_v26 }
 0x16f   :  { %v3455_v4 = vpack.c.bf16 %v788_v56, %v681_v40 }
 0x171   :  { %v781_v35 = vpop.permute.xlu1 %780  ;;  %v765_v28 = vpop.permute.xlu0 %764  ;;  %3456 = vmatprep.subr.bf16.mxu1 %v3455_v4 }
 0x172   :  { %v785_v31 = vsel %vm5195_vm5, %v765_v28, %v767_v3  ;;  %3458 = vmatpush1.bf16.msra.mxu1 %v3457_v27 }
 0x173   :  { %v3427_v32 = vpack.c.bf16 %v785_v31, %v678_v42 }
 0x175   :  { %v893_v15 = vpop.permute.xlu1 %892  ;;  %v779_v16 = vpop.permute.xlu0 %778  ;;  %3428 = vmatpush1.bf16.msra.mxu0 %v3427_v32 }
 0x176   :  { %v790_v34 = vsel %vm5195_vm5, %v777_v50, %v779_v16  ;;  %v791_v36 = vsel %vm5195_vm5, %v779_v16, %v781_v35  ;;  %v3384_v16 = vld [vmem:[%s5184_s1 + $0x14] sm:$0xf] }
 0x177   :  { %806 = vst [vmem:[#allocation5 + $0x148] sm:$0xf] %v790_v34  ;;  %807 = vst [vmem:[#allocation5 + $0x150] sm:$0xf] %v791_v36  ;;  %v1606_v34 = vrot.slane %v3384_v16, %v3757_v9  ;;  %v1602_v36 = vrot.slane %v3384_v16, %v3759_v10 }
 0x179   :  { %v897_v37 = vpop.permute.xlu1 %896  ;;  %v783_v24 = vpop.permute.xlu0 %782  ;;  %1617 = vrot.lane.b32.xlu0 %v1606_v34, %s3666_s11  ;;  %1615 = vrot.lane.b32.xlu1 %v1602_v36, %s3666_s11 }
 0x17a   :  { %v792_v38 = vsel %vm5195_vm5, %v781_v35, %v783_v24 }
 0x17b   :  { %808 = vst [vmem:[#allocation5 + $0x158] sm:$0xf] %v792_v38 }
 0x17d   :  { %v903_v25 = vpop.permute.xlu1 %902  ;;  %v895_v39 = vpop.permute.xlu0 %894 }
 0x17e   :  { %v912_v20 = vsel %vm5196_vm2, %v893_v15, %v895_v39  ;;  %v913_v1 = vsel %vm5196_vm2, %v895_v39, %v897_v37 }
 0x17f   :  { %928 = vst [vmem:[#allocation5 + $0x148] sm:$0xf0] %v912_v20  ;;  %929 = vst [vmem:[#allocation5 + $0x150] sm:$0xf0] %v913_v1 }
 0x181   :  { %v907_v33 = vpop.permute.xlu1 %906  ;;  %v899_v43 = vpop.permute.xlu0 %898 }
 0x182   :  { %v914_v47 = vsel %vm5196_vm2, %v897_v37, %v899_v43 }
 0x183   :  { %930 = vst [vmem:[#allocation5 + $0x158] sm:$0xf0] %v914_v47 }
 0x185   :  { %v775_v44 = vpop.permute.xlu1 %774  ;;  %v905_v19 = vpop.permute.xlu0 %904 }
 0x186   :  { %v789_v46 = vsel %vm5195_vm5, %v775_v44, %v777_v50  ;;  %v916_v62 = vsel %vm5196_vm2, %v903_v25, %v905_v19  ;;  %v917_v6 = vsel %vm5196_vm2, %v905_v19, %v907_v33  ;;  %v1088_v48 = vld [vmem:[#allocation5 + $0x148] sm:$0xff]  ;;  %v1089_v55 = vld [vmem:[#allocation5 + $0x150] sm:$0xff]  ;;  %vm1021_vm5 = vcmask 769024  }
 0x187   :  { %805 = vst [vmem:[#allocation5 + $0x140] sm:$0xf] %v789_v46  ;;  %v3429_v52 = vpack.c.bf16 %v916_v62, %v1088_v48  ;;  %v3461_v12 = vpack.c.bf16 %v917_v6, %v1089_v55  ;;  %v1614_v55 = vrot.slane %v3384_v16, %v3780_v14 }
 0x189   :  { %v901_v53 = vpop.permute.xlu1 %900  ;;  %v909_v45 = vpop.permute.xlu0 %908  ;;  %3430 = vmatprep.subr.bf16.mxu0 %v3429_v52 }
 0x18a   :  { %v915_v57 = vsel %vm5196_vm2, %v901_v53, %v903_v25  ;;  %v918_v61 = vsel %vm5196_vm2, %v907_v33, %v909_v45  ;;  %v1090_v5 = vld [vmem:[#allocation5 + $0x158] sm:$0xff]  ;;  %v1610_v45 = vrot.slane %v3384_v16, %v3786_v17 }
 0x18b   :  { %v3459_v8 = vpack.c.bf16 %v918_v61, %v1090_v5 }
 0x18d   :  { %v1006_v63 = vpop.permute.xlu1 %1005  ;;  %v891_v0 = vpop.permute.xlu0 %890  ;;  %3460 = vmatprep.subr.bf16.mxu1 %v3459_v8 }
 0x18e   :  { %v911_v18 = vsel %vm5196_vm2, %v891_v0, %v893_v15  ;;  %3462 = vmatpush1.bf16.msra.mxu1 %v3461_v12  ;;  %vm3679_vm2 = vmmov 1   ;;  %v1046_v15 = vld [vmem:[%s5186_s2] sm:$0xff] }
 0x18f   :  { %927 = vst [vmem:[#allocation5 + $0x140] sm:$0xf0] %v911_v18  ;;  %vm3434_vm3 = vmpackc.low %vm209_vm9, %vm3679_vm2  ;;  %vm5203_vm2 = vcmask 1031168  }
 0x191   :  { %v1010_v60 = vpop.permute.xlu1 %1009  ;;  %v1004_v29 = vpop.permute.xlu0 %1003 }
 0x192   :  { %v1023_v51 = vsel %vm1021_vm5, %v1004_v29, %v1006_v63 }
 0x195   :  { %v1016_v3 = vpop.permute.xlu1 %1015  ;;  %v1008_v49 = vpop.permute.xlu0 %1007 }
 0x196   :  { %v1024_v54 = vsel %vm1021_vm5, %v1006_v63, %v1008_v49  ;;  %v1025_v59 = vsel %vm1021_vm5, %v1008_v49, %v1010_v60  ;;  %v1087_v11 = vld [vmem:[#allocation5 + $0x140] sm:$0xff]  ;;  %v3386_v63 = vld [vmem:[%s5184_s1 + $0x1c] sm:$0xf] }
 0x197   :  { %v3431_v30 = vpack.c.bf16 %v915_v57, %v1087_v11  ;;  %v3385_v57 = vld [vmem:[%s5184_s1 + $0x18] sm:$0xf]  ;;  %v1744_v0 = vrot.slane %v3386_v63, %v3759_v10  ;;  %v1748_v18 = vrot.slane %v3386_v63, %v3757_v9  ;;  %v1752_v60 = vrot.slane %v3386_v63, %v3786_v17 }
 0x198   :  { %v1673_v61 = vrot.slane %v3385_v57, %v3759_v10  ;;  %v1677_v5 = vrot.slane %v3385_v57, %v3757_v9  ;;  %v1681_v8 = vrot.slane %v3385_v57, %v3786_v17  ;;  %v1685_v12 = vrot.slane %v3385_v57, %v3780_v14 }
 0x199   :  { %v1020_v40 = vpop.permute.xlu1 %1019  ;;  %3432 = vmatpush1.bf16.msra.mxu0 %v3431_v30  ;;  %v1014_v21 = vpop.permute.xlu0 %1013 }
 0x19a   :  { %v1027_v23 = vsel %vm1021_vm5, %v1014_v21, %v1016_v3 }
 0x19b   :  { %1043 = vst [vmem:[#allocation5 + $0x1a8] sm:$0xf] %v1027_v23 }
 0x19d   :  { %v1012_v22 = vpop.permute.xlu1 %1011  ;;  %v1018_v7 = vpop.permute.xlu0 %1017 }
 0x19e   :  { %v1026_v42 = vsel %vm1021_vm5, %v1012_v22, %v1014_v21  ;;  %v1028_v41 = vsel %vm1021_vm5, %v1016_v3, %v1018_v7  ;;  %v1029_v58 = vsel %vm1021_vm5, %v1018_v7, %v1020_v40 }
 0x19f   :  { %1042 = vst [vmem:[#allocation5 + $0x1a0] sm:$0xf] %v1026_v42  ;;  %1044 = vst [vmem:[#allocation5 + $0x1b0] sm:$0xf] %v1028_v41 }
 0x1a0   :  { %1045 = vst [vmem:[#allocation5 + $0x1b8] sm:$0xf] %v1029_v58 }
 0x1a1   :  { %v1002_v13 = vpop.permute.xlu0 %1001 }
 0x1a2   :  { %v1022_v50 = vsel %vm1021_vm5, %v1002_v13, %v1004_v29  ;;  %v1100_v26 = vld [vmem:[#allocation5 + $0x1a8] sm:$0xf]  ;;  %v1756_v29 = vrot.slane %v3386_v63, %v3780_v14 }
 0x1a3   :  { %v3433_v56 = vpack.c.bf16 %v1100_v26, %v1023_v51  ;;  %v3387_v51 = vld [vmem:[%s5184_s1 + $0x20] sm:$0xf] }
 0x1a4   :  { %v1815_v3 = vrot.slane %v3387_v51, %v3759_v10  ;;  %v1819_v49 = vrot.slane %v3387_v51, %v3757_v9 }
 0x1a5   :  { %3435 = vmatprep.subr.msk.bf16.mxu0 %vm3434_vm3, %v3433_v56 }
 0x1a6   :  { %v1101_v27 = vld [vmem:[#allocation5 + $0x1b0] sm:$0xf]  ;;  %v1099_v35 = vld [vmem:[#allocation5 + $0x1a0] sm:$0xf] }
 0x1a7   :  { %v1102_v4 = vld [vmem:[#allocation5 + $0x1b8] sm:$0xf]  ;;  %v3466_v31 = vpack.c.bf16 %v1101_v27, %v1024_v54  ;;  %v3436_v32 = vpack.c.bf16 %v1099_v35, %v1022_v50  ;;  %v1823_v54 = vrot.slane %v3387_v51, %v3786_v17 }
 0x1a8   :  { %v3463_v28 = vpack.c.bf16 %v1102_v4, %v1025_v59  ;;  %v1827_v59 = vrot.slane %v3387_v51, %v3780_v14 }
 0x1a9   :  { %3438 = vmatpush1.bf16.msk.msra.mxu0 %vm3434_vm3, %v3436_v32 }
 0x1aa   :  { %3465 = vmatprep.subr.msk.bf16.mxu1 %vm3434_vm3, %v3463_v28 }
 0x1ab   :  { %3468 = vmatpush1.bf16.msk.msra.mxu1 %vm3434_vm3, %v3466_v31  ;;  %vm5206_vm3 = vcmask 900096  }
 0x1ac   :  { %3376 = vmatmul.mubr.msk.f32.vlgmr.msra.gmra.mrb[0].mxu0 %vm1103_vm13, %v1046_v15 }
 0x1ad   :  { %1985 = vmatprep.mubr.f32.mxu0 %v3661_v2 }
 0x1ae   :  { %3379 = vmatmul.mubr.msk.f32.vlgmr.msra.gmra.mrb[0].mxu1 %vm1103_vm13, %v1046_v15  ;;  %v1276_v38 = vpop.permute.xlu1 %1275  ;;  %vm5205_vm13 = vmmov %vm5203_vm2 }
 0x1af   :  { %2062 = vmatprep.mubr.f32.mxu1 %v3661_v2 }
 0x1b2   :  { %v1265_v37 = vpop.permute.xlu0 %1264  ;;  %v1371_v11 = vpop.permute.xlu1 %1370 }
 0x1b6   :  { %v1373_v30 = vpop.permute.xlu0 %1372  ;;  %v1375_v40 = vpop.permute.xlu1 %1374 }
 0x1ba   :  { %v1377_v21 = vpop.permute.xlu0 %1376  ;;  %v1442_v23 = vpop.permute.xlu1 %1441 }
 0x1be   :  { %v1444_v22 = vpop.permute.xlu0 %1443  ;;  %v4331_v7 = vpop.permute.xlu1 %1445 }
 0x1bf   :  { %v1449_v57 = vsel %vm307_vm6, %v1442_v23, %v1444_v22 }
 0x1c2   :  { %v4333_v42 = vpop.permute.xlu0 %1447  ;;  %v1513_v41 = vpop.permute.xlu1 %1512 }
 0x1c6   :  { %v1515_v58 = vpop.permute.xlu0 %1514  ;;  %v4335_v13 = vpop.permute.xlu1 %1516 }
 0x1c7   :  { %v1521_v63 = vsel %vm418_vm8, %v1515_v58, %v4335_v13  ;;  %v1520_v51 = vsel %vm418_vm8, %v1513_v41, %v1515_v58 }
 0x1ca   :  { %v4337_v50 = vpop.permute.xlu0 %1518 }
 0x1eb   :  { %v4339_v26 = vpop.permute.xlu1 %1615  ;;  %v4341_v56 = vpop.permute.xlu0 %1617 }
 0x27f   :  { %v1185_v24 = vpop.f32.mrb[0].mxu0 }
 0x280   :  { %v1267_v39 = vmul.f32 %v1265_v37, %v1185_v24  ;;  %v1187_v20 = vpop.f32.mrb[1].mxu0 }
 0x281   :  { %v1256_v25 = vpop.f32.mrb[0].mxu1  ;;  %v1268_v43 = vmul.f32 %v1265_v37, %v1187_v20 }
 0x282   :  { %v1258_v1 = vpop.f32.mrb[1].mxu1  ;;  %v1269_v33 = vmul.f32 %v1265_v37, %v1256_v25  ;;  %v1278_v44 = vadd.f32 %v1276_v38, %v1267_v39 }
 0x283   :  { %v1270_v47 = vmul.f32 %v1265_v37, %v1258_v1  ;;  %v1279_v19 = vadd.f32 %v1276_v38, %v1268_v43 }
 0x284   :  { %v1282_v46 = vmax.f32 %v1278_v44, 0.0  ;;  %v1280_v62 = vadd.f32 %v1276_v38, %v1269_v33 }
 0x285   :  { %v1283_v6 = vmax.f32 %v1279_v19, 0.0  ;;  %v1281_v48 = vadd.f32 %v1276_v38, %v1270_v47  ;;  %v1380_v19 = vsel %vm180_vm7, %v1375_v40, %v1377_v21 }
 0x286   :  { %1292 = vrot.lane.b32.xlu1 %v1282_v46, %s3662_s9  ;;  %v1284_v52 = vmax.f32 %v1280_v62, 0.0 }
 0x287   :  { %1294 = vrot.lane.b32.xlu0 %v1283_v6, %s3662_s9  ;;  %v1285_v53 = vmax.f32 %v1281_v48, 0.0  ;;  %v1450_v48 = vsel %vm307_vm6, %v1444_v22, %v4331_v7 }
 0x28a   :  { %1296 = vrot.lane.b32.xlu1 %v1284_v52, %s3662_s9 }
 0x28b   :  { %1298 = vrot.lane.b32.xlu0 %v1285_v53, %s3662_s9 }
 0x28e   :  { %1619 = vrot.lane.b32.xlu1 %v1610_v45, %s3666_s11 }
 0x28f   :  { %1621 = vrot.lane.b32.xlu0 %v1614_v55, %s3666_s11  ;;  %v1379_v55 = vsel %vm180_vm7, %v1373_v30, %v1375_v40 }
 0x292   :  { %1686 = vrot.lane.b32.xlu1 %v1673_v61, %s3667_s14 }
 0x293   :  { %1688 = vrot.lane.b32.xlu0 %v1677_v5, %s3667_s14 }
 0x296   :  { %1690 = vrot.lane.b32.xlu1 %v1681_v8, %s3667_s14 }
 0x297   :  { %1692 = vrot.lane.b32.xlu0 %v1685_v12, %s3667_s14  ;;  %v1378_v12 = vsel %vm180_vm7, %v1371_v11, %v1373_v30 }
 0x29a   :  { %1757 = vrot.lane.b32.xlu1 %v1744_v0, %s3668_s17 }
 0x29b   :  { %1759 = vrot.lane.b32.xlu0 %v1748_v18, %s3668_s17 }
 0x29e   :  { %1761 = vrot.lane.b32.xlu1 %v1752_v60, %s3668_s17 }
 0x29f   :  { %1763 = vrot.lane.b32.xlu0 %v1756_v29, %s3668_s17 }
 0x2a2   :  { %1828 = vrot.lane.b32.xlu1 %v1815_v3, %s3669_s20 }
 0x2a3   :  { %1830 = vrot.lane.b32.xlu0 %v1819_v49, %s3669_s20 }
 0x2a6   :  { %1832 = vrot.lane.b32.xlu1 %v1823_v54, %s3669_s20 }
 0x2a7   :  { %1834 = vrot.lane.b32.xlu0 %v1827_v59, %s3669_s20 }
 0x2f8   :  { %v1293_v4 = vpop.permute.xlu1 %1292 }
 0x2f9   :  { %1308 = vst.msk [vmem:[#allocation3] sm:$0xff] %vm85_vm4, %v1293_v4  ;;  %v1295_v27 = vpop.permute.xlu0 %1294  ;;  %vm5204_vm4 = vcmask 908288  }
 0x2fa   :  { %v4345_v35 = vsel %vm29_vm0, %v1293_v4, %v1295_v27 }
 0x2fb   :  { %v1458_v5 = vmul.f32 %v1449_v57, %v4345_v35  ;;  %v1387_v60 = vmul.f32 %v1378_v12, %v4345_v35  ;;  %v1529_v54 = vmul.f32 %v1520_v51, %v4345_v35  ;;  %v2075_v51 = vld [vmem:[%s5187_s5] sm:$0xff] }
 0x2fc   :  { %v1297_v28 = vpop.permute.xlu1 %1296 }
 0x2fd   :  { %v4348_v31 = vsel %vm29_vm0, %v1295_v27, %v1297_v28  ;;  %v1299_v32 = vpop.permute.xlu0 %1298  ;;  %v1522_v27 = vsel %vm418_vm8, %v4335_v13, %v4337_v50 }
 0x2fe   :  { %v4351_v15 = vsel %vm29_vm0, %v1297_v28, %v1299_v32  ;;  %1312 = vst.msk [vmem:[#allocation3 + $0x20] sm:$0xff] %vm29_vm0, %v1299_v32  ;;  %v3554_v1 = vpack.i.bf16 %v4348_v31, %v4345_v35  ;;  %v1459_v45 = vmul.f32 %v1450_v48, %v4348_v31  ;;  %v1388_v8 = vmul.f32 %v1379_v55, %v4348_v31 }
 0x2ff   :  { %v1389_v6 = vmul.f32 %v1380_v19, %v4351_v15  ;;  %v1530_v29 = vmul.f32 %v1521_v63, %v4348_v31 }
 0x300   :  { %v4354_v16 = vpop.permute.xlu1 %1619  ;;  %v4356_v34 = vld [vmem:[#allocation3] sm:$0xff]  ;;  %v3574_v18 = vpack.i.bf16 %v1459_v45, %v1458_v5  ;;  %v3564_v49 = vpack.i.bf16 %v1388_v8, %v1387_v60 }
 0x301   :  { %1570 = vrot.lane.b32.xlu0 %v4356_v34, %s3673_s27  ;;  %v4360_v36 = vpop.permute.xlu0 %1621  ;;  %v1386_v37 = vmul.f32 %v4356_v34, %v1371_v11  ;;  %v1457_v24 = vmul.f32 %v4356_v34, %v1442_v23  ;;  %v1528_v25 = vmul.f32 %v4356_v34, %v1513_v41  ;;  %v1631_v62 = vmul.f32 %v4339_v26, %v4356_v34 }
 0x302   :  { %v1624_v3 = vsel %vm609_vm10, %v4341_v56, %v4354_v16  ;;  %v1451_v11 = vsel %vm307_vm6, %v4331_v7, %v4333_v42  ;;  %v3584_v40 = vpack.i.bf16 %v1530_v29, %v1529_v54  ;;  %v1623_v23 = vsel %vm609_vm10, %v4339_v26, %v4341_v56  ;;  %v3392_v29 = vld [vmem:[%s5187_s5 + $0x10] sm:$0xff]  ;;  %v3395_v54 = vld [vmem:[%s5184_s1 + $0xc] sm:$0xf] }
 0x303   :  { %1396 = vrot.lane.b32.xlu1 %v1386_v37, %s3671_s24  ;;  %v1633_v30 = vmul.f32 %v1624_v3, %v4348_v31  ;;  %v1632_v41 = vmul.f32 %v1623_v23, %v4345_v35  ;;  %v1531_v56 = vmul.f32 %v1522_v27, %v4351_v15  ;;  %v1625_v37 = vsel %vm609_vm10, %v4354_v16, %v4360_v36  ;;  %v3393_v3 = vld [vmem:[%s5187_s5 + $0x18] sm:$0xff] }
 0x304   :  { %v1687_v38 = vpop.permute.xlu1 %1686  ;;  %v2325_v23 = vrot.slane %v3395_v54, %v3759_v10 }
 0x305   :  { %1467 = vrot.lane.b32.xlu0 %v1457_v24, %s5199_s23  ;;  %v4367_v39 = vld [vmem:[#allocation3 + $0x20] sm:$0xff]  ;;  %v1689_v20 = vpop.permute.xlu0 %1688  ;;  %v1702_v47 = vmul.f32 %v1687_v38, %v4356_v34  ;;  %v3594_v32 = vpack.i.bf16 %v1633_v30, %v1632_v41  ;;  %v2333_v41 = vrot.slane %v3395_v54, %v3786_v17 }
 0x306   :  { %v3559_v43 = vpack.i.bf16 %v4367_v39, %v4351_v15  ;;  %v1390_v44 = vmul.f32 %v4367_v39, %v1377_v21  ;;  %v1461_v59 = vmul.f32 %v4367_v39, %v4333_v42  ;;  %v1460_v21 = vmul.f32 %v1451_v11, %v4351_v15 }
 0x307   :  { %1538 = vrot.lane.b32.xlu1 %v1528_v25, %s3672_s25  ;;  %v1532_v42 = vmul.f32 %v4367_v39, %v4337_v50  ;;  %v1694_v28 = vsel %vm5202_vm11, %v1687_v38, %v1689_v20  ;;  %v1635_v25 = vmul.f32 %v4360_v36, %v4367_v39 }
 0x308   :  { %v1691_v33 = vpop.permute.xlu1 %1690  ;;  %v3569_v53 = vpack.i.bf16 %v1390_v44, %v1389_v6  ;;  %v3579_v7 = vpack.i.bf16 %v1461_v59, %v1460_v21  ;;  %v1703_v13 = vmul.f32 %v1694_v28, %v4345_v35  ;;  %v3396_v21 = vld [vmem:[%s5184_s1 + $0x1c] sm:$0xf] }
 0x309   :  { %3555 = vrot.lane.b32.xlu0 %v3554_v1, %s3673_s27  ;;  %v4379_v46 = vpop.permute.xlu0 %1692  ;;  %v1695_v22 = vsel %vm5202_vm11, %v1689_v20, %v1691_v33  ;;  %v3589_v50 = vpack.i.bf16 %v1532_v42, %v1531_v56  ;;  %v1634_v1 = vmul.f32 %v1625_v37, %v4351_v15  ;;  %v2421_v27 = vrot.slane %v3396_v21, %v3759_v10  ;;  %v3397_v37 = vld [vmem:[%s5184_s1 + $0x20] sm:$0xf] }
 0x30a   :  { %v1704_v26 = vmul.f32 %v1695_v22, %v4348_v31  ;;  %v1696_v38 = vsel %vm5202_vm11, %v1691_v33, %v4379_v46  ;;  %v2329_v22 = vrot.slane %v3395_v54, %v3757_v9  ;;  %v2425_v28 = vrot.slane %v3396_v21, %v3757_v9  ;;  %vm5208_vm11 = vmmov %vm5203_vm2 }
 0x30b   :  { %3560 = vrot.lane.b32.xlu1 %v3559_v43, %s3673_s27  ;;  %v3599_v36 = vpack.i.bf16 %v1635_v25, %v1634_v1  ;;  %v1705_v19 = vmul.f32 %v1696_v38, %v4351_v15  ;;  %v2433_v56 = vrot.slane %v3396_v21, %v3780_v14  ;;  %v2486_v25 = vrot.slane %v3397_v37, %v3759_v10  ;;  %v3398_v1 = vld [vmem:[%s5184_s1 + $0x18] sm:$0xf] }
 0x30c   :  { %v1758_v52 = vpop.permute.xlu1 %1757  ;;  %v3604_v43 = vpack.i.bf16 %v1704_v26, %v1703_v13  ;;  %v2338_v42 = vcombine.low %v2325_v23, %v2329_v22  ;;  %v2429_v26 = vrot.slane %v3396_v21, %v3786_v17  ;;  %v2490_v13 = vrot.slane %v3397_v37, %v3757_v9  ;;  %v4561_v21 = vld [vmem:[%s5184_s1 + $0x14] sm:$0xf] }
 0x30d   :  { %1712 = vrot.lane.b32.xlu0 %v1702_v47, %s3675_s30  ;;  %v1773_v61 = vmul.f32 %v1758_v52, %v4356_v34  ;;  %v1760_v0 = vpop.permute.xlu0 %1759  ;;  %v2494_v38 = vrot.slane %v3397_v37, %v3786_v17  ;;  %v2946_v23 = vrot.slane %v4561_v21, %v3759_v10 }
 0x30e   :  { %v1765_v20 = vsel %vm846_vm12, %v1758_v52, %v1760_v0 }
 0x30f   :  { %1641 = vrot.lane.b32.xlu1 %v1631_v62, %s3674_s28  ;;  %v1706_v62 = vmul.f32 %v4379_v46, %v4367_v39  ;;  %v1774_v6 = vmul.f32 %v1765_v20, %v4345_v35  ;;  %v2498_v20 = vrot.slane %v3397_v37, %v3780_v14  ;;  %v1317_v37 = vld [vmem:[%s5184_s1] sm:$0xf] }
 0x310   :  { %v1762_v58 = vpop.permute.xlu1 %1761 }
 0x311   :  { %3570 = vrot.lane.b32.xlu0 %v3569_v53, %s3671_s24  ;;  %v1764_v4 = vpop.permute.xlu0 %1763  ;;  %v1766_v24 = vsel %vm846_vm12, %v1760_v0, %v1762_v58  ;;  %v3609_v53 = vpack.i.bf16 %v1706_v62, %v1705_v19  ;;  %v2564_v19 = vrot.slane %v3398_v1, %v3780_v14  ;;  %v3399_v62 = vld [vmem:[%s5184_s1 + $0x1c] sm:$0xf] }
 0x312   :  { %v1775_v16 = vmul.f32 %v1766_v24, %v4348_v31  ;;  %v1767_v33 = vsel %vm846_vm12, %v1762_v58, %v1764_v4  ;;  %v1777_v55 = vmul.f32 %v1764_v4, %v4367_v39  ;;  %v2337_v58 = vrot.slane %v3395_v54, %v3780_v14 }
 0x313   :  { %1783 = vrot.lane.b32.xlu1 %v1773_v61, %s3676_s10  ;;  %v1776_v45 = vmul.f32 %v1767_v33, %v4351_v15  ;;  %v2434_v24 = vcombine.low %v2421_v27, %v2425_v28  ;;  %v2621_v33 = vrot.slane %v3399_v62, %v3757_v9 }
 0x314   :  { %v1829_v47 = vpop.permute.xlu1 %1828  ;;  %v3614_v48 = vpack.i.bf16 %v1775_v16, %v1774_v6  ;;  %v2552_v16 = vrot.slane %v3398_v1, %v3759_v10  ;;  %v2617_v6 = vrot.slane %v3399_v62, %v3759_v10 }
 0x315   :  { %3575 = vrot.lane.b32.xlu0 %v3574_v18, %s5199_s23  ;;  %v1831_v44 = vpop.permute.xlu0 %1830  ;;  %v3619_v8 = vpack.i.bf16 %v1777_v55, %v1776_v45  ;;  %v1844_v18 = vmul.f32 %v1829_v47, %v4356_v34  ;;  %v2629_v45 = vrot.slane %v3399_v62, %v3780_v14  ;;  %v3400_v55 = vld [vmem:[%s5184_s1 + $0x4] sm:$0xf] }
 0x316   :  { %v1836_v52 = vsel %vm972_vm14, %v1829_v47, %v1831_v44  ;;  %v2556_v47 = vrot.slane %v3398_v1, %v3757_v9 }
 0x317   :  { %3565 = vrot.lane.b32.xlu1 %v3564_v49, %s3671_s24  ;;  %v1845_v46 = vmul.f32 %v1836_v52, %v4345_v35  ;;  %v3394_v49 = vld [vmem:[%s5184_s1 + $0x14] sm:$0xf] }
 0x318   :  { %v1833_v57 = vpop.permute.xlu1 %1832  ;;  %v2259_v59 = vrot.slane %v3394_v49, %v3759_v10  ;;  %v2263_v11 = vrot.slane %v3394_v49, %v3757_v9  ;;  %v2267_v30 = vrot.slane %v3394_v49, %v3786_v17  ;;  %v2565_v52 = vcombine.low %v2552_v16, %v2556_v47 }
 0x319   :  { %3585 = vrot.lane.b32.xlu0 %v3584_v40, %s3672_s25  ;;  %v1835_v61 = vpop.permute.xlu0 %1834  ;;  %v1837_v12 = vsel %vm972_vm14, %v1831_v44, %v1833_v57  ;;  %v2271_v40 = vrot.slane %v3394_v49, %v3780_v14  ;;  %v2500_v44 = vcombine.low %v2494_v38, %v2498_v20  ;;  %v1326_v16 = vrot.slane %v1317_v37, %v3757_v9 }
 0x31a   :  { %v1838_v5 = vsel %vm972_vm14, %v1833_v57, %v1835_v61  ;;  %v1846_v0 = vmul.f32 %v1837_v12, %v4348_v31  ;;  %v1848_v60 = vmul.f32 %v1835_v61, %v4367_v39  ;;  %v2076_v39 = vld [vmem:[%s5187_s5 + $0x8] sm:$0xff]  ;;  %v2272_v4 = vcombine.low %v2259_v59, %v2263_v11 }
 0x31b   :  { %3580 = vrot.lane.b32.xlu1 %v3579_v7, %s5199_s23  ;;  %v1847_v63 = vmul.f32 %v1838_v5, %v4351_v15  ;;  %v2273_v7 = vcombine.low %v2267_v30, %v2271_v40  ;;  %v2630_v57 = vcombine.low %v2617_v6, %v2621_v33  ;;  %v2683_v61 = vrot.slane %v3400_v55, %v3759_v10 }
 0x31c   :  { %v2695_v12 = vrot.slane %v3400_v55, %v3780_v14  ;;  %v1330_v47 = vrot.slane %v1317_v37, %v3786_v17 }
 0x31d   :  { %3595 = vrot.lane.b32.xlu0 %v3594_v32, %s3674_s28  ;;  %v2339_v32 = vcombine.low %v2333_v41, %v2337_v58  ;;  %v2950_v58 = vrot.slane %v4561_v21, %v3757_v9 }
 0x31f   :  { %3590 = vrot.lane.b32.xlu1 %v3589_v50, %s3672_s25  ;;  %v2435_v50 = vcombine.low %v2429_v26, %v2433_v56 }
 0x321   :  { %3605 = vrot.lane.b32.xlu0 %v3604_v43, %s3675_s30  ;;  %v2499_v43 = vcombine.low %v2486_v25, %v2490_v13  ;;  %v1334_v25 = vrot.slane %v1317_v37, %v3780_v14 }
 0x323   :  { %3600 = vrot.lane.b32.xlu1 %v3599_v36, %s3674_s28  ;;  %v2560_v36 = vrot.slane %v3398_v1, %v3786_v17  ;;  %v1342_v1 = vmul.f32 %v1334_v25, %v4351_v15 }
 0x325   :  { %3615 = vrot.lane.b32.xlu0 %v3614_v48, %s3676_s10  ;;  %v2625_v48 = vrot.slane %v3399_v62, %v3786_v17 }
 0x327   :  { %3610 = vrot.lane.b32.xlu1 %v3609_v53, %s3675_s30  ;;  %v2566_v53 = vcombine.low %v2560_v36, %v2564_v19  ;;  %v2631_v5 = vcombine.low %v2625_v48, %v2629_v45  ;;  %v1322_v19 = vrot.slane %v1317_v37, %v3759_v10  ;;  %v1340_v48 = vmul.f32 %v1326_v16, %v4345_v35 }
 0x329   :  { %1856 = vrot.lane.b32.xlu0 %v1845_v46, %s3677_s12  ;;  %v2687_v46 = vrot.slane %v3400_v55, %v3757_v9 }
 0x32b   :  { %3620 = vrot.lane.b32.xlu1 %v3619_v8, %s3676_s10  ;;  %v2691_v8 = vrot.slane %v3400_v55, %v3786_v17 }
 0x32d   :  { %1860 = vrot.lane.b32.xlu0 %v1847_v63, %s3677_s12  ;;  %v3401_v63 = vld [vmem:[%s5184_s1 + $0x8] sm:$0xf] }
 0x32f   :  { %1858 = vrot.lane.b32.xlu1 %v1846_v0, %s3677_s12  ;;  %v2696_v0 = vcombine.low %v2683_v61, %v2687_v46 }
 0x331   :  { %1854 = vrot.lane.b32.xlu0 %v1844_v18, %s3677_s12  ;;  %v2748_v18 = vrot.slane %v3401_v63, %v3759_v10 }
 0x333   :  { %1862 = vrot.lane.b32.xlu1 %v1848_v60, %s3677_s12  ;;  %v2752_v60 = vrot.slane %v3401_v63, %v3757_v9 }
 0x335   :  { %2100 = vperm.xlu0 %3552, %v3392_v29   ;;  %v2697_v29 = vcombine.low %v2691_v8, %v2695_v12  ;;  %v2761_v49 = vcombine.low %v2748_v18, %v2752_v60 }
 0x337   :  { %2079 = vperm.xlu1 %3553, %v2075_v51   ;;  %v2756_v51 = vrot.slane %v3401_v63, %v3786_v17 }
 0x339   :  { %2105 = vperm.xlu0 %3552, %v3393_v3   ;;  %v2760_v3 = vrot.slane %v3401_v63, %v3780_v14 }
 0x33b   :  { %2084 = vperm.xlu1 %3553, %v2076_v39   ;;  %v3402_v39 = vld [vmem:[%s5184_s1 + $0x4] sm:$0xf]  ;;  %v2762_v11 = vcombine.low %v2756_v51, %v2760_v3 }
 0x33c   :  { %v2850_v54 = vrot.slane %v3402_v39, %v3759_v10  ;;  %v2854_v59 = vrot.slane %v3402_v39, %v3757_v9  ;;  %v2858_v30 = vrot.slane %v3402_v39, %v3786_v17  ;;  %v2862_v40 = vrot.slane %v3402_v39, %v3780_v14 }
 0x33d   :  { %2276 = vrot.lane.b32.xlu0 %v2273_v7, %s3666_s11 }
 0x33e   :  { %v2863_v22 = vcombine.low %v2850_v54, %v2854_v59  ;;  %v2864_v41 = vcombine.low %v2858_v30, %v2862_v40 }
 0x33f   :  { %2274 = vrot.lane.b32.xlu1 %v2272_v4, %s3666_s11  ;;  %v2959_v4 = vcombine.low %v2946_v23, %v2950_v58 }
 0x341   :  { %2342 = vrot.lane.b32.xlu0 %v2339_v32, %s3665_s29 }
 0x343   :  { %2340 = vrot.lane.b32.xlu1 %v2338_v42, %s3665_s29 }
 0x345   :  { %2438 = vrot.lane.b32.xlu0 %v2435_v50, %s3668_s17 }
 0x347   :  { %2436 = vrot.lane.b32.xlu1 %v2434_v24, %s3668_s17 }
 0x349   :  { %2503 = vrot.lane.b32.xlu0 %v2500_v44, %s3669_s20 }
 0x34b   :  { %2501 = vrot.lane.b32.xlu1 %v2499_v43, %s3669_s20 }
 0x34d   :  { %2569 = vrot.lane.b32.xlu0 %v2566_v53, %s3667_s14 }
 0x34f   :  { %2567 = vrot.lane.b32.xlu1 %v2565_v52, %s3667_s14  ;;  %v1341_v52 = vmul.f32 %v1330_v47, %v4348_v31 }
 0x351   :  { %2634 = vrot.lane.b32.xlu0 %v2631_v5, %s3668_s17 }
 0x353   :  { %2632 = vrot.lane.b32.xlu1 %v2630_v57, %s3668_s17  ;;  %v1339_v57 = vmul.f32 %v4356_v34, %v1322_v19 }
 0x355   :  { %2700 = vrot.lane.b32.xlu0 %v2697_v29, %s3663_s0 }
 0x357   :  { %2698 = vrot.lane.b32.xlu1 %v2696_v0, %s3663_s0 }
 0x359   :  { %2765 = vrot.lane.b32.xlu0 %v2762_v11, %s3664_s26 }
 0x35b   :  { %2763 = vrot.lane.b32.xlu1 %v2761_v49, %s3664_s26 }
 0x35d   :  { %2867 = vrot.lane.b32.xlu0 %v2864_v41, %s3663_s0 }
 0x35f   :  { %2865 = vrot.lane.b32.xlu1 %v2863_v22, %s3663_s0 }
 0x363   :  { %2961 = vrot.lane.b32.xlu1 %v2959_v4, %s3666_s11 }
 0x373   :  { %v4572_v7 = vpop.permute.xlu0 %1570 }
 0x375   :  { %v1397_v42 = vpop.permute.xlu1 %1396 }
 0x377   :  { %v1468_v27 = vpop.permute.xlu0 %1467 }
 0x379   :  { %v1539_v28 = vpop.permute.xlu1 %1538 }
 0x37b   :  { %v4574_v32 = vpop.permute.xlu0 %3555 }
 0x37c   :  { %v3558_v15 = vunpack.i.h.bf16 %v4574_v32  ;;  %v3557_v12 = vunpack.i.l.bf16 %v4574_v32 }
 0x37d   :  { %v4576_v26 = vpop.permute.xlu1 %3560 }
 0x37e   :  { %v3563_v11 = vunpack.i.h.bf16 %v4576_v26  ;;  %v1581_v40 = vsel %vm5204_vm4, %v3557_v12, %v3558_v15  ;;  %v3562_v4 = vunpack.i.l.bf16 %v4576_v26 }
 0x37f   :  { %v4578_v56 = vpop.permute.xlu0 %1712 }
 0x381   :  { %v1642_v24 = vpop.permute.xlu1 %1641 }
 0x383   :  { %v3571_v13 = vpop.permute.xlu0 %3570 }
 0x384   :  { %v3573_v50 = vunpack.i.h.bf16 %v3571_v13  ;;  %v3572_v38 = vunpack.i.l.bf16 %v3571_v13 }
 0x385   :  { %v4584_v20 = vpop.permute.xlu1 %1783 }
 0x386   :  { %v1409_v43 = vsel %vm5201_vm1, %v3572_v38, %v3573_v50 }
 0x387   :  { %v3576_v44 = vpop.permute.xlu0 %3575  ;;  %v3485_v36 = vpack.c.bf16 %v1409_v43, %v1342_v1 }
 0x388   :  { %v3578_v53 = vunpack.i.h.bf16 %v3576_v44  ;;  %v3577_v45 = vunpack.i.l.bf16 %v3576_v44 }
 0x389   :  { %v3566_v62 = vpop.permute.xlu1 %3565  ;;  %3486 = vmatprep.subr.bf16.mxu1 %v3485_v36 }
 0x38a   :  { %v3568_v6 = vunpack.i.h.bf16 %v3566_v62  ;;  %v3567_v33 = vunpack.i.l.bf16 %v3566_v62  ;;  %v1478_v34 = vsel %vm5203_vm2, %v3577_v45, %v3578_v53  ;;  %v1477_v23 = vsel %vm5205_vm13, %v1468_v27, %v3577_v45  ;;  %vm5209_vm13 = vmmov %vm5204_vm4 }
 0x38b   :  { %v3586_v55 = vpop.permute.xlu0 %3585 }
 0x38c   :  { %v1406_v61 = vsel %vm5201_vm1, %v1397_v42, %v3567_v33  ;;  %v1408_v46 = vsel %vm5201_vm1, %v3568_v6, %v3572_v38  ;;  %v3588_v5 = vunpack.i.h.bf16 %v3586_v55  ;;  %v3587_v8 = vunpack.i.l.bf16 %v3586_v55 }
 0x38d   :  { %v3581_v63 = vpop.permute.xlu1 %3580  ;;  %v1407_v35 = vsel %vm5201_vm1, %v3567_v33, %v3568_v6  ;;  %v3487_v0 = vpack.c.bf16 %v1408_v46, %v1341_v52  ;;  %v3471_v31 = vpack.c.bf16 %v1406_v61, %v1339_v57  ;;  %vm5207_vm1 = vmmov %vm5206_vm3  ;;  %v1580_v38 = vsel %vm5204_vm4, %v4572_v7, %v3557_v12 }
 0x38e   :  { %v3469_v18 = vpack.c.bf16 %v1407_v35, %v1340_v48  ;;  %v1548_v60 = vsel %vm482_vm15, %v1539_v28, %v3587_v8  ;;  %v3582_v29 = vunpack.i.l.bf16 %v3581_v63  ;;  %v1549_v3 = vsel %vm482_vm15, %v3587_v8, %v3588_v5 }
 0x38f   :  { %v3596_v51 = vpop.permute.xlu0 %3595  ;;  %3488 = vmatpush1.bf16.msra.mxu1 %v3487_v0  ;;  %v3583_v39 = vunpack.i.h.bf16 %v3581_v63  ;;  %v3473_v59 = vpack.c.bf16 %v1549_v3, %v1478_v34  ;;  %v3475_v32 = vpack.c.bf16 %v1548_v60, %v1477_v23 }
 0x390   :  { %3470 = vmatprep.subr.bf16.mxu0 %v3469_v18  ;;  %v3598_v49 = vunpack.i.h.bf16 %v3596_v51  ;;  %v3597_v54 = vunpack.i.l.bf16 %v3596_v51  ;;  %v1479_v42 = vsel %vm5203_vm2, %v3578_v53, %v3582_v29  ;;  %vm5212_vm2 = vcmask 785408  }
 0x391   :  { %3472 = vmatpush1.bf16.msra.mxu0 %v3471_v31  ;;  %v3591_v30 = vpop.permute.xlu1 %3590  ;;  %v1480_v50 = vsel %vm5208_vm11, %v3582_v29, %v3583_v39  ;;  %vm5210_vm11 = vmmov %vm5204_vm4  ;;  %vm5213_vm4 = vcmask 777216  }
 0x392   :  { %v3593_v22 = vunpack.i.h.bf16 %v3591_v30  ;;  %v3592_v41 = vunpack.i.l.bf16 %v3591_v30  ;;  %3474 = vmatprep.subr.bf16.mxu0 %v3473_v59  ;;  %v1652_v58 = vsel %vm5206_vm3, %v3597_v54, %v3598_v49  ;;  %v1651_v25 = vsel %vm5207_vm1, %v1642_v24, %v3597_v54  ;;  %vm5211_vm3 = vmmov %vm5207_vm1  ;;  %v1876_v59 = vld [vmem:[%s5188_s4] sm:$0xff] }
 0x393   :  { %v3606_v28 = vpop.permute.xlu0 %3605  ;;  %v3477_v37 = vpack.c.bf16 %v1652_v58, %v1581_v40  ;;  %v1582_v24 = vsel %vm5209_vm13, %v3558_v15, %v3562_v4  ;;  %v3479_v62 = vpack.c.bf16 %v1651_v25, %v1580_v38  ;;  %v1583_v6 = vsel %vm5210_vm11, %v3562_v4, %v3563_v11  ;;  %vm5214_vm13 = vmmov %vm5212_vm2 }
 0x394   :  { %v1550_v13 = vsel %vm482_vm15, %v3588_v5, %v3592_v41  ;;  %v1551_v27 = vsel %vm482_vm15, %v3592_v41, %v3593_v22  ;;  %v3608_v16 = vunpack.i.h.bf16 %v3606_v28  ;;  %v3607_v47 = vunpack.i.l.bf16 %v3606_v28  ;;  %vm5215_vm11 = vmmov %vm5213_vm4  ;;  %v1877_v22 = vld [vmem:[%s5188_s4 + $0x8] sm:$0xff] }
 0x395   :  { %3476 = vmatpush1.bf16.msra.mxu0 %v3475_v32  ;;  %v3601_v1 = vpop.permute.xlu1 %3600  ;;  %v3489_v43 = vpack.c.bf16 %v1551_v27, %v1480_v50  ;;  %v3491_v26 = vpack.c.bf16 %v1550_v13, %v1479_v42  ;;  %v2954_v41 = vrot.slane %v4561_v21, %v3786_v17  ;;  %v2958_v58 = vrot.slane %v4561_v21, %v3780_v14  ;;  %v3404_v42 = vld [vmem:[%s5184_s1 + $0xc] sm:$0xf] }
 0x396   :  { %v3603_v44 = vunpack.i.h.bf16 %v3601_v1  ;;  %v3602_v36 = vunpack.i.l.bf16 %v3601_v1  ;;  %3478 = vmatprep.subr.bf16.mxu0 %v3477_v37  ;;  %v1722_v57 = vsel %vm5212_vm2, %v4578_v56, %v3607_v47  ;;  %v1723_v61 = vsel %vm5214_vm13, %v3607_v47, %v3608_v16 }
 0x397   :  { %v3616_v19 = vpop.permute.xlu0 %3615  ;;  %3490 = vmatprep.subr.bf16.mxu1 %v3489_v43  ;;  %vm1914_vm13 = vcmask 588800   ;;  %v2960_v4 = vcombine.low %v2954_v41, %v2958_v58  ;;  %v3012_v28 = vrot.slane %v3404_v42, %v3759_v10  ;;  %v3016_v32 = vrot.slane %v3404_v42, %v3757_v9 }
 0x398   :  { %v1653_v33 = vsel %vm5207_vm1, %v3598_v49, %v3602_v36  ;;  %v3618_v48 = vunpack.i.h.bf16 %v3616_v19  ;;  %v3617_v7 = vunpack.i.l.bf16 %v3616_v19  ;;  %3492 = vmatpush1.bf16.msra.mxu1 %v3491_v26  ;;  %v1654_v52 = vsel %vm5211_vm3, %v3602_v36, %v3603_v44  ;;  %vm5216_vm1 = vmmov %vm5212_vm2 }
 0x399   :  { %3480 = vmatpush1.bf16.msra.mxu0 %v3479_v62  ;;  %v3611_v53 = vpop.permute.xlu1 %3610  ;;  %v3493_v45 = vpack.c.bf16 %v1654_v52, %v1583_v6  ;;  %v3495_v55 = vpack.c.bf16 %v1653_v33, %v1582_v24  ;;  %vm5217_vm3 = vmmov %vm5213_vm4  ;;  %2963 = vrot.lane.b32.xlu0 %v2960_v4, %s3666_s11  ;;  %v3020_v37 = vrot.slane %v3404_v42, %v3786_v17 }
 0x39a   :  { %v1793_v15 = vsel %vm5213_vm4, %v4584_v20, %v3617_v7  ;;  %v1794_v46 = vsel %vm5215_vm11, %v3617_v7, %v3618_v48  ;;  %v3613_v63 = vunpack.i.h.bf16 %v3611_v53  ;;  %v3612_v35 = vunpack.i.l.bf16 %v3611_v53  ;;  %vm5218_vm2 = vmmov %vm5216_vm1 }
 0x39b   :  { %v1857_v5 = vpop.permute.xlu0 %1856  ;;  %3494 = vmatprep.subr.bf16.mxu1 %v3493_v45  ;;  %v3481_v8 = vpack.c.bf16 %v1794_v46, %v1723_v61  ;;  %v3483_v12 = vpack.c.bf16 %v1793_v15, %v1722_v57  ;;  %vm5219_vm4 = vmmov %vm5217_vm3  ;;  %v3024_v25 = vrot.slane %v3404_v42, %v3780_v14  ;;  %v3025_v13 = vcombine.low %v3012_v28, %v3016_v32 }
 0x39c   :  { %3496 = vmatpush1.bf16.msra.mxu1 %v3495_v55  ;;  %v1724_v60 = vsel %vm5216_vm1, %v3608_v16, %v3612_v35  ;;  %v1725_v29 = vsel %vm5218_vm2, %v3612_v35, %v3613_v63  ;;  %vm2152_vm11 = vcmask 1047556   ;;  %vm5220_vm1 = vcmask 1043592  }
 0x39d   :  { %v3621_v0 = vpop.permute.xlu1 %3620  ;;  %3482 = vmatprep.subr.bf16.mxu0 %v3481_v8  ;;  %v3026_v50 = vcombine.low %v3020_v37, %v3024_v25  ;;  %3027 = vrot.lane.b32.xlu1 %v3025_v13, %s3665_s29  ;;  %vm5223_vm2 = vcmask 134144  }
 0x39e   :  { %v3623_v31 = vunpack.i.h.bf16 %v3621_v0  ;;  %v3622_v18 = vunpack.i.l.bf16 %v3621_v0  ;;  %3484 = vmatpush1.bf16.msra.mxu0 %v3483_v12 }
 0x39f   :  { %v1861_v56 = vpop.permute.xlu0 %1860  ;;  %3029 = vrot.lane.b32.xlu0 %v3026_v50, %s3665_s29 }
 0x3a0   :  { %v1795_v20 = vsel %vm5217_vm3, %v3618_v48, %v3622_v18  ;;  %v1796_v51 = vsel %vm5219_vm4, %v3622_v18, %v3623_v31  ;;  %vm4765_vm3 = vmor %vm2152_vm11, %vm5220_vm1 }
 0x3a1   :  { %v1859_v34 = vpop.permute.xlu1 %1858  ;;  %v3497_v3 = vpack.c.bf16 %v1796_v51, %v1725_v29  ;;  %v3499_v39 = vpack.c.bf16 %v1795_v20, %v1724_v60  ;;  %vm5224_vm4 = vmmov %vm5223_vm2 }
 0x3a2   :  { %v1865_v49 = vsel %vm1021_vm5, %v1857_v5, %v1859_v34  ;;  %v1866_v23 = vsel %vm1021_vm5, %v1859_v34, %v1861_v56  ;;  %vm5226_vm11 = vmmov %vm5223_vm2 }
 0x3a3   :  { %v1855_v54 = vpop.permute.xlu0 %1854  ;;  %1937 = vmatprep.subr.mxu0 %v1865_v49  ;;  %3498 = vmatprep.subr.bf16.mxu1 %v3497_v3 }
 0x3a4   :  { %v1864_v11 = vsel %vm1021_vm5, %v1855_v54, %v1857_v5  ;;  %3500 = vmatpush1.bf16.msra.mxu1 %v3499_v39 }
 0x3a5   :  { %v1863_v30 = vpop.permute.xlu1 %1862  ;;  %1938 = vmatpush1.msra.mxu0 %v1864_v11 }
 0x3a6   :  { %3388 = vmatmul.mubr.msk.f32.vlgmr.msra.gmra.mrb[2].mxu0 %vm1914_vm13, %v1876_v59  ;;  %v1867_v40 = vsel %vm1021_vm5, %v1861_v56, %v1863_v30 }
 0x3a7   :  { %2014 = vmatprep.subr.mxu1 %v1867_v40  ;;  %1991 = vmatprep.mubr.f32.mxu0 %v3661_v2 }
 0x3a8   :  { %2015 = vmatpush1.msra.mxu1 %v1866_v23 }
 0x3a9   :  { %3390 = vmatmul.mubr.msk.f32.vlgmr.msra.gmra.mrb[2].mxu1 %vm1914_vm13, %v1876_v59 }
 0x3aa   :  { %3389 = vmatmul.mubr.msk.f32.gmra.mrb[4].mxu0 %vm1914_vm13, %v1877_v22  ;;  %2068 = vmatprep.mubr.f32.mxu1 %v3661_v2 }
 0x3ab   :  { %3217 = vmatprep.mubr.f32.mxu0 %v3661_v2 }
 0x3ad   :  { %3391 = vmatmul.mubr.msk.f32.gmra.mrb[4].mxu1 %vm1914_vm13, %v1877_v22  ;;  %vm5225_vm13 = vmmov %vm5223_vm2 }
 0x3ae   :  { %3294 = vmatprep.mubr.f32.mxu1 %v3661_v2 }
 0x3b4   :  { %v2101_v27 = vpop.permute.xlu0 %2100 }
 0x3b6   :  { %v2080_v38 = vpop.permute.xlu1 %2079 }
 0x3b8   :  { %v4660_v21 = vpop.permute.xlu0 %2105 }
 0x3ba   :  { %v2085_v1 = vpop.permute.xlu1 %2084 }
 0x3bc   :  { %v4664_v26 = vpop.permute.xlu0 %2276 }
 0x3be   :  { %v4662_v43 = vpop.permute.xlu1 %2274 }
 0x3c0   :  { %v4668_v47 = vpop.permute.xlu0 %2342 }
 0x3c2   :  { %v4666_v16 = vpop.permute.xlu1 %2340 }
 0x3c4   :  { %v4672_v36 = vpop.permute.xlu0 %2438 }
 0x3c6   :  { %v4670_v44 = vpop.permute.xlu1 %2436 }
 0x3c8   :  { %v4676_v19 = vpop.permute.xlu0 %2503 }
 0x3ca   :  { %v4674_v24 = vpop.permute.xlu1 %2501 }
 0x3cc   :  { %v4680_v6 = vpop.permute.xlu0 %2569 }
 0x3ce   :  { %v4678_v62 = vpop.permute.xlu1 %2567 }
 0x3d0   :  { %v4684_v48 = vpop.permute.xlu0 %2634 }
 0x3d2   :  { %v4682_v33 = vpop.permute.xlu1 %2632 }
 0x3d4   :  { %v4688_v52 = vpop.permute.xlu0 %2700 }
 0x3d5   :  { %v2703_v45 = vrot.slane %v4688_v52, 4 }
 0x3d6   :  { %v4686_v7 = vpop.permute.xlu1 %2698 }
 0x3d7   :  { %v2702_v53 = vrot.slane %v4686_v7, 4 }
 0x3d8   :  { %v4703_v61 = vpop.permute.xlu0 %2765 }
 0x3d9   :  { %v2705_v55 = vsel %vm209_vm9, %v2702_v53, %v2703_v45  ;;  %v2768_v5 = vrot.slane %v4703_v61, 4 }
 0x3da   :  { %v4699_v57 = vsel %vm180_vm7, %v2705_v55, %v4688_v52  ;;  %v4701_v15 = vpop.permute.xlu1 %2763 }
 0x3db   :  { %v2767_v46 = vrot.slane %v4701_v15, 4 }
 0x3dd   :  { %v2770_v8 = vsel %vm209_vm9, %v2767_v46, %v2768_v5  ;;  %v2769_v52 = vsel %vm307_vm6, %v2767_v46, %v4701_v15 }
 0x3de   :  { %v4714_v12 = vsel %vm307_vm6, %v2770_v8, %v4703_v61  ;;  %vm5230_vm6 = vcmask 908288  }
 0x479   :  { %v1987_v63 = vpop.f32.mrb[2].mxu0 }
 0x47a   :  { %v2087_v35 = vmul.f32 %v2080_v38, %v1987_v63  ;;  %v1989_v0 = vpop.f32.mrb[3].mxu0 }
 0x47b   :  { %v2088_v31 = vmul.f32 %v2080_v38, %v1989_v0 }
 0x47c   :  { %v2108_v18 = vadd.f32 %v2101_v27, %v2087_v35  ;;  %v2064_v56 = vpop.f32.mrb[2].mxu1 }
 0x47d   :  { %v2109_v60 = vadd.f32 %v2101_v27, %v2088_v31  ;;  %v2089_v20 = vmul.f32 %v2080_v38, %v2064_v56  ;;  %v1993_v29 = vpop.f32.mrb[4].mxu0  ;;  %v2066_v51 = vpop.f32.mrb[3].mxu1 }
 0x47e   :  { %v2116_v34 = vmax.f32 %v2108_v18, 0.0  ;;  %v2091_v3 = vmul.f32 %v2085_v1, %v1993_v29  ;;  %v2090_v39 = vmul.f32 %v2080_v38, %v2066_v51  ;;  %v1995_v49 = vpop.f32.mrb[5].mxu0  ;;  %v4752_v31 = vpop.permute.xlu1 %2865 }
 0x47f   :  { %v2117_v54 = vmax.f32 %v2109_v60, 0.0  ;;  %v2110_v59 = vadd.f32 %v2101_v27, %v2089_v20  ;;  %v2092_v11 = vmul.f32 %v2085_v1, %v1995_v49  ;;  %v4754_v18 = vpop.permute.xlu0 %2867 }
 0x480   :  { %2124 = vst [vmem:[%s5189_s8] sm:$0xff] %v2116_v34  ;;  %v2112_v30 = vadd.f32 %v4660_v21, %v2091_v3  ;;  %v2111_v40 = vadd.f32 %v2101_v27, %v2090_v39  ;;  %v2070_v23 = vpop.f32.mrb[4].mxu1 }
 0x481   :  { %2125 = vst [vmem:[%s5189_s8 + $0x8] sm:$0xff] %v2117_v54  ;;  %v2118_v22 = vmax.f32 %v2110_v59, 0.0  ;;  %v2113_v41 = vadd.f32 %v4660_v21, %v2092_v11  ;;  %v2093_v58 = vmul.f32 %v2085_v1, %v2070_v23  ;;  %v2072_v4 = vpop.f32.mrb[5].mxu1  ;;  %v2138_v42 = vcombine.low %v2116_v34, %v2117_v54 }
 0x482   :  { %v2120_v28 = vmax.f32 %v2112_v30, 0.0  ;;  %v2119_v32 = vmax.f32 %v2111_v40, 0.0  ;;  %v2094_v37 = vmul.f32 %v2085_v1, %v2072_v4  ;;  %v2160_v25 = vcombine.high %v2116_v34, %v2117_v54  ;;  %v4756_v56 = vpop.permute.xlu1 %2961 }
 0x483   :  { %2126 = vst [vmem:[%s5189_s8 + $0x10] sm:$0xff] %v2118_v22  ;;  %v2121_v13 = vmax.f32 %v2113_v41, 0.0  ;;  %v2114_v50 = vadd.f32 %v4660_v21, %v2093_v58  ;;  %2140 = vrot.lane.b32.xlu1 %v2138_v42, %s3662_s9  ;;  %v4758_v60 = vpop.permute.xlu0 %2963  ;;  %v2808_v42 = vld [vmem:[%s5184_s1] sm:$0xf]  ;;  %s5229_s1 = smov 126  }
 0x484   :  { %2128 = vst [vmem:[%s5189_s8 + $0x20] sm:$0xff] %v2120_v28  ;;  %2127 = vst [vmem:[%s5189_s8 + $0x18] sm:$0xff] %v2119_v32  ;;  %v2115_v27 = vadd.f32 %v4660_v21, %v2094_v37  ;;  %v2139_v38 = vcombine.low %v2118_v22, %v2119_v32  ;;  %v2161_v1 = vcombine.high %v2118_v22, %v2119_v32 }
 0x485   :  { %2129 = vst [vmem:[%s5189_s8 + $0x28] sm:$0xff] %v2121_v13  ;;  %v2122_v55 = vmax.f32 %v2114_v50, 0.0  ;;  %v2184_v8 = vcombine.low %v2120_v28, %v2121_v13  ;;  %v2204_v63 = vcombine.high %v2120_v28, %v2121_v13 }
 0x486   :  { %v2123_v35 = vmax.f32 %v2115_v27, 0.0  ;;  %2142 = vrot.lane.b32.xlu0 %v2139_v38, %s3662_s9  ;;  %v4760_v20 = vpop.permute.xlu1 %3027  ;;  %v2821_v27 = vrot.slane %v2808_v42, %v3786_v17  ;;  %v2825_v38 = vrot.slane %v2808_v42, %v3780_v14  ;;  %v2813_v17 = vrot.slane %v2808_v42, %v3759_v10 }
 0x487   :  { %2130 = vst [vmem:[%s5189_s8 + $0x30] sm:$0xff] %v2122_v55  ;;  %2162 = vrot.lane.b32.xlu1 %v2160_v25, %s3662_s9  ;;  %v4762_v29 = vpop.permute.xlu0 %3029  ;;  %v2817_v14 = vrot.slane %v2808_v42, %v3757_v9  ;;  %v2869_v9 = vrot.slane %v4752_v31, 4 }
 0x488   :  { %2131 = vst [vmem:[%s5189_s8 + $0x38] sm:$0xff] %v2123_v35  ;;  %v2185_v21 = vcombine.low %v2122_v55, %v2123_v35  ;;  %v2205_v0 = vcombine.high %v2122_v55, %v2123_v35 }
 0x48a   :  { %2164 = vrot.lane.b32.xlu0 %v2161_v1, %s3662_s9 }
 0x48b   :  { %2186 = vrot.lane.b32.xlu1 %v2184_v8, %s3662_s9 }
 0x48e   :  { %2188 = vrot.lane.b32.xlu0 %v2185_v21, %s3662_s9 }
 0x48f   :  { %2206 = vrot.lane.b32.xlu1 %v2204_v63, %s3662_s9 }
 0x492   :  { %2208 = vrot.lane.b32.xlu0 %v2205_v0, %s3662_s9 }
 0x4f5   :  { %v2141_v51 = vpop.permute.xlu1 %2140 }
 0x4f6   :  { %v2144_v3 = vrot.slane %v2141_v51, 4 }
 0x4f8   :  { %v2146_v39 = vsel %vm29_vm0, %v2144_v3, %v2141_v51  ;;  %v2143_v49 = vpop.permute.xlu0 %2142  ;;  %v2827_v51 = vcombine.low %v2821_v27, %v2825_v38  ;;  %v2344_v38 = vrot.slane %v4666_v16, 4 }
 0x4f9   :  { %2154 = vst.msk [vmem:[#allocation4] sm:$0xff] %vm4765_vm3, %v2146_v39  ;;  %v2145_v54 = vrot.slane %v2143_v49, 4  ;;  %v2163_v59 = vpop.permute.xlu1 %2162 }
 0x4fa   :  { %v2166_v11 = vrot.slane %v2163_v59, 4 }
 0x4fb   :  { %v2147_v30 = vsel %vm209_vm9, %v2144_v3, %v2145_v54  ;;  %2156 = vst.msk [vmem:[#allocation4 + $0x10] sm:$0xf] %vm5223_vm2, %v2145_v54  ;;  %vm5238_vm2 = vcmask 900096  }
 0x4fc   :  { %v4775_v40 = vsel %vm29_vm0, %v2147_v30, %v2143_v49  ;;  %v2168_v23 = vsel %vm29_vm0, %v2166_v11, %v2163_v59  ;;  %v2165_v22 = vpop.permute.xlu0 %2164  ;;  %v2345_v49 = vrot.slane %v4668_v47, 4  ;;  %v2826_v59 = vcombine.low %v2813_v17, %v2817_v14 }
 0x4fd   :  { %2174 = vst.msk [vmem:[#allocation4 + $0x14] sm:$0xff] %vm4765_vm3, %v2168_v23  ;;  %v2167_v41 = vrot.slane %v2165_v22, 4  ;;  %v2187_v58 = vpop.permute.xlu1 %2186  ;;  %v2346_v17 = vsel %vm418_vm8, %v2344_v38, %v4666_v16 }
 0x4fe   :  { %v2190_v4 = vrot.slane %v2187_v58, 4 }
 0x4ff   :  { %v2169_v28 = vsel %vm209_vm9, %v2166_v11, %v2167_v41  ;;  %2176 = vst.msk [vmem:[#allocation4 + $0x24] sm:$0xf] %vm5224_vm4, %v2167_v41  ;;  %vm5239_vm4 = vcmask 777216  }
 0x500   :  { %v4786_v32 = vsel %vm29_vm0, %v2169_v28, %v2165_v22  ;;  %v2192_v37 = vsel %vm29_vm0, %v2190_v4, %v2187_v58  ;;  %v2189_v25 = vpop.permute.xlu0 %2188  ;;  %v2221_v34 = vld [vmem:[#allocation4] sm:$0xff]  ;;  %v2871_v22 = vsel %vm180_vm7, %v2869_v9, %v4752_v31  ;;  %v2278_v28 = vrot.slane %v4662_v43, 4 }
 0x501   :  { %2198 = vst.msk [vmem:[#allocation4 + $0x28] sm:$0xff] %vm4765_vm3, %v2192_v37  ;;  %v2191_v13 = vrot.slane %v2189_v25, 4  ;;  %v2207_v50 = vpop.permute.xlu1 %2206 }
 0x502   :  { %v2210_v1 = vrot.slane %v2207_v50, 4  ;;  %v2223_v55 = vld [vmem:[#allocation4 + $0x10] sm:$0xf]  ;;  %v2280_v27 = vsel %vm609_vm10, %v2278_v28, %v4662_v43  ;;  %v2505_v43 = vrot.slane %v4674_v24, 4 }
 0x503   :  { %v2193_v8 = vsel %vm209_vm9, %v2190_v4, %v2191_v13  ;;  %2200 = vst.msk [vmem:[#allocation4 + $0x38] sm:$0xf] %vm5225_vm13, %v2191_v13  ;;  %2237 = vrot.lane.b32.xlu0 %v2223_v55, %s3673_s27  ;;  %v2415_v37 = vld [vmem:[#allocation4 + $0x10] sm:$0xf]  ;;  %v2227_v13 = vcombine.high %v2221_v34, %v2221_v34  ;;  %v2572_v55 = vrot.slane %v4680_v6, 4  ;;  %vm5240_vm13 = vmmov %vm5238_vm2 }
 0x504   :  { %v4797_v63 = vsel %vm29_vm0, %v2193_v8, %v2189_v25  ;;  %v2212_v35 = vsel %vm29_vm0, %v2210_v1, %v2207_v50  ;;  %v2209_v21 = vpop.permute.xlu0 %2208  ;;  %v4800_v0 = vld [vmem:[#allocation4 + $0x14] sm:$0xff]  ;;  %v2441_v25 = vrot.slane %v4672_v36, 4  ;;  %v4841_v8 = vmul.f32 %v2280_v27, %v2221_v34  ;;  %v2253_v14 = vld [vmem:[#allocation4 + $0x10] sm:$0xf] }
 0x505   :  { %2218 = vst.msk [vmem:[#allocation4 + $0x3c] sm:$0xff] %vm4765_vm3, %v2212_v35  ;;  %v2211_v3 = vrot.slane %v2209_v21, 4  ;;  %2393 = vrot.lane.b32.xlu1 %v4800_v0, %s3673_s27  ;;  %v2507_v16 = vsel %vm972_vm14, %v2505_v43, %v4674_v24  ;;  %v2389_v27 = vcombine.low %v4786_v32, %v4786_v32  ;;  %v4963_v15 = vmul.f32 %v4699_v57, %v4797_v63  ;;  %vm5237_vm3 = vmmov %vm5230_vm6 }
 0x506   :  { %v2319_v39 = vld [vmem:[#allocation4 + $0x24] sm:$0xf]  ;;  %v2450_v50 = vmul.f32 %v2441_v25, %v2415_v37 }
 0x507   :  { %v2213_v54 = vsel %vm209_vm9, %v2210_v1, %v2211_v3  ;;  %2220 = vst.msk [vmem:[#allocation4 + $0x4c] sm:$0xf] %vm5226_vm11, %v2211_v3  ;;  %2233 = vrot.lane.b32.xlu0 %v4775_v40, %s3673_s27  ;;  %v2354_v30 = vmul.f32 %v2345_v49, %v2319_v39  ;;  %v3626_v4 = vld [vmem:[#allocation4 + $0x24] ss:$0 sps:$4 sm:$0xff]   ;;  %v4851_v3 = vmul.f32 %v4800_v0, %v2346_v17  ;;  %vm5241_vm11 = vmmov %vm5239_vm4 }
 0x508   :  { %v4815_v10 = vsel %vm29_vm0, %v2213_v54, %v2209_v21  ;;  %v2546_v1 = vld [vmem:[#allocation4 + $0x24] sm:$0xf]  ;;  %v2388_v39 = vcombine.low %v4800_v0, %v4800_v0  ;;  %vm5227_vm0 = vcmask 261120  }
 0x509   :  { %v2831_v11 = vmul.f32 %v2827_v51, %v4815_v10  ;;  %2229 = vrot.lane.b32.xlu1 %v2221_v34, %s3673_s27  ;;  %v2581_v21 = vmul.f32 %v2572_v55, %v2546_v1  ;;  %v2279_v51 = vrot.slane %v4664_v26, 4  ;;  %v2506_v1 = vrot.slane %v4676_v19, 4  ;;  %vm5228_vm1 = vmmov %vm5227_vm0 }
 0x50b   :  { %v2835_v23 = vcombine.high %v2831_v11, %v2831_v11  ;;  %2840 = vst [vmem:[#allocation7 + $0xb0] sm:$0xf] %v2831_v11  ;;  %2368 = vrot.lane.b32.xlu0 %v2354_v30, %s3672_s25  ;;  %v2288_v54 = vmul.f32 %v2279_v51, %v2253_v14  ;;  %v2513_v11 = vmul.f32 %v2507_v16, %v2221_v34  ;;  %v2611_v14 = vld [vmem:[#allocation4 + $0x24] sm:$0xf] }
 0x50c   :  { %v4824_v41 = vld [vmem:[#allocation4 + $0x3c] sm:$0xff]  ;;  %v2347_v30 = vsel %vm209_vm9, %v2344_v38, %v2345_v49  ;;  %v2480_v38 = vld [vmem:[#allocation4 + $0x10] sm:$0xf] }
 0x50d   :  { %v2830_v58 = vmul.f32 %v2826_v59, %v4824_v41  ;;  %2841 = vst [vmem:[#allocation7 + $0xb8] sm:$0xf] %v2835_v23  ;;  %2397 = vrot.lane.b32.xlu1 %v4786_v32, %s3673_s27  ;;  %v4830_v42 = vmul.f32 %v2871_v22, %v4824_v41  ;;  %v2636_v59 = vrot.slane %v4682_v33, 4  ;;  %v2294_v23 = vcombine.low %v2288_v54, %v2288_v54 }
 0x50e   :  { %v2440_v22 = vrot.slane %v4670_v44, 4  ;;  %v2348_v24 = vsel %vm418_vm8, %v2347_v30, %v4668_v47  ;;  %v2637_v54 = vrot.slane %v4684_v48, 4 }
 0x50f   :  { %2838 = vst [vmem:[#allocation7 + $0xa0] sm:$0xf] %v2830_v58  ;;  %2399 = vrot.lane.b32.xlu0 %v3626_v4, %s3673_s27  ;;  %v2834_v35 = vcombine.high %v2830_v58, %v2830_v58  ;;  %v2638_v58 = vsel %vm846_vm12, %v2636_v59, %v4682_v33  ;;  %v2353_v37 = vmul.f32 %v2348_v24, %v4786_v32 }
 0x510   :  { %v2644_v4 = vmul.f32 %v2638_v58, %v4800_v0  ;;  %v2442_v49 = vsel %vm846_vm12, %v2440_v22, %v4670_v44  ;;  %v2443_v33 = vsel %vm209_vm9, %v2440_v22, %v2441_v25  ;;  %v2646_v16 = vmul.f32 %v2637_v54, %v2611_v14 }
 0x511   :  { %2231 = vrot.lane.b32.xlu1 %v2227_v13, %s3673_s27  ;;  %2839 = vst [vmem:[#allocation7 + $0xa8] sm:$0xf] %v2834_v35  ;;  %v2571_v13 = vrot.slane %v4678_v62, 4  ;;  %v2515_v35 = vmul.f32 %v2506_v1, %v2480_v38  ;;  %v2639_v30 = vsel %vm209_vm9, %v2636_v59, %v2637_v54  ;;  %v2910_v59 = vld [vmem:[#allocation4 + $0x38] sm:$0xf]  ;;  %v2359_v24 = vcombine.high %v2353_v37, %v2353_v37 }
 0x512   :  { %v2650_v58 = vcombine.low %v2644_v4, %v2644_v4 }
 0x513   :  { %2464 = vrot.lane.b32.xlu0 %v2450_v50, %s3676_s10  ;;  %v2448_v50 = vmul.f32 %v2442_v49, %v2221_v34  ;;  %v2573_v47 = vsel %vm5227_vm0, %v2571_v13, %v4678_v62  ;;  %v2444_v34 = vsel %vm846_vm12, %v2443_v33, %v4672_v36  ;;  %v2228_v62 = vcombine.high %v4775_v40, %v4775_v40  ;;  %v2677_v33 = vld [vmem:[#allocation4 + $0x38] sm:$0xf]  ;;  %vm5242_vm0 = vmmov %vm5239_vm4 }
 0x514   :  { %v2579_v44 = vmul.f32 %v2573_v47, %v4800_v0  ;;  %v2449_v25 = vmul.f32 %v2444_v34, %v4775_v40  ;;  %v2574_v17 = vsel %vm209_vm9, %v2571_v13, %v2572_v55  ;;  %v2521_v0 = vcombine.low %v2515_v35, %v2515_v35 }
 0x515   :  { %2297 = vrot.lane.b32.xlu1 %v4841_v8, %s3674_s28  ;;  %v2712_v47 = vmul.f32 %v2703_v45, %v2677_v33 }
 0x517   :  { %2595 = vrot.lane.b32.xlu0 %v2581_v21, %s3675_s30  ;;  %v2281_v21 = vsel %vm209_vm9, %v2278_v28, %v2279_v51  ;;  %v2575_v51 = vsel %vm5228_vm1, %v2574_v17, %v4680_v6  ;;  %v2640_v6 = vsel %vm846_vm12, %v2639_v30, %v4684_v48  ;;  %v2358_v48 = vcombine.high %v4851_v3, %v4851_v3  ;;  %vm5235_vm12 = vmmov %vm5230_vm6 }
 0x518   :  { %v2282_v36 = vsel %vm609_vm10, %v2281_v21, %v4664_v26  ;;  %v2580_v55 = vmul.f32 %v2575_v51, %v4786_v32  ;;  %v2645_v22 = vmul.f32 %v2640_v6, %v4786_v32  ;;  %v2454_v32 = vcombine.high %v2448_v50, %v2448_v50  ;;  %v2742_v21 = vld [vmem:[#allocation4 + $0x38] sm:$0xf]  ;;  %vm5243_vm1 = vmmov %vm5242_vm0 }
 0x519   :  { %2360 = vrot.lane.b32.xlu1 %v4851_v3, %s3672_s25  ;;  %v2287_v28 = vmul.f32 %v2282_v36, %v4775_v40  ;;  %v2777_v46 = vmul.f32 %v2768_v5, %v2742_v21  ;;  %v2870_v17 = vrot.slane %v4754_v18, 4  ;;  %v2966_v5 = vrot.slane %v4758_v60, 4 }
 0x51a   :  { %v2586_v13 = vcombine.high %v2580_v55, %v2580_v55 }
 0x51b   :  { %2391 = vrot.lane.b32.xlu0 %v2388_v39, %s3673_s27  ;;  %v2508_v39 = vsel %vm209_vm9, %v2505_v43, %v2506_v1  ;;  %v2293_v3 = vcombine.low %v2287_v28, %v2287_v28  ;;  %v3628_v1 = vld [vmem:[#allocation4 + $0x4c] ss:$0 sps:$4 sm:$0xff]   ;;  %v2783_v36 = vcombine.low %v2777_v46, %v2777_v46  ;;  %v2872_v61 = vsel %vm209_vm9, %v2869_v9, %v2870_v17 }
 0x51c   :  { %v2509_v26 = vsel %vm972_vm14, %v2508_v39, %v4676_v19  ;;  %v2292_v19 = vcombine.low %v4841_v8, %v4841_v8  ;;  %v2585_v8 = vcombine.high %v2579_v44, %v2579_v44  ;;  %v2873_v39 = vsel %vm180_vm7, %v2872_v61, %v4754_v18  ;;  %vm5236_vm14 = vmmov %vm5230_vm6 }
 0x51d   :  { %2524 = vrot.lane.b32.xlu1 %v2513_v11, %s3677_s12  ;;  %v2514_v43 = vmul.f32 %v2509_v26, %v4775_v40  ;;  %v2519_v40 = vcombine.low %v2513_v11, %v2513_v11  ;;  %v2908_v11 = vld [vmem:[#allocation4 + $0x28] sm:$0xff]  ;;  %v2878_v31 = vmul.f32 %v2873_v39, %v4815_v10 }
 0x51e   :  { %v2914_v34 = vcombine.high %v2908_v11, %v2908_v11  ;;  %v2775_v45 = vmul.f32 %v2908_v11, %v2769_v52 }
 0x51f   :  { %2303 = vrot.lane.b32.xlu0 %v2294_v23, %s3674_s28  ;;  %v2652_v23 = vcombine.low %v2646_v16, %v2646_v16  ;;  %v2520_v49 = vcombine.low %v2514_v43, %v2514_v43 }
 0x521   :  { %2655 = vrot.lane.b32.xlu1 %v2644_v4, %s3676_s10  ;;  %v2455_v4 = vcombine.high %v2449_v25, %v2449_v25 }
 0x523   :  { %2364 = vrot.lane.b32.xlu0 %v2353_v37, %s3672_s25  ;;  %v3032_v37 = vrot.slane %v4762_v29, 4 }
 0x525   :  { %2456 = vrot.lane.b32.xlu1 %v2448_v50, %s3676_s10  ;;  %v2651_v50 = vcombine.low %v2645_v22, %v2645_v22 }
 0x527   :  { %2395 = vrot.lane.b32.xlu0 %v2389_v27, %s3673_s27  ;;  %v3006_v27 = vld [vmem:[#allocation4 + $0x4c] sm:$0xf] }
 0x528   :  { %v3041_v38 = vmul.f32 %v3032_v37, %v3006_v27 }
 0x529   :  { %2587 = vrot.lane.b32.xlu1 %v2579_v44, %s3675_s30  ;;  %v2965_v44 = vrot.slane %v4756_v56, 4 }
 0x52b   :  { %2460 = vrot.lane.b32.xlu0 %v2449_v25, %s3676_s10  ;;  %v2967_v25 = vsel %vm609_vm10, %v2965_v44, %v4756_v56  ;;  %v2704_v56 = vsel %vm180_vm7, %v2702_v53, %v4686_v7  ;;  %v2776_v7 = vmul.f32 %v4714_v12, %v4797_v63  ;;  %v2940_v53 = vld [vmem:[#allocation4 + $0x38] sm:$0xf]  ;;  %v2968_v9 = vsel %vm209_vm9, %v2965_v44, %v2966_v5  ;;  %vm5231_vm7 = vmmov %vm5230_vm6 }
 0x52c   :  { %v4955_v35 = vmul.f32 %v2967_v25, %v2908_v11  ;;  %v2975_v54 = vmul.f32 %v2966_v5, %v2940_v53  ;;  %v2915_v12 = vcombine.high %v4797_v63, %v4797_v63  ;;  %v2969_v26 = vsel %vm609_vm10, %v2968_v9, %v4758_v60  ;;  %vm5234_vm10 = vmmov %vm5230_vm6 }
 0x52d   :  { %2235 = vrot.lane.b32.xlu1 %v2228_v62, %s3673_s27  ;;  %v2844_v62 = vld [vmem:[#allocation4 + $0x4c] sm:$0xf]  ;;  %v2781_v60 = vcombine.low %v2775_v45, %v2775_v45 }
 0x52e   :  { %v2879_v57 = vmul.f32 %v2870_v17, %v2844_v62  ;;  %v2981_v16 = vcombine.low %v2975_v54, %v2975_v54  ;;  %v2979_v27 = vcombine.low %v4955_v35, %v4955_v35  ;;  %v3135_v62 = vld [vmem:[%s5190_s7 + $0x8] sm:$0xf] }
 0x52f   :  { %2530 = vrot.lane.b32.xlu0 %v2521_v0, %s3677_s12  ;;  %v2710_v0 = vmul.f32 %v2908_v11, %v2704_v56 }
 0x530   :  { %v2885_v14 = vcombine.low %v2879_v57, %v2879_v57 }
 0x531   :  { %2301 = vrot.lane.b32.xlu1 %v2287_v28, %s3674_s28  ;;  %v3031_v28 = vrot.slane %v4760_v20, 4 }
 0x533   :  { %2591 = vrot.lane.b32.xlu0 %v2580_v55, %s3675_s30  ;;  %v3034_v55 = vsel %vm209_vm9, %v3031_v28, %v3032_v37  ;;  %vm5233_vm9 = vmmov %vm5230_vm6 }
 0x535   :  { %2528 = vrot.lane.b32.xlu1 %v2514_v43, %s3677_s12  ;;  %v2974_v43 = vmul.f32 %v2969_v26, %v4797_v63 }
 0x537   :  { %2661 = vrot.lane.b32.xlu0 %v2652_v23, %s3676_s10  ;;  %v3035_v23 = vsel %vm418_vm8, %v3034_v55, %v4762_v29  ;;  %v2980_v52 = vcombine.low %v2974_v43, %v2974_v43 }
 0x539   :  { %2659 = vrot.lane.b32.xlu1 %v2645_v22, %s3676_s10  ;;  %v3040_v22 = vmul.f32 %v3035_v23, %v4815_v10 }
 0x53b   :  { %2295 = vrot.lane.b32.xlu0 %v2292_v19, %s3674_s28  ;;  %v3033_v19 = vsel %vm418_vm8, %v3031_v28, %v4760_v20  ;;  %vm5232_vm8 = vmmov %vm5230_vm6 }
 0x53d   :  { %2924 = vrot.lane.b32.xlu1 %v2910_v59, %s3673_s27 }
 0x53f   :  { %2522 = vrot.lane.b32.xlu0 %v2519_v40, %s3677_s12  ;;  %v3039_v40 = vmul.f32 %v3033_v19, %v4824_v41 }
 0x541   :  { %2362 = vrot.lane.b32.xlu1 %v2358_v48, %s3672_s25 }
 0x543   :  { %2653 = vrot.lane.b32.xlu0 %v2650_v58, %s3676_s10  ;;  %v3045_v58 = vcombine.high %v3039_v40, %v3039_v40 }
 0x545   :  { %2458 = vrot.lane.b32.xlu1 %v2454_v32, %s3676_s10 }
 0x547   :  { %3080 = vrot.lane.b32.xlu0 %v4824_v41, %s3673_s27 }
 0x549   :  { %2589 = vrot.lane.b32.xlu1 %v2585_v8, %s3675_s30  ;;  %v2716_v8 = vcombine.high %v2710_v0, %v2710_v0 }
 0x54b   :  { %2916 = vrot.lane.b32.xlu0 %v2908_v11, %s3673_s27 }
 0x54d   :  { %2366 = vrot.lane.b32.xlu1 %v2359_v24, %s3672_s25 }
 0x54f   :  { %2299 = vrot.lane.b32.xlu0 %v2293_v3, %s3674_s28  ;;  %v2782_v3 = vcombine.low %v2776_v7, %v2776_v7 }
 0x551   :  { %2462 = vrot.lane.b32.xlu1 %v2455_v4, %s3676_s10 }
 0x553   :  { %2526 = vrot.lane.b32.xlu0 %v2520_v49, %s3677_s12  ;;  %v2883_v49 = vcombine.low %v4830_v42, %v4830_v42 }
 0x555   :  { %2593 = vrot.lane.b32.xlu1 %v2586_v13, %s3675_s30 }
 0x557   :  { %2657 = vrot.lane.b32.xlu0 %v2651_v50, %s3676_s10  ;;  %v2884_v50 = vcombine.low %v2878_v31, %v2878_v31 }
 0x559   :  { %2920 = vrot.lane.b32.xlu1 %v4797_v63, %s3673_s27  ;;  %v3076_v63 = vcombine.low %v4815_v10, %v4815_v10 }
 0x55b   :  { %2726 = vrot.lane.b32.xlu0 %v2712_v47, %s3671_s24  ;;  %v3046_v47 = vcombine.high %v3040_v22, %v3040_v22 }
 0x55d   :  { %3055 = vrot.lane.b32.xlu1 %v3041_v38, %s3672_s25 }
 0x55f   :  { %3084 = vrot.lane.b32.xlu0 %v4815_v10, %s3673_s27 }
 0x561   :  { %3086 = vrot.lane.b32.xlu1 %v3628_v1, %s3673_s27  ;;  %v2717_v1 = vcombine.high %v4963_v15, %v4963_v15 }
 0x563   :  { %2918 = vrot.lane.b32.xlu0 %v2914_v34, %s3673_s27 }
 0x565   :  { %2786 = vrot.lane.b32.xlu1 %v2775_v45, %s5229_s1  ;;  %v3134_v45 = vld [vmem:[%s5190_s7] sm:$0xff] }
 0x567   :  { %2984 = vrot.lane.b32.xlu0 %v4955_v35, %s3674_s28  ;;  %v3075_v35 = vcombine.low %v4824_v41, %v4824_v41 }
 0x569   :  { %2888 = vrot.lane.b32.xlu1 %v4830_v42, %s3671_s24 }
 0x56b   :  { %2722 = vrot.lane.b32.xlu0 %v4963_v15, %s3671_s24 }
 0x56d   :  { %2718 = vrot.lane.b32.xlu1 %v2710_v0, %s3671_s24 }
 0x56f   :  { %2792 = vrot.lane.b32.xlu0 %v2783_v36, %s5229_s1 }
 0x571   :  { %2790 = vrot.lane.b32.xlu1 %v2776_v7, %s5229_s1 }
 0x573   :  { %2894 = vrot.lane.b32.xlu0 %v2885_v14, %s3671_s24 }
 0x575   :  { %v4991_v51 = vpop.permute.xlu0 %2237  ;;  %2892 = vrot.lane.b32.xlu1 %v2878_v31, %s3671_s24 }
 0x577   :  { %2922 = vrot.lane.b32.xlu0 %v2915_v12, %s3673_s27  ;;  %v4996_v18 = vpop.permute.xlu1 %2393 }
 0x579   :  { %v5000_v30 = vpop.permute.xlu0 %2233  ;;  %2990 = vrot.lane.b32.xlu1 %v2981_v16, %s3674_s28 }
 0x57b   :  { %2988 = vrot.lane.b32.xlu0 %v2974_v43, %s3674_s28  ;;  %v2230_v6 = vpop.permute.xlu1 %2229 }
 0x57d   :  { %v5010_v59 = vpop.permute.xlu0 %2368  ;;  %3051 = vrot.lane.b32.xlu1 %v3040_v22, %s3672_s25 }
 0x57f   :  { %2784 = vrot.lane.b32.xlu0 %v2781_v60, %s5229_s1  ;;  %v2398_v29 = vpop.permute.xlu1 %2397 }
 0x581   :  { %v2400_v48 = vpop.permute.xlu0 %2399  ;;  %3082 = vrot.lane.b32.xlu1 %v3076_v63, %s3673_s27 }
 0x582   :  { %v2404_v32 = vsel %vm5230_vm6, %v2398_v29, %v2400_v48  ;;  %vm5244_vm6 = vcmask 785408  }
 0x583   :  { %2412 = vst [vmem:[#allocation7 + $0x38] sm:$0xf0] %v2404_v32  ;;  %3049 = vrot.lane.b32.xlu0 %v3045_v58, %s3672_s25  ;;  %v2232_v20 = vpop.permute.xlu1 %2231 }
 0x584   :  { %v2239_v11 = vsel %vm5231_vm7, %v2230_v6, %v2232_v20  ;;  %v2240_v24 = vsel %vm5232_vm8, %v2232_v20, %v5000_v30  ;;  %vm5245_vm7 = vmmov %vm5244_vm6 }
 0x585   :  { %2247 = vst [vmem:[#allocation7] sm:$0xf] %v2239_v11  ;;  %2248 = vst [vmem:[#allocation7 + $0x8] sm:$0xf] %v2240_v24  ;;  %v5023_v10 = vpop.permute.xlu0 %2464  ;;  %2720 = vrot.lane.b32.xlu1 %v2716_v8, %s3671_s24 }
 0x586   :  { %vm5246_vm8 = vmmov %vm5238_vm2 }
 0x587   :  { %2788 = vrot.lane.b32.xlu0 %v2782_v3, %s5229_s1  ;;  %v5027_v4 = vpop.permute.xlu1 %2297 }
 0x589   :  { %v5031_v13 = vpop.permute.xlu0 %2595  ;;  %2886 = vrot.lane.b32.xlu1 %v2883_v49, %s3671_s24 }
 0x58b   :  { %2890 = vrot.lane.b32.xlu0 %v2884_v50, %s3671_s24  ;;  %v2361_v33 = vpop.permute.xlu1 %2360 }
 0x58d   :  { %v2392_v37 = vpop.permute.xlu0 %2391  ;;  %2982 = vrot.lane.b32.xlu1 %v2979_v27, %s3674_s28 }
 0x58e   :  { %v2401_v38 = vsel %vm5233_vm9, %v2392_v37, %v4996_v18  ;;  %vm5247_vm9 = vmmov %vm5238_vm2 }
 0x58f   :  { %2409 = vst [vmem:[#allocation7 + $0x20] sm:$0xf0] %v2401_v38  ;;  %3053 = vrot.lane.b32.xlu0 %v3046_v47, %s3672_s25  ;;  %v5041_v42 = vpop.permute.xlu1 %2524 }
 0x591   :  { %v2304_v44 = vpop.permute.xlu0 %2303  ;;  %2724 = vrot.lane.b32.xlu1 %v2717_v1, %s3671_s24 }
 0x593   :  { %3047 = vrot.lane.b32.xlu0 %v3039_v40, %s3672_s25  ;;  %v5047_v34 = vpop.permute.xlu1 %2655 }
 0x595   :  { %v2365_v25 = vpop.permute.xlu0 %2364  ;;  %2986 = vrot.lane.b32.xlu1 %v2980_v52, %s3674_s28 }
 0x597   :  { %3138 = vperm.xlu0 %3552, %v3134_v45   ;;  %v2457_v21 = vpop.permute.xlu1 %2456 }
 0x599   :  { %v2396_v15 = vpop.permute.xlu0 %2395  ;;  %3078 = vrot.lane.b32.xlu1 %v3075_v35, %s3673_s27 }
 0x59a   :  { %v2402_v46 = vsel %vm5234_vm10, %v4996_v18, %v2396_v15  ;;  %v2403_v56 = vsel %vm5235_vm12, %v2396_v15, %v2398_v29  ;;  %vm5248_vm10 = vmmov %vm5242_vm0 }
 0x59b   :  { %2410 = vst [vmem:[#allocation7 + $0x28] sm:$0xf0] %v2402_v46  ;;  %2411 = vst [vmem:[#allocation7 + $0x30] sm:$0xf0] %v2403_v56  ;;  %v2588_v17 = vpop.permute.xlu1 %2587 }
 0x59c   :  { %vm5249_vm12 = vmmov %vm5242_vm0 }
 0x59d   :  { %v2461_v0 = vpop.permute.xlu0 %2460  ;;  %3143 = vperm.xlu1 %3553, %v3135_v62  }
 0x59f   :  { %v2236_v41 = vpop.permute.xlu1 %2235 }
 0x5a0   :  { %v2241_v36 = vsel %vm5236_vm14, %v5000_v30, %v2236_v41  ;;  %v2242_v57 = vsel %vm5237_vm3, %v2236_v41, %v4991_v51  ;;  %vm5250_vm14 = vmmov %vm5244_vm6 }
 0x5a1   :  { %2249 = vst [vmem:[#allocation7 + $0x10] sm:$0xf] %v2241_v36  ;;  %2250 = vst [vmem:[#allocation7 + $0x18] sm:$0xf] %v2242_v57  ;;  %v2531_v61 = vpop.permute.xlu0 %2530 }
 0x5a2   :  { %vm5251_vm3 = vmmov %vm5244_vm6 }
 0x5a3   :  { %v2302_v7 = vpop.permute.xlu1 %2301 }
 0x5a4   :  { %v2308_v53 = vsel %vm5238_vm2, %v2302_v7, %v2304_v44  ;;  %vm5252_vm2 = vmmov %vm5242_vm0 }
 0x5a5   :  { %2316 = vst [vmem:[#allocation7 + $0x18] sm:$0xf0] %v2308_v53  ;;  %v2592_v5 = vpop.permute.xlu0 %2591 }
 0x5a7   :  { %v2529_v14 = vpop.permute.xlu1 %2528 }
 0x5a8   :  { %v2535_v39 = vsel %vm1021_vm5, %v2529_v14, %v2531_v61 }
 0x5a9   :  { %2543 = vst [vmem:[#allocation7 + $0x58] sm:$0xf0] %v2535_v39  ;;  %v2662_v31 = vpop.permute.xlu0 %2661 }
 0x5ab   :  { %v5068_v54 = vpop.permute.xlu1 %2659 }
 0x5ac   :  { %v2666_v9 = vsel %vm5239_vm4, %v5068_v54, %v2662_v31  ;;  %v3105_v38 = vld [vmem:[#allocation7 + $0x18] sm:$0xff]  ;;  %vm5254_vm4 = vcmask 908288  }
 0x5ad   :  { %2674 = vst [vmem:[#allocation7 + $0x78] sm:$0xf0] %v2666_v9  ;;  %v2296_v28 = vpop.permute.xlu0 %2295 }
 0x5ae   :  { %v2305_v12 = vsel %vm5240_vm13, %v2296_v28, %v5027_v4  ;;  %vm5255_vm13 = vmmov %vm5254_vm4 }
 0x5af   :  { %2313 = vst [vmem:[#allocation7] sm:$0xf0] %v2305_v12  ;;  %v5074_v51 = vpop.permute.xlu1 %2924 }
 0x5b1   :  { %v2523_v55 = vpop.permute.xlu0 %2522 }
 0x5b2   :  { %v2532_v18 = vsel %vm1021_vm5, %v2523_v55, %v5041_v42 }
 0x5b3   :  { %2540 = vst [vmem:[#allocation7 + $0x40] sm:$0xf0] %v2532_v18  ;;  %v2363_v16 = vpop.permute.xlu1 %2362 }
 0x5b4   :  { %v2370_v26 = vsel %vm482_vm15, %v2361_v33, %v2363_v16  ;;  %v2371_v30 = vsel %vm482_vm15, %v2363_v16, %v2365_v25 }
 0x5b5   :  { %2378 = vst [vmem:[#allocation7 + $0x20] sm:$0xf] %v2370_v26  ;;  %2379 = vst [vmem:[#allocation7 + $0x28] sm:$0xf] %v2371_v30  ;;  %v2654_v43 = vpop.permute.xlu0 %2653 }
 0x5b6   :  { %v2663_v23 = vsel %vm5241_vm11, %v2654_v43, %v5047_v34  ;;  %v3102_v62 = vld [vmem:[#allocation7] sm:$0xff]  ;;  %vm5256_vm11 = vmmov %vm5254_vm4 }
 0x5b7   :  { %2671 = vst [vmem:[#allocation7 + $0x60] sm:$0xf0] %v2663_v23  ;;  %v2459_v6 = vpop.permute.xlu1 %2458 }
 0x5b8   :  { %v2466_v22 = vsel %vm5242_vm0, %v2457_v21, %v2459_v6  ;;  %v2467_v19 = vsel %vm5243_vm1, %v2459_v6, %v2461_v0  ;;  %vm5258_vm1 = vcmask 1039360  }
 0x5b9   :  { %2474 = vst [vmem:[#allocation7 + $0x40] sm:$0xf] %v2466_v22  ;;  %2475 = vst [vmem:[#allocation7 + $0x48] sm:$0xf] %v2467_v19  ;;  %v5084_v60 = vpop.permute.xlu0 %3080 }
 0x5bb   :  { %v2590_v40 = vpop.permute.xlu1 %2589 }
 0x5bc   :  { %v2597_v63 = vsel %vm5244_vm6, %v2588_v17, %v2590_v40  ;;  %v2598_v29 = vsel %vm5245_vm7, %v2590_v40, %v2592_v5  ;;  %v3107_v52 = vld [vmem:[#allocation7 + $0x28] sm:$0xff]  ;;  %v3106_v45 = vld [vmem:[#allocation7 + $0x20] sm:$0xff]  ;;  %vm5259_vm6 = vmmov %vm5254_vm4 }
 0x5bd   :  { %2605 = vst [vmem:[#allocation7 + $0x60] sm:$0xf] %v2597_v63  ;;  %2606 = vst [vmem:[#allocation7 + $0x68] sm:$0xf] %v2598_v29  ;;  %v5088_v48 = vpop.permute.xlu0 %2916  ;;  %v3503_v17 = vpack.c.bf16 %v3106_v45, %v3102_v62 }
 0x5be   :  { %vm5260_vm7 = vmmov %vm5254_vm4 }
 0x5bf   :  { %v2367_v58 = vpop.permute.xlu1 %2366 }
 0x5c0   :  { %v2372_v32 = vsel %vm482_vm15, %v2365_v25, %v2367_v58  ;;  %v2373_v20 = vsel %vm482_vm15, %v2367_v58, %v5010_v59  ;;  %v3110_v28 = vld [vmem:[#allocation7 + $0x40] sm:$0xff] }
 0x5c1   :  { %2380 = vst [vmem:[#allocation7 + $0x30] sm:$0xf] %v2372_v32  ;;  %2381 = vst [vmem:[#allocation7 + $0x38] sm:$0xf] %v2373_v20  ;;  %v2300_v8 = vpop.permute.xlu0 %2299 }
 0x5c2   :  { %v2306_v11 = vsel %vm5246_vm8, %v5027_v4, %v2300_v8  ;;  %v2307_v24 = vsel %vm5247_vm9, %v2300_v8, %v2302_v7 }
 0x5c3   :  { %2314 = vst [vmem:[#allocation7 + $0x8] sm:$0xf0] %v2306_v11  ;;  %2315 = vst [vmem:[#allocation7 + $0x10] sm:$0xf0] %v2307_v24  ;;  %v2463_v3 = vpop.permute.xlu1 %2462 }
 0x5c4   :  { %v2468_v49 = vsel %vm5248_vm10, %v2461_v0, %v2463_v3  ;;  %v2469_v50 = vsel %vm5249_vm12, %v2463_v3, %v5023_v10  ;;  %v3114_v53 = vld [vmem:[#allocation7 + $0x60] sm:$0xff]  ;;  %vm5262_vm10 = vmmov %vm5254_vm4 }
 0x5c5   :  { %2476 = vst [vmem:[#allocation7 + $0x50] sm:$0xf] %v2468_v49  ;;  %2477 = vst [vmem:[#allocation7 + $0x58] sm:$0xf] %v2469_v50  ;;  %v2527_v33 = vpop.permute.xlu0 %2526  ;;  %v3507_v55 = vpack.c.bf16 %v3114_v53, %v3110_v28 }
 0x5c6   :  { %v2533_v59 = vsel %vm1021_vm5, %v5041_v42, %v2527_v33  ;;  %v2534_v27 = vsel %vm1021_vm5, %v2527_v33, %v2529_v14  ;;  %vm5253_vm5 = vmmov %vm5242_vm0  ;;  %vm5257_vm0 = vcmask 1031168  }
 0x5c7   :  { %2541 = vst [vmem:[#allocation7 + $0x48] sm:$0xf0] %v2533_v59  ;;  %2542 = vst [vmem:[#allocation7 + $0x50] sm:$0xf0] %v2534_v27  ;;  %v2594_v4 = vpop.permute.xlu1 %2593 }
 0x5c8   :  { %v2599_v37 = vsel %vm5250_vm14, %v2592_v5, %v2594_v4  ;;  %v2600_v47 = vsel %vm5251_vm3, %v2594_v4, %v5031_v13  ;;  %v3109_v1 = vld [vmem:[#allocation7 + $0x38] sm:$0xff]  ;;  %v3108_v15 = vld [vmem:[#allocation7 + $0x30] sm:$0xff]  ;;  %vm5261_vm9 = vmmov %vm5257_vm0 }
 0x5c9   :  { %2607 = vst [vmem:[#allocation7 + $0x70] sm:$0xf] %v2599_v37  ;;  %2608 = vst [vmem:[#allocation7 + $0x78] sm:$0xf] %v2600_v47  ;;  %v2658_v10 = vpop.permute.xlu0 %2657  ;;  %v3517_v44 = vpack.c.bf16 %v3109_v1, %v3105_v38 }
 0x5ca   :  { %v2664_v42 = vsel %vm5252_vm2, %v5047_v34, %v2658_v10  ;;  %v2665_v25 = vsel %vm5253_vm5, %v2658_v10, %v5068_v54  ;;  %v3103_v35 = vld [vmem:[#allocation7 + $0x8] sm:$0xff]  ;;  %v3104_v21 = vld [vmem:[#allocation7 + $0x10] sm:$0xff]  ;;  %vm5263_vm12 = vmmov %vm5254_vm4 }
 0x5cb   :  { %2672 = vst [vmem:[#allocation7 + $0x68] sm:$0xf0] %v2664_v42  ;;  %2673 = vst [vmem:[#allocation7 + $0x70] sm:$0xf0] %v2665_v25  ;;  %3518 = vmatprep.subr.bf16.mxu1 %v3517_v44  ;;  %v2921_v13 = vpop.permute.xlu1 %2920  ;;  %v3501_v46 = vpack.c.bf16 %v3107_v52, %v3103_v35  ;;  %v3519_v56 = vpack.c.bf16 %v3108_v15, %v3104_v21 }
 0x5cc   :  { %v3113_v41 = vld [vmem:[#allocation7 + $0x58] sm:$0xff]  ;;  %vm5264_vm14 = vmmov %vm5258_vm1 }
 0x5cd   :  { %v5109_v0 = vpop.permute.xlu0 %2726  ;;  %3502 = vmatprep.subr.bf16.mxu0 %v3501_v46  ;;  %3520 = vmatpush1.bf16.msra.mxu1 %v3519_v56  ;;  %vm5265_vm3 = vmmov %vm5258_vm1 }
 0x5ce   :  { %3504 = vmatpush1.bf16.msra.mxu0 %v3503_v17  ;;  %v3111_v7 = vld [vmem:[#allocation7 + $0x48] sm:$0xff]  ;;  %v3112_v14 = vld [vmem:[#allocation7 + $0x50] sm:$0xff]  ;;  %vm5266_vm2 = vmmov %vm5257_vm0 }
 0x5cf   :  { %v5111_v34 = vpop.permute.xlu1 %3055  ;;  %vm5267_vm5 = vmmov %vm5257_vm0 }
 0x5d0   :  { %v3117_v36 = vld [vmem:[#allocation7 + $0x78] sm:$0xff] }
 0x5d1   :  { %v3085_v57 = vpop.permute.xlu0 %3084  ;;  %v3521_v61 = vpack.c.bf16 %v3117_v36, %v3113_v41 }
 0x5d2   :  { %v3115_v5 = vld [vmem:[#allocation7 + $0x68] sm:$0xff]  ;;  %v3116_v39 = vld [vmem:[#allocation7 + $0x70] sm:$0xff] }
 0x5d3   :  { %3522 = vmatprep.subr.bf16.mxu1 %v3521_v61  ;;  %v3087_v31 = vpop.permute.xlu1 %3086  ;;  %v3505_v54 = vpack.c.bf16 %v3115_v5, %v3111_v7  ;;  %v3523_v9 = vpack.c.bf16 %v3116_v39, %v3112_v14 }
 0x5d4   :  { %v3091_v12 = vsel %vm5254_vm4, %v3085_v57, %v3087_v31  ;;  %vm5268_vm4 = vmmov %vm5258_vm1 }
 0x5d5   :  { %3099 = vst [vmem:[#allocation7 + $0xf8] sm:$0xf0] %v3091_v12  ;;  %v2919_v18 = vpop.permute.xlu0 %2918  ;;  %3506 = vmatprep.subr.bf16.mxu0 %v3505_v54  ;;  %3524 = vmatpush1.bf16.msra.mxu1 %v3523_v9 }
 0x5d6   :  { %v2926_v16 = vsel %vm5255_vm13, %v5088_v48, %v2919_v18  ;;  %v2927_v26 = vsel %vm5256_vm11, %v2919_v18, %v2921_v13  ;;  %3508 = vmatpush1.bf16.msra.mxu0 %v3507_v55  ;;  %vm5269_vm13 = vmmov %vm5258_vm1 }
 0x5d7   :  { %2934 = vst [vmem:[#allocation7 + $0xc0] sm:$0xf] %v2926_v16  ;;  %2935 = vst [vmem:[#allocation7 + $0xc8] sm:$0xf] %v2927_v26  ;;  %v2787_v30 = vpop.permute.xlu1 %2786 }
 0x5d8   :  { %vm5270_vm11 = vmmov %vm5258_vm1 }
 0x5d9   :  { %v5117_v43 = vpop.permute.xlu0 %2984 }
 0x5db   :  { %v2889_v23 = vpop.permute.xlu1 %2888 }
 0x5dd   :  { %v2723_v6 = vpop.permute.xlu0 %2722 }
 0x5df   :  { %v2719_v22 = vpop.permute.xlu1 %2718 }
 0x5e1   :  { %v2793_v19 = vpop.permute.xlu0 %2792 }
 0x5e3   :  { %v2791_v40 = vpop.permute.xlu1 %2790 }
 0x5e4   :  { %v2797_v63 = vsel %vm5257_vm0, %v2791_v40, %v2793_v19  ;;  %vm5271_vm0 = vmmov %vm5246_vm8 }
 0x5e5   :  { %2805 = vst [vmem:[#allocation7 + $0x98] sm:$0xf0] %v2797_v63  ;;  %v2895_v29 = vpop.permute.xlu0 %2894 }
 0x5e7   :  { %v2893_v58 = vpop.permute.xlu1 %2892 }
 0x5e8   :  { %v2899_v48 = vsel %vm5258_vm1, %v2893_v58, %v2895_v29 }
 0x5e9   :  { %2907 = vst [vmem:[#allocation7 + $0xb8] sm:$0xf0] %v2899_v48  ;;  %v2923_v32 = vpop.permute.xlu0 %2922 }
 0x5ea   :  { %v2928_v20 = vsel %vm5259_vm6, %v2921_v13, %v2923_v32  ;;  %v2929_v8 = vsel %vm5260_vm7, %v2923_v32, %v5074_v51  ;;  %vm5272_vm6 = vmmov %vm5258_vm1  ;;  %v3100_v32 = vld [vmem:[%s5191_s6] sm:$0xff] }
 0x5eb   :  { %2936 = vst [vmem:[#allocation7 + $0xd0] sm:$0xf] %v2928_v20  ;;  %2937 = vst [vmem:[#allocation7 + $0xd8] sm:$0xf] %v2929_v8  ;;  %v2991_v11 = vpop.permute.xlu1 %2990  ;;  %v3101_v8 = vld [vmem:[%s5191_s6 + $0x8] sm:$0xf] }
 0x5ec   :  { %vm5273_vm7 = vmmov %vm5271_vm0 }
 0x5ed   :  { %v2989_v24 = vpop.permute.xlu0 %2988 }
 0x5ee   :  { %v2995_v3 = vsel %vm5246_vm8, %v2989_v24, %v2991_v11  ;;  %vm5274_vm8 = vmmov %vm5271_vm0 }
 0x5ef   :  { %3003 = vst [vmem:[#allocation7 + $0xd8] sm:$0xf0] %v2995_v3  ;;  %v3052_v49 = vpop.permute.xlu1 %3051 }
 0x5f0   :  { %v3125_v28 = vld [vmem:[#allocation7 + $0xb8] sm:$0xff] }
 0x5f1   :  { %v2785_v50 = vpop.permute.xlu0 %2784 }
 0x5f2   :  { %v2794_v33 = vsel %vm5261_vm9, %v2785_v50, %v2787_v30  ;;  %vm3146_vm9 = vcmask 523264  }
 0x5f3   :  { %2802 = vst [vmem:[#allocation7 + $0x80] sm:$0xf0] %v2794_v33  ;;  %v3083_v59 = vpop.permute.xlu1 %3082 }
 0x5f4   :  { %v3089_v27 = vsel %vm5262_vm10, %v5084_v60, %v3083_v59  ;;  %v3090_v4 = vsel %vm5263_vm12, %v3083_v59, %v3085_v57 }
 0x5f5   :  { %3097 = vst [vmem:[#allocation7 + $0xe8] sm:$0xf0] %v3089_v27  ;;  %3098 = vst [vmem:[#allocation7 + $0xf0] sm:$0xf0] %v3090_v4  ;;  %v3050_v51 = vpop.permute.xlu0 %3049 }
 0x5f6   :  { %v3058_v37 = vsel %vm482_vm15, %v3050_v51, %v3052_v49 }
 0x5f7   :  { %3066 = vst [vmem:[#allocation7 + $0xe8] sm:$0xf] %v3058_v37  ;;  %v2721_v47 = vpop.permute.xlu1 %2720 }
 0x5f8   :  { %v2728_v38 = vsel %vm5264_vm14, %v2719_v22, %v2721_v47  ;;  %v2729_v1 = vsel %vm5265_vm3, %v2721_v47, %v2723_v6 }
 0x5f9   :  { %2736 = vst [vmem:[#allocation7 + $0x80] sm:$0xf] %v2728_v38  ;;  %2737 = vst [vmem:[#allocation7 + $0x88] sm:$0xf] %v2729_v1  ;;  %v2789_v10 = vpop.permute.xlu0 %2788 }
 0x5fa   :  { %v2795_v44 = vsel %vm5266_vm2, %v2787_v30, %v2789_v10  ;;  %v2796_v52 = vsel %vm5267_vm5, %v2789_v10, %v2791_v40 }
 0x5fb   :  { %2803 = vst [vmem:[#allocation7 + $0x88] sm:$0xf0] %v2795_v44  ;;  %2804 = vst [vmem:[#allocation7 + $0x90] sm:$0xf0] %v2796_v52  ;;  %v2887_v45 = vpop.permute.xlu1 %2886 }
 0x5fc   :  { %v2896_v42 = vsel %vm5268_vm4, %v2887_v45, %v2889_v23 }
 0x5fd   :  { %2904 = vst [vmem:[#allocation7 + $0xa0] sm:$0xf0] %v2896_v42  ;;  %v2891_v25 = vpop.permute.xlu0 %2890 }
 0x5fe   :  { %v2897_v35 = vsel %vm5269_vm13, %v2889_v23, %v2891_v25  ;;  %v2898_v21 = vsel %vm5270_vm11, %v2891_v25, %v2893_v58  ;;  %v3131_v22 = vld [vmem:[#allocation7 + $0xe8] sm:$0xff] }
 0x5ff   :  { %2905 = vst [vmem:[#allocation7 + $0xa8] sm:$0xf0] %v2897_v35  ;;  %2906 = vst [vmem:[#allocation7 + $0xb0] sm:$0xf0] %v2898_v21  ;;  %v2983_v15 = vpop.permute.xlu1 %2982 }
 0x600   :  { %v2992_v13 = vsel %vm5271_vm0, %v2983_v15, %v5117_v43 }
 0x601   :  { %3000 = vst [vmem:[#allocation7 + $0xc0] sm:$0xf0] %v2992_v13  ;;  %v3054_v46 = vpop.permute.xlu0 %3053 }
 0x602   :  { %v3059_v56 = vsel %vm482_vm15, %v3052_v49, %v3054_v46  ;;  %v3060_v62 = vsel %vm482_vm15, %v3054_v46, %v5111_v34  ;;  %v3119_v53 = vld [vmem:[#allocation7 + $0x88] sm:$0xff]  ;;  %v3118_v34 = vld [vmem:[#allocation7 + $0x80] sm:$0xff] }
 0x603   :  { %3067 = vst [vmem:[#allocation7 + $0xf0] sm:$0xf] %v3059_v56  ;;  %3068 = vst [vmem:[#allocation7 + $0xf8] sm:$0xf] %v3060_v62  ;;  %v2725_v17 = vpop.permute.xlu1 %2724 }
 0x604   :  { %v2730_v41 = vsel %vm5258_vm1, %v2723_v6, %v2725_v17  ;;  %v2731_v36 = vsel %vm5272_vm6, %v2725_v17, %v5109_v0  ;;  %v3122_v61 = vld [vmem:[#allocation7 + $0xa0] sm:$0xff] }
 0x605   :  { %2738 = vst [vmem:[#allocation7 + $0x90] sm:$0xf] %v2730_v41  ;;  %2739 = vst [vmem:[#allocation7 + $0x98] sm:$0xf] %v2731_v36  ;;  %v3048_v57 = vpop.permute.xlu0 %3047  ;;  %v3511_v9 = vpack.c.bf16 %v3122_v61, %v3118_v34 }
 0x606   :  { %v3057_v7 = vsel %vm482_vm15, %v3048_v57, %v3050_v51  ;;  %v3123_v5 = vld [vmem:[#allocation7 + $0xa8] sm:$0xff]  ;;  %v3124_v12 = vld [vmem:[#allocation7 + $0xb0] sm:$0xff]  ;;  %vm5275_vm15 = vmmov %vm5262_vm10 }
 0x607   :  { %3065 = vst [vmem:[#allocation7 + $0xe0] sm:$0xf] %v3057_v7  ;;  %v2987_v14 = vpop.permute.xlu1 %2986  ;;  %v3509_v39 = vpack.c.bf16 %v3123_v5, %v3119_v53 }
 0x608   :  { %v2993_v31 = vsel %vm5273_vm7, %v5117_v43, %v2987_v14  ;;  %v2994_v54 = vsel %vm5274_vm8, %v2987_v14, %v2989_v24  ;;  %v3129_v43 = vld [vmem:[#allocation7 + $0xd8] sm:$0xff] }
 0x609   :  { %3001 = vst [vmem:[#allocation7 + $0xc8] sm:$0xf0] %v2993_v31  ;;  %3002 = vst [vmem:[#allocation7 + $0xd0] sm:$0xf0] %v2994_v54  ;;  %3510 = vmatprep.subr.bf16.mxu0 %v3509_v39 }
 0x60a   :  { %3512 = vmatpush1.bf16.msra.mxu0 %v3511_v9  ;;  %v3133_v26 = vld [vmem:[#allocation7 + $0xf8] sm:$0xff]  ;;  %v3132_v63 = vld [vmem:[#allocation7 + $0xf0] sm:$0xff] }
 0x60b   :  { %v3079_v0 = vpop.permute.xlu1 %3078  ;;  %v3529_v6 = vpack.c.bf16 %v3133_v26, %v3129_v43 }
 0x60c   :  { %v3088_v55 = vsel %vm5275_vm15, %v3079_v0, %v5084_v60  ;;  %v3121_v18 = vld [vmem:[#allocation7 + $0x98] sm:$0xff]  ;;  %v3120_v16 = vld [vmem:[#allocation7 + $0x90] sm:$0xff]  ;;  %v3126_v60 = vld [vmem:[#allocation7 + $0xc0] sm:$0xff] }
 0x60d   :  { %3096 = vst [vmem:[#allocation7 + $0xe0] sm:$0xf0] %v3088_v55  ;;  %v3525_v30 = vpack.c.bf16 %v3125_v28, %v3121_v18  ;;  %v3527_v23 = vpack.c.bf16 %v3124_v12, %v3120_v16 }
 0x60f   :  { %3526 = vmatprep.subr.bf16.mxu1 %v3525_v30 }
 0x610   :  { %3528 = vmatpush1.bf16.msra.mxu1 %v3527_v23  ;;  %v3127_v19 = vld [vmem:[#allocation7 + $0xc8] sm:$0xff]  ;;  %v3128_v40 = vld [vmem:[#allocation7 + $0xd0] sm:$0xff] }
 0x611   :  { %3530 = vmatprep.subr.bf16.mxu1 %v3529_v6  ;;  %v3513_v29 = vpack.c.bf16 %v3131_v22, %v3127_v19  ;;  %v3531_v58 = vpack.c.bf16 %v3132_v63, %v3128_v40 }
 0x613   :  { %3514 = vmatprep.subr.bf16.mxu0 %v3513_v29 }
 0x614   :  { %3532 = vmatpush1.bf16.msra.mxu1 %v3531_v58  ;;  %v3130_v48 = vld [vmem:[#allocation7 + $0xe0] sm:$0xff] }
 0x615   :  { %v3515_v20 = vpack.c.bf16 %v3130_v48, %v3126_v60 }
 0x616   :  { %v3139_v11 = vpop.permute.xlu0 %3138 }
 0x617   :  { %3516 = vmatpush1.bf16.msra.mxu0 %v3515_v20  ;;  %3407 = vmatmul.mubr.msk.f32.vlgmr.msra.gmra.mrb[6].mxu1 %vm3146_vm9, %v3100_v32 }
 0x618   :  { %3300 = vmatprep.mubr.f32.mxu1 %v3661_v2 }
 0x61a   :  { %3405 = vmatmul.mubr.msk.f32.vlgmr.msra.gmra.mrb[6].mxu0 %vm3146_vm9, %v3100_v32 }
 0x61b   :  { %3408 = vmatmul.mubr.msk.f32.gmra.mrb[8].mxu1 %vm3146_vm9, %v3101_v8  ;;  %3223 = vmatprep.mubr.f32.mxu0 %v3661_v2 }
 0x61c   :  { %v3144_v33 = vpop.permute.xlu1 %3143 }
 0x61e   :  { %3406 = vmatmul.mubr.msk.f32.gmra.mrb[8].mxu0 %vm3146_vm9, %v3101_v8 }
 0x6ea   :  { %v3296_v24 = vpop.f32.mrb[6].mxu1 }
 0x6eb   :  { %v3297_v3 = vadd.f32 %v3296_v24, %v3139_v11  ;;  %v3298_v49 = vpop.f32.mrb[7].mxu1 }
 0x6ec   :  { %v3299_v50 = vadd.f32 %v3298_v49, %v3139_v11 }
 0x6ed   :  { %v3309_v59 = vsub.f32 0.0, %v3297_v3  ;;  %v3219_v27 = vpop.f32.mrb[6].mxu0 }
 0x6ee   :  { %v3310_v4 = vsub.f32 0.0, %v3299_v50  ;;  %v3220_v51 = vadd.f32 %v3219_v27, %v3139_v11  ;;  %v3221_v37 = vpop.f32.mrb[7].mxu0  ;;  %v3302_v47 = vpop.f32.mrb[8].mxu1 }
 0x6ef   :  { %v3319_v38 = vmul.f32 1.442695, %v3309_v59  ;;  %v3222_v1 = vadd.f32 %v3221_v37, %v3139_v11  ;;  %v3303_v10 = vadd.f32 %v3302_v47, %v3144_v33  ;;  %v3304_v44 = vpop.f32.mrb[9].mxu1 }
 0x6f0   :  { %v3321_v52 = vmul.f32 1.442695, %v3310_v4  ;;  %v3307_v45 = vsub.f32 0.0, %v3220_v51  ;;  %v3305_v2 = vadd.f32 %v3304_v44, %v3144_v33 }
 0x6f1   :  { %3629 = vpow2.f32 %v3319_v38  ;;  %v3308_v42 = vsub.f32 0.0, %v3222_v1  ;;  %v3313_v25 = vsub.f32 0.0, %v3303_v10  ;;  %v3225_v35 = vpop.f32.mrb[8].mxu0 }
 0x6f2   :  { %3631 = vpow2.f32 %v3321_v52  ;;  %v3315_v21 = vmul.f32 1.442695, %v3307_v45  ;;  %v3314_v15 = vsub.f32 0.0, %v3305_v2  ;;  %v3226_v13 = vadd.f32 %v3225_v35, %v3144_v33  ;;  %v3227_v46 = vpop.f32.mrb[9].mxu0 }
 0x6f3   :  { %v3317_v56 = vmul.f32 1.442695, %v3308_v42  ;;  %v3327_v62 = vmul.f32 1.442695, %v3313_v25  ;;  %v3228_v17 = vadd.f32 %v3227_v46, %v3144_v33 }
 0x6f4   :  { %3633 = vpow2.f32 %v3315_v21  ;;  %v3329_v41 = vmul.f32 1.442695, %v3314_v15  ;;  %v3311_v36 = vsub.f32 0.0, %v3226_v13 }
 0x6f5   :  { %3635 = vpow2.f32 %v3317_v56  ;;  %v3312_v57 = vsub.f32 0.0, %v3228_v17 }
 0x6f6   :  { %3637 = vpow2.f32 %v3327_v62  ;;  %v3323_v61 = vmul.f32 1.442695, %v3311_v36 }
 0x6f7   :  { %3639 = vpow2.f32 %v3329_v41  ;;  %v3325_v7 = vmul.f32 1.442695, %v3312_v57 }
 0x6f8   :  { %3641 = vpow2.f32 %v3323_v61 }
 0x6f9   :  { %3643 = vpow2.f32 %v3325_v7 }
 0x6fb   :  { %v3630_v53 = vpop.eup %3629 }
 0x6fc   :  { %v3632_v5 = vpop.eup %3631  ;;  %v3333_v14 = vadd.f32 1.0, %v3630_v53 }
 0x6fd   :  { %v3334_v39 = vadd.f32 1.0, %v3632_v5 }
 0x6fe   :  { %v3634_v34 = vpop.eup %3633  ;;  %3645 = vrcp.f32 %v3333_v14 }
 0x6ff   :  { %v3636_v31 = vpop.eup %3635  ;;  %3647 = vrcp.f32 %v3334_v39  ;;  %v3331_v54 = vadd.f32 1.0, %v3634_v34 }
 0x700   :  { %v3638_v9 = vpop.eup %3637  ;;  %v3332_v0 = vadd.f32 1.0, %v3636_v31 }
 0x701   :  { %v3640_v28 = vpop.eup %3639  ;;  %3649 = vrcp.f32 %v3331_v54  ;;  %v3337_v12 = vadd.f32 1.0, %v3638_v9 }
 0x702   :  { %v3642_v55 = vpop.eup %3641  ;;  %3651 = vrcp.f32 %v3332_v0  ;;  %v3338_v18 = vadd.f32 1.0, %v3640_v28 }
 0x703   :  { %v3644_v16 = vpop.eup %3643  ;;  %3653 = vrcp.f32 %v3337_v12  ;;  %v3335_v26 = vadd.f32 1.0, %v3642_v55 }
 0x704   :  { %3655 = vrcp.f32 %v3338_v18  ;;  %v3336_v30 = vadd.f32 1.0, %v3644_v16 }
 0x705   :  { %3657 = vrcp.f32 %v3335_v26 }
 0x706   :  { %3659 = vrcp.f32 %v3336_v30 }
 0x708   :  { %v3646_v23 = vpop.eup %3645 }
 0x709   :  { %v3648_v43 = vpop.eup %3647  ;;  %3357 = vst [vmem:[%s5189_s8 + $0x50] sm:$0xff] %v3646_v23 }
 0x70a   :  { %3358 = vst [vmem:[%s5189_s8 + $0x58] sm:$0xff] %v3648_v43 }
 0x70b   :  { %v3650_v6 = vpop.eup %3649 }
 0x70c   :  { %v3652_v22 = vpop.eup %3651  ;;  %3355 = vst [vmem:[%s5189_s8 + $0x40] sm:$0xff] %v3650_v6 }
 0x70d   :  { %v3654_v19 = vpop.eup %3653  ;;  %3356 = vst [vmem:[%s5189_s8 + $0x48] sm:$0xff] %v3652_v22 }
 0x70e   :  { %v3656_v40 = vpop.eup %3655  ;;  %3361 = vst [vmem:[%s5189_s8 + $0x70] sm:$0xf] %v3654_v19 }
 0x70f   :  { %v3658_v63 = vpop.eup %3657  ;;  %3362 = vst [vmem:[%s5189_s8 + $0x78] sm:$0xf] %v3656_v40 }
 0x710   :  { %v3660_v29 = vpop.eup %3659  ;;  %3359 = vst [vmem:[%s5189_s8 + $0x60] sm:$0xf] %v3658_v63 }
 0x711   :  { %3360 = vst [vmem:[%s5189_s8 + $0x68] sm:$0xf] %v3660_v29 }

</bundles_post_ra>
